<compile_context>
chip_gen: v6e
topology: v6e:2x2x1
jax: 0.10.0
libtpu: 0.0.40
codegen_flags: <defaults>
</compile_context>

<pallas_src>
import jax
import jax.numpy as jnp
from jax import lax
from jax.experimental import pallas as pl
from jax.experimental.pallas import tpu as pltpu


# ----------------------------------------------------------------------------
# Bidirectional GRU kernel: time-tiled grid, hidden state carried in scratch.
# ----------------------------------------------------------------------------
def _bigru_kernel(xf_ref, xb_ref, mf_ref, mb_ref,
                  wif_ref, whf_ref, bprf_ref, bhnf_ref,
                  wib_ref, whb_ref, bprb_ref, bhnb_ref,
                  of_ref, ob_ref,
                  hf_sc, hb_sc, xgf_sc, xgb_sc):
    ct, Bp, E = xf_ref.shape
    H = bhnf_ref.shape[-1]

    @pl.when(pl.program_id(0) == 0)
    def _():
        hf_sc[...] = jnp.zeros_like(hf_sc)
        hb_sc[...] = jnp.zeros_like(hb_sc)

    # Hoisted input projection: one (ct*Bp, E) @ (E, 3H) bf16 GEMM per
    # direction for the whole chunk; r/z biases are pre-folded (bi+bh).
    xf2 = xf_ref[...].reshape(ct * Bp, E)
    xb2 = xb_ref[...].reshape(ct * Bp, E)
    xgf_sc[...] = (jnp.dot(xf2, wif_ref[...], preferred_element_type=jnp.float32)
                   + bprf_ref[...]).reshape(ct, Bp, 3 * H)
    xgb_sc[...] = (jnp.dot(xb2, wib_ref[...], preferred_element_type=jnp.float32)
                   + bprb_ref[...]).reshape(ct, Bp, 3 * H)

    def gru_step(gi, m, h, wh_ref, bhn_ref):
        # Single fused recurrent matmul per step (bf16 operands, f32 acc).
        gh = jnp.dot(h.astype(jnp.bfloat16), wh_ref[...],
                     preferred_element_type=jnp.float32)          # (Bp, 3H)
        r = jax.nn.sigmoid(gi[:, :H] + gh[:, :H])
        z = jax.nn.sigmoid(gi[:, H:2 * H] + gh[:, H:2 * H])
        n = jnp.tanh(gi[:, 2 * H:] + r * (gh[:, 2 * H:] + bhn_ref[...]))
        h_new = (1.0 - z) * n + z * h
        # pack_padded_sequence emulation: freeze state and zero output on pad.
        h_new = jnp.where(m > 0.0, h_new, h)
        out = jnp.where(m > 0.0, h_new, jnp.zeros_like(h_new))
        return h_new, out

    def body(t, carry):
        hf, hb = carry
        tb = ct - 1 - t
        # forward direction (chunk-local time t)
        hf, outf = gru_step(xgf_sc[t], mf_ref[t], hf, whf_ref, bhnf_ref)
        of_ref[t] = outf.astype(of_ref.dtype)
        # backward direction (chunk-local time ct-1-t of the reversed chunk)
        hb, outb = gru_step(xgb_sc[tb], mb_ref[tb], hb, whb_ref, bhnb_ref)
        ob_ref[tb] = outb.astype(ob_ref.dtype)
        return (hf, hb)

    hf, hb = lax.fori_loop(0, ct, body, (hf_sc[...], hb_sc[...]), unroll=True)
    hf_sc[...] = hf
    hb_sc[...] = hb


def bigru(x_tbe, mask_tb1, gru_params, hidden, chunk_t):
    T, Bp, E = x_tbe.shape
    H = hidden
    nct = T // chunk_t
    (wif, whf, bprf, bhnf, wib, whb, bprb, bhnb) = gru_params

    grid_spec = pltpu.PrefetchScalarGridSpec(
        num_scalar_prefetch=0,
        grid=(nct,),
        in_specs=[
            pl.BlockSpec((chunk_t, Bp, E), lambda i: (i, 0, 0)),            # x fwd
            pl.BlockSpec((chunk_t, Bp, E), lambda i: (nct - 1 - i, 0, 0)),  # x bwd
            pl.BlockSpec((chunk_t, Bp, 1), lambda i: (i, 0, 0)),            # m fwd
            pl.BlockSpec((chunk_t, Bp, 1), lambda i: (nct - 1 - i, 0, 0)),  # m bwd
            pl.BlockSpec(wif.shape, lambda i: (0, 0)),
            pl.BlockSpec(whf.shape, lambda i: (0, 0)),
            pl.BlockSpec(bprf.shape, lambda i: (0, 0)),
            pl.BlockSpec(bhnf.shape, lambda i: (0, 0)),
            pl.BlockSpec(wib.shape, lambda i: (0, 0)),
            pl.BlockSpec(whb.shape, lambda i: (0, 0)),
            pl.BlockSpec(bprb.shape, lambda i: (0, 0)),
            pl.BlockSpec(bhnb.shape, lambda i: (0, 0)),
        ],
        out_specs=[
            pl.BlockSpec((chunk_t, Bp, H), lambda i: (i, 0, 0)),            # out fwd
            pl.BlockSpec((chunk_t, Bp, H), lambda i: (nct - 1 - i, 0, 0)),  # out bwd
        ],
        scratch_shapes=[
            pltpu.VMEM((Bp, H), jnp.float32),              # fwd hidden state
            pltpu.VMEM((Bp, H), jnp.float32),              # bwd hidden state
            pltpu.VMEM((chunk_t, Bp, 3 * H), jnp.float32),  # fwd gate inputs
            pltpu.VMEM((chunk_t, Bp, 3 * H), jnp.float32),  # bwd gate inputs
        ],
    )

    of, ob = pl.pallas_call(
        _bigru_kernel,
        grid_spec=grid_spec,
        out_shape=(jax.ShapeDtypeStruct((T, Bp, H), jnp.bfloat16),
                   jax.ShapeDtypeStruct((T, Bp, H), jnp.bfloat16)),
        compiler_params=pltpu.CompilerParams(
            dimension_semantics=("arbitrary",),          # sequential recurrence
            vmem_limit_bytes=32 * 1024 * 1024),
    )(x_tbe, x_tbe, mask_tb1, mask_tb1,
      wif, whf, bprf, bhnf, wib, whb, bprb, bhnb)
    return of, ob


def encoder_forward(seq, mask, emb_bf16, gru_params, hidden):
    """Embedding gather (directly in (T,B,E) order) + tiled bidirectional GRU."""
    Bc, T = seq.shape
    x = jnp.take(emb_bf16, seq.T, axis=0)                        # (T, Bc, E) bf16
    m = mask.T.astype(jnp.float32)[:, :, None]                   # (T, Bc, 1)

    # Pad batch to a multiple of 8 (sublane-full tiles). Padded rows carry
    # mask == 0, so h stays 0 and outputs stay 0; results are unchanged.
    b_pad = ((Bc + 7) // 8) * 8
    if b_pad != Bc:
        x = jnp.pad(x, ((0, 0), (0, b_pad - Bc), (0, 0)))
        m = jnp.pad(m, ((0, 0), (0, b_pad - Bc), (0, 0)))

    chunk_t = 8 if (T >= 8 and T % 8 == 0) else T
    of, ob = bigru(x, m, gru_params, hidden, chunk_t)            # (T, Bp, H) x2
    enc = jnp.concatenate([of, ob], axis=-1)[:, :Bc]             # (T, Bc, 2H)
    return jnp.transpose(enc, (1, 0, 2))                         # (Bc, T, 2H) bf16


# ----------------------------------------------------------------------------
# Attention + FC heads + masked argmax kernel (grid over batch, parallel).
# ----------------------------------------------------------------------------
def _attn_kernel(d_ref, q_ref, qt_ref, dmask_ref,
                 wc_ref, wd_ref, bfc_ref, ws_ref, we_ref, bse_ref,
                 start_ref, end_ref):
    Dv = d_ref[0]                                # (m, 2H) bf16
    Qv = q_ref[0]                                # (n, 2H) bf16
    Qt = qt_ref[0]                               # (2H, n) bf16 (pre-transposed)
    maskv = dmask_ref[0]                         # (m, 1)  f32
    m = Dv.shape[0]

    # A = softmax(D Q^T) over query positions (no query-side masking, as in ref)
    a = jnp.dot(Dv, Qt, preferred_element_type=jnp.float32)       # (m, n) f32
    a = a - jnp.max(a, axis=-1, keepdims=True)
    p = jnp.exp(a)
    p = p * pl.reciprocal(jnp.sum(p, axis=-1, keepdims=True), approx=True)
    Cv = jnp.dot(p.astype(jnp.bfloat16), Qv,
                 preferred_element_type=jnp.float32)              # (m, 2H) f32

    # relu(fc([C, D])) without the lane-dim concat: C@Wc + D@Wd + b.
    bhat = jnp.maximum(
        jnp.dot(Cv.astype(jnp.bfloat16), wc_ref[...],
                preferred_element_type=jnp.float32)
        + jnp.dot(Dv, wd_ref[...], preferred_element_type=jnp.float32)
        + bfc_ref[...], 0.0)                                      # (m, H) f32

    # start/end heads as VPU multiply + lane reduction (no N=2 MXU matmul).
    bse = bse_ref[...]                                            # (1, 2) f32
    neg = (1.0 - maskv) * (-1e30)                                 # (m, 1)
    ls = jnp.sum(bhat * ws_ref[...], axis=-1, keepdims=True) + bse[:, 0:1] + neg
    le = jnp.sum(bhat * we_ref[...], axis=-1, keepdims=True) + bse[:, 1:2] + neg

    iota = lax.broadcasted_iota(jnp.int32, (m, 1), 0)

    def masked_argmax(lg):                       # first-occurrence argmax
        mx = jnp.max(lg, axis=0, keepdims=True)
        return jnp.min(jnp.where(lg >= mx, iota, m),
                       axis=0, keepdims=True).astype(jnp.int32)   # (1, 1)

    start_ref[...] = jnp.broadcast_to(masked_argmax(ls).reshape(1, 1, 1),
                                      start_ref.shape)
    end_ref[...] = jnp.broadcast_to(masked_argmax(le).reshape(1, 1, 1),
                                    end_ref.shape)


def attention_head(D, Q, d_mask, wc, wd, bfc, ws, we, bse):
    B, m, h2 = D.shape
    n = Q.shape[1]
    Qt = jnp.transpose(Q, (0, 2, 1))                              # (B, 2H, n)
    dmask = d_mask.astype(jnp.float32)[:, :, None]                # (B, m, 1)

    grid_spec = pltpu.PrefetchScalarGridSpec(
        num_scalar_prefetch=0,
        grid=(B,),
        in_specs=[
            pl.BlockSpec((1, m, h2), lambda i: (i, 0, 0)),
            pl.BlockSpec((1, n, h2), lambda i: (i, 0, 0)),
            pl.BlockSpec((1, h2, n), lambda i: (i, 0, 0)),
            pl.BlockSpec((1, m, 1), lambda i: (i, 0, 0)),
            pl.BlockSpec(wc.shape, lambda i: (0, 0)),
            pl.BlockSpec(wd.shape, lambda i: (0, 0)),
            pl.BlockSpec(bfc.shape, lambda i: (0, 0)),
            pl.BlockSpec(ws.shape, lambda i: (0, 0)),
            pl.BlockSpec(we.shape, lambda i: (0, 0)),
            pl.BlockSpec(bse.shape, lambda i: (0, 0)),
        ],
        out_specs=[
            pl.BlockSpec((1, 1, 128), lambda i: (i, 0, 0)),
            pl.BlockSpec((1, 1, 128), lambda i: (i, 0, 0)),
        ],
    )

    start, end = pl.pallas_call(
        _attn_kernel,
        grid_spec=grid_spec,
        out_shape=(jax.ShapeDtypeStruct((B, 1, 128), jnp.int32),
                   jax.ShapeDtypeStruct((B, 1, 128), jnp.int32)),
        compiler_params=pltpu.CompilerParams(
            dimension_semantics=("parallel",),
            vmem_limit_bytes=32 * 1024 * 1024),
    )(D, Q, Qt, dmask, wc, wd, bfc, ws, we, bse)
    return start[:, 0, 0], end[:, 0, 0]


# ----------------------------------------------------------------------------
# Full Baseline forward (span=None path).
# ----------------------------------------------------------------------------
def baseline_forward(q_seq, q_mask, d_seq, d_mask, params):
    H = params["hidden"]
    B, Tq = q_seq.shape
    _, Td = d_seq.shape
    T = max(Tq, Td)

    # Single encoder invocation: pad both sequences to T and stack on batch.
    # Extra padded positions have mask 0 (outputs zero, state frozen) and are
    # sliced away afterwards, so the result is identical to two separate runs.
    q_seq_p = jnp.pad(q_seq, ((0, 0), (0, T - Tq)))
    q_mask_p = jnp.pad(q_mask, ((0, 0), (0, T - Tq)))
    d_seq_p = jnp.pad(d_seq, ((0, 0), (0, T - Td)))
    d_mask_p = jnp.pad(d_mask, ((0, 0), (0, T - Td)))
    seq_all = jnp.concatenate([q_seq_p, d_seq_p], axis=0)
    mask_all = jnp.concatenate([q_mask_p, d_mask_p], axis=0)

    enc = encoder_forward(seq_all, mask_all, params["emb"], params["gru"], H)
    Q = enc[:B, :Tq]                                              # (B, Tq, 2H)
    D = enc[B:, :Td]                                              # (B, Td, 2H)
    return attention_head(D, Q, d_mask,
                          params["wc"], params["wd"], params["bfc"],
                          params["ws"], params["we"], params["bse"])


def _uniform(key, shape, scale):
    return jax.random.uniform(key, shape, jnp.float32, -scale, scale)


if __name__ == "__main__":
    V, E, H = 50, 32, 32          # vocab, embedding dim, hidden dim
    B, Tq, Td = 2, 8, 16          # batch, query len, document len

    key = jax.random.PRNGKey(0)
    keys = jax.random.split(key, 20)
    k_scale = 1.0 / jnp.sqrt(float(H))

    # frozen embedding matrix (bf16 operand for the MXU input GEMM)
    emb_matrix = jax.random.normal(keys[0], (V, E), jnp.float32)
    emb_bf16 = emb_matrix.astype(jnp.bfloat16)

    # Bidirectional GRU parameters with fused gates (PyTorch order r|z|n):
    #   wi (E,3H), wh (H,3H) in bf16; r/z biases folded (b_ih+b_hh), the
    #   n-gate recurrent bias kept separate (it is scaled by r).
    def make_gru_dir(ks):
        wi = _uniform(ks[0], (E, 3 * H), k_scale)
        wh = _uniform(ks[1], (H, 3 * H), k_scale)
        bi = _uniform(ks[2], (1, 3 * H), k_scale)
        bh = _uniform(ks[3], (1, 3 * H), k_scale)
        b_pre = jnp.concatenate([bi[:, :2 * H] + bh[:, :2 * H], bi[:, 2 * H:]],
                                axis=1)                        # (1, 3H)
        bh_n = bh[:, 2 * H:]                                   # (1, H)
        return wi.astype(jnp.bfloat16), wh.astype(jnp.bfloat16), b_pre, bh_n

    gru_fwd = make_gru_dir(keys[1:5])
    gru_bwd = make_gru_dir(keys[5:9])
    gru_params = gru_fwd + gru_bwd

    # fc split into the C-half and D-half of the (4H,H) weight (bf16 operands);
    # fc_start / fc_end as (1,H) row vectors (VPU multiply + lane reduce).
    fc_scale = 1.0 / jnp.sqrt(4.0 * H)
    wc = _uniform(keys[9], (2 * H, H), fc_scale).astype(jnp.bfloat16)
    wd = _uniform(keys[10], (2 * H, H), fc_scale).astype(jnp.bfloat16)
    bfc = _uniform(keys[11], (1, H), fc_scale)
    h_scale = 1.0 / jnp.sqrt(float(H))
    ws = _uniform(keys[12], (1, H), h_scale)      # fc_start weight
    we = _uniform(keys[13], (1, H), h_scale)      # fc_end weight
    bse = _uniform(keys[14], (1, 2), h_scale)     # [0,0]=start bias, [0,1]=end

    params = dict(hidden=H, emb=emb_bf16, gru=gru_params,
                  wc=wc, wd=wd, bfc=bfc, ws=ws, we=we, bse=bse)

    # deterministic inputs: token ids + right-padded masks
    q_seq = jax.random.randint(keys[15], (B, Tq), 0, V, jnp.int32)
    d_seq = jax.random.randint(keys[16], (B, Td), 0, V, jnp.int32)
    q_lens = jnp.array([Tq, 5], jnp.int32)
    d_lens = jnp.array([Td, 11], jnp.int32)
    q_mask = (jnp.arange(Tq)[None, :] < q_lens[:, None]).astype(jnp.int32)
    d_mask = (jnp.arange(Td)[None, :] < d_lens[:, None]).astype(jnp.int32)

    start_i, end_i = baseline_forward(q_seq, q_mask, d_seq, d_mask, params)
    jax.block_until_ready((start_i, end_i))
    assert start_i.shape == (B,) and end_i.shape == (B,)
    assert start_i.dtype == jnp.int32 and end_i.dtype == jnp.int32
    print("KERNEL_OK")
</pallas_src>

<mosaic_0001>
module attributes {stable_mosaic.version = 11 : i64} {
  func.func @_bigru_kernel(%arg0: i32, %arg1: memref<8x8x32xbf16, #tpu.memory_space<vmem>>, %arg2: memref<8x8x32xbf16, #tpu.memory_space<vmem>>, %arg3: memref<8x8x1xf32, #tpu.memory_space<vmem>>, %arg4: memref<8x8x1xf32, #tpu.memory_space<vmem>>, %arg5: memref<32x96xbf16, #tpu.memory_space<vmem>>, %arg6: memref<32x96xbf16, #tpu.memory_space<vmem>>, %arg7: memref<1x96xf32, #tpu.memory_space<vmem>>, %arg8: memref<1x32xf32, #tpu.memory_space<vmem>>, %arg9: memref<32x96xbf16, #tpu.memory_space<vmem>>, %arg10: memref<32x96xbf16, #tpu.memory_space<vmem>>, %arg11: memref<1x96xf32, #tpu.memory_space<vmem>>, %arg12: memref<1x32xf32, #tpu.memory_space<vmem>>, %arg13: memref<8x8x32xbf16, #tpu.memory_space<vmem>>, %arg14: memref<8x8x32xbf16, #tpu.memory_space<vmem>>, %arg15: memref<8x32xf32, #tpu.memory_space<vmem>>, %arg16: memref<8x32xf32, #tpu.memory_space<vmem>>, %arg17: memref<8x8x96xf32, #tpu.memory_space<vmem>>, %arg18: memref<8x8x96xf32, #tpu.memory_space<vmem>>) attributes {dimension_semantics = [#tpu.dimension_semantics<arbitrary>], iteration_bounds = array<i64: 2>, scalar_prefetch = 0 : i64, scratch_operands = 4 : i64, tpu.core_type = #tpu.core_type<tc>, window_params = [{transform_indices = @transform_0, window_bounds = array<i64: 8, 8, 32>}, {transform_indices = @transform_1, window_bounds = array<i64: 8, 8, 32>}, {transform_indices = @transform_2, window_bounds = array<i64: 8, 8, 1>}, {transform_indices = @transform_3, window_bounds = array<i64: 8, 8, 1>}, {pipeline_mode = #tpu.pipeline_mode<synchronous>, transform_indices = @transform_4, window_bounds = array<i64: 32, 96>}, {pipeline_mode = #tpu.pipeline_mode<synchronous>, transform_indices = @transform_5, window_bounds = array<i64: 32, 96>}, {pipeline_mode = #tpu.pipeline_mode<synchronous>, transform_indices = @transform_6, window_bounds = array<i64: 1, 96>}, {pipeline_mode = #tpu.pipeline_mode<synchronous>, transform_indices = @transform_7, window_bounds = array<i64: 1, 32>}, {pipeline_mode = #tpu.pipeline_mode<synchronous>, transform_indices = @transform_8, window_bounds = array<i64: 32, 96>}, {pipeline_mode = #tpu.pipeline_mode<synchronous>, transform_indices = @transform_9, window_bounds = array<i64: 32, 96>}, {pipeline_mode = #tpu.pipeline_mode<synchronous>, transform_indices = @transform_10, window_bounds = array<i64: 1, 96>}, {pipeline_mode = #tpu.pipeline_mode<synchronous>, transform_indices = @transform_11, window_bounds = array<i64: 1, 32>}, {transform_indices = @transform_12, window_bounds = array<i64: 8, 8, 32>}, {transform_indices = @transform_13, window_bounds = array<i64: 8, 8, 32>}]} {
    %c0_i32 = arith.constant 0 : i32
    %0 = arith.cmpi eq, %arg0, %c0_i32 : i32
    %1 = arith.extui %0 : i1 to i32
    %c0_i32_0 = arith.constant 0 : i32
    %2 = arith.cmpi ne, %1, %c0_i32_0 : i32
    scf.if %2 {
      %cst_310 = arith.constant 0.000000e+00 : f32
      %897 = vector.broadcast %cst_310 : f32 to vector<8x32xf32>
      %c0_311 = arith.constant 0 : index
      %c0_312 = arith.constant 0 : index
      %898 = vector.load %arg15[%c0_311, %c0_312] : memref<8x32xf32, #tpu.memory_space<vmem>>, vector<8x32xf32>
      tpu.vector_store %arg15[%c0_311, %c0_312], %897 {strides = array<i32>} : memref<8x32xf32, #tpu.memory_space<vmem>>, vector<8x32xf32>,
      %cst_313 = arith.constant 0.000000e+00 : f32
      %899 = vector.broadcast %cst_313 : f32 to vector<8x32xf32>
      %c0_314 = arith.constant 0 : index
      %c0_315 = arith.constant 0 : index
      %900 = vector.load %arg16[%c0_314, %c0_315] : memref<8x32xf32, #tpu.memory_space<vmem>>, vector<8x32xf32>
      tpu.vector_store %arg16[%c0_314, %c0_315], %899 {strides = array<i32>} : memref<8x32xf32, #tpu.memory_space<vmem>>, vector<8x32xf32>,
    } else {
    }
    %c0 = arith.constant 0 : index
    %c0_1 = arith.constant 0 : index
    %c0_2 = arith.constant 0 : index
    %3 = vector.load %arg1[%c0, %c0_1, %c0_2] : memref<8x8x32xbf16, #tpu.memory_space<vmem>>, vector<8x8x32xbf16>
    %4 = vector.shape_cast %3 : vector<8x8x32xbf16> to vector<64x32xbf16>
    %c0_3 = arith.constant 0 : index
    %c0_4 = arith.constant 0 : index
    %c0_5 = arith.constant 0 : index
    %5 = vector.load %arg2[%c0_3, %c0_4, %c0_5] : memref<8x8x32xbf16, #tpu.memory_space<vmem>>, vector<8x8x32xbf16>
    %6 = vector.shape_cast %5 : vector<8x8x32xbf16> to vector<64x32xbf16>
    %c0_6 = arith.constant 0 : index
    %c0_7 = arith.constant 0 : index
    %7 = vector.load %arg5[%c0_6, %c0_7] : memref<32x96xbf16, #tpu.memory_space<vmem>>, vector<32x96xbf16>
    %cst = arith.constant dense<0.000000e+00> : vector<64x96xf32>
    %8 = tpu.matmul %4, %7, %cst {dimension_numbers = #tpu.dot_dimension_numbers<[1], [0], [0], [1], [0, 0, 1, 1], [], []>} : vector<64x32xbf16>, vector<32x96xbf16>, vector<64x96xf32> -> vector<64x96xf32>
    %c0_8 = arith.constant 0 : index
    %c0_9 = arith.constant 0 : index
    %9 = vector.load %arg7[%c0_8, %c0_9] : memref<1x96xf32, #tpu.memory_space<vmem>>, vector<1x96xf32>
    %10 = vector.broadcast %9 : vector<1x96xf32> to vector<64x96xf32>
    %11 = arith.addf %8, %10 : vector<64x96xf32>
    %12 = vector.shape_cast %11 : vector<64x96xf32> to vector<8x8x96xf32>
    %c0_10 = arith.constant 0 : index
    %c0_11 = arith.constant 0 : index
    %c0_12 = arith.constant 0 : index
    %13 = vector.load %arg17[%c0_10, %c0_11, %c0_12] : memref<8x8x96xf32, #tpu.memory_space<vmem>>, vector<8x8x96xf32>
    tpu.vector_store %arg17[%c0_10, %c0_11, %c0_12], %12 {strides = array<i32>} : memref<8x8x96xf32, #tpu.memory_space<vmem>>, vector<8x8x96xf32>,
    %c0_13 = arith.constant 0 : index
    %c0_14 = arith.constant 0 : index
    %14 = vector.load %arg9[%c0_13, %c0_14] : memref<32x96xbf16, #tpu.memory_space<vmem>>, vector<32x96xbf16>
    %cst_15 = arith.constant dense<0.000000e+00> : vector<64x96xf32>
    %15 = tpu.matmul %6, %14, %cst_15 {dimension_numbers = #tpu.dot_dimension_numbers<[1], [0], [0], [1], [0, 0, 1, 1], [], []>} : vector<64x32xbf16>, vector<32x96xbf16>, vector<64x96xf32> -> vector<64x96xf32>
    %c0_16 = arith.constant 0 : index
    %c0_17 = arith.constant 0 : index
    %16 = vector.load %arg11[%c0_16, %c0_17] : memref<1x96xf32, #tpu.memory_space<vmem>>, vector<1x96xf32>
    %17 = vector.broadcast %16 : vector<1x96xf32> to vector<64x96xf32>
    %18 = arith.addf %15, %17 : vector<64x96xf32>
    %19 = vector.shape_cast %18 : vector<64x96xf32> to vector<8x8x96xf32>
    %c0_18 = arith.constant 0 : index
    %c0_19 = arith.constant 0 : index
    %c0_20 = arith.constant 0 : index
    %20 = vector.load %arg18[%c0_18, %c0_19, %c0_20] : memref<8x8x96xf32, #tpu.memory_space<vmem>>, vector<8x8x96xf32>
    tpu.vector_store %arg18[%c0_18, %c0_19, %c0_20], %19 {strides = array<i32>} : memref<8x8x96xf32, #tpu.memory_space<vmem>>, vector<8x8x96xf32>,
    %c0_21 = arith.constant 0 : index
    %c0_22 = arith.constant 0 : index
    %21 = vector.load %arg15[%c0_21, %c0_22] : memref<8x32xf32, #tpu.memory_space<vmem>>, vector<8x32xf32>
    %c0_23 = arith.constant 0 : index
    %c0_24 = arith.constant 0 : index
    %22 = vector.load %arg16[%c0_23, %c0_24] : memref<8x32xf32, #tpu.memory_space<vmem>>, vector<8x32xf32>
    %c0_i32_25 = arith.constant 0 : i32
    %c7_i32 = arith.constant 7 : i32
    %23 = arith.subi %c7_i32, %c0_i32_25 : i32
    %24 = arith.index_cast %c0_i32_25 : i32 to index
    %c0_26 = arith.constant 0 : index
    %c0_27 = arith.constant 0 : index
    %25 = vector.load %arg17[%24, %c0_26, %c0_27] : memref<8x8x96xf32, #tpu.memory_space<vmem>>, vector<1x8x96xf32>
    %26 = vector.shape_cast %25 : vector<1x8x96xf32> to vector<8x96xf32>
    %27 = arith.index_cast %c0_i32_25 : i32 to index
    %c0_28 = arith.constant 0 : index
    %c0_29 = arith.constant 0 : index
    %28 = vector.load %arg3[%27, %c0_28, %c0_29] : memref<8x8x1xf32, #tpu.memory_space<vmem>>, vector<1x8x1xf32>
    %29 = vector.shape_cast %28 : vector<1x8x1xf32> to vector<8x1xf32>
    %30 = arith.truncf %21 : vector<8x32xf32> to vector<8x32xbf16>
    %c0_30 = arith.constant 0 : index
    %c0_31 = arith.constant 0 : index
    %31 = vector.load %arg6[%c0_30, %c0_31] : memref<32x96xbf16, #tpu.memory_space<vmem>>, vector<32x96xbf16>
    %cst_32 = arith.constant dense<0.000000e+00> : vector<8x96xf32>
    %32 = tpu.matmul %30, %31, %cst_32 {dimension_numbers = #tpu.dot_dimension_numbers<[1], [0], [0], [1], [0, 0, 1, 1], [], []>} : vector<8x32xbf16>, vector<32x96xbf16>, vector<8x96xf32> -> vector<8x96xf32>
    %33 = vector.extract_strided_slice %26 {offsets = [0, 0], sizes = [8, 32], strides = [1, 1]} : vector<8x96xf32> to vector<8x32xf32>
    %34 = vector.extract_strided_slice %32 {offsets = [0, 0], sizes = [8, 32], strides = [1, 1]} : vector<8x96xf32> to vector<8x32xf32>
    %35 = arith.addf %33, %34 : vector<8x32xf32>
    %36 = arith.negf %35 : vector<8x32xf32>
    %37 = math.exp %36 : vector<8x32xf32>
    %cst_33 = arith.constant 1.000000e+00 : f32
    %38 = vector.broadcast %cst_33 : f32 to vector<8x32xf32>
    %39 = arith.addf %38, %37 : vector<8x32xf32>
    %40 = arith.divf %38, %39 : vector<8x32xf32>
    %41 = vector.extract_strided_slice %26 {offsets = [0, 32], sizes = [8, 32], strides = [1, 1]} : vector<8x96xf32> to vector<8x32xf32>
    %42 = vector.extract_strided_slice %32 {offsets = [0, 32], sizes = [8, 32], strides = [1, 1]} : vector<8x96xf32> to vector<8x32xf32>
    %43 = arith.addf %41, %42 : vector<8x32xf32>
    %44 = arith.negf %43 : vector<8x32xf32>
    %45 = math.exp %44 : vector<8x32xf32>
    %cst_34 = arith.constant 1.000000e+00 : f32
    %46 = vector.broadcast %cst_34 : f32 to vector<8x32xf32>
    %47 = arith.addf %46, %45 : vector<8x32xf32>
    %48 = arith.divf %46, %47 : vector<8x32xf32>
    %49 = vector.extract_strided_slice %26 {offsets = [0, 64], sizes = [8, 32], strides = [1, 1]} : vector<8x96xf32> to vector<8x32xf32>
    %50 = vector.extract_strided_slice %32 {offsets = [0, 64], sizes = [8, 32], strides = [1, 1]} : vector<8x96xf32> to vector<8x32xf32>
    %c0_35 = arith.constant 0 : index
    %c0_36 = arith.constant 0 : index
    %51 = vector.load %arg8[%c0_35, %c0_36] : memref<1x32xf32, #tpu.memory_space<vmem>>, vector<1x32xf32>
    %52 = vector.broadcast %51 : vector<1x32xf32> to vector<8x32xf32>
    %53 = arith.addf %50, %52 : vector<8x32xf32>
    %54 = arith.mulf %40, %53 : vector<8x32xf32>
    %55 = arith.addf %49, %54 : vector<8x32xf32>
    %56 = math.tanh %55 : vector<8x32xf32>
    %cst_37 = arith.constant 1.000000e+00 : f32
    %57 = vector.broadcast %cst_37 : f32 to vector<8x32xf32>
    %58 = arith.subf %57, %48 : vector<8x32xf32>
    %59 = arith.mulf %58, %56 : vector<8x32xf32>
    %60 = arith.mulf %48, %21 : vector<8x32xf32>
    %61 = arith.addf %59, %60 : vector<8x32xf32>
    %cst_38 = arith.constant 0.000000e+00 : f32
    %62 = vector.broadcast %cst_38 : f32 to vector<8x1xf32>
    %63 = arith.cmpf ogt, %29, %62 : vector<8x1xf32>
    %64 = vector.shape_cast %63 : vector<8x1xi1> to vector<8x1xi1>
    %65 = vector.broadcast %64 : vector<8x1xi1> to vector<8x32xi1>
    %66 = arith.select %65, %61, %21 : vector<8x32xi1>, vector<8x32xf32>
    %cst_39 = arith.constant 0.000000e+00 : f32
    %67 = vector.broadcast %cst_39 : f32 to vector<8x1xf32>
    %68 = arith.cmpf ogt, %29, %67 : vector<8x1xf32>
    %cst_40 = arith.constant 0.000000e+00 : f32
    %69 = vector.broadcast %cst_40 : f32 to vector<8x32xf32>
    %70 = vector.shape_cast %68 : vector<8x1xi1> to vector<8x1xi1>
    %71 = vector.broadcast %70 : vector<8x1xi1> to vector<8x32xi1>
    %72 = arith.select %71, %66, %69 : vector<8x32xi1>, vector<8x32xf32>
    %73 = arith.truncf %72 : vector<8x32xf32> to vector<8x32xbf16>
    %74 = arith.index_cast %c0_i32_25 : i32 to index
    %c0_41 = arith.constant 0 : index
    %c0_42 = arith.constant 0 : index
    %75 = vector.load %arg13[%74, %c0_41, %c0_42] : memref<8x8x32xbf16, #tpu.memory_space<vmem>>, vector<1x8x32xbf16>
    %76 = vector.shape_cast %75 : vector<1x8x32xbf16> to vector<8x32xbf16>
    %77 = vector.shape_cast %73 : vector<8x32xbf16> to vector<1x8x32xbf16>
    tpu.vector_store %arg13[%74, %c0_41, %c0_42], %77 {strides = array<i32>} : memref<8x8x32xbf16, #tpu.memory_space<vmem>>, vector<1x8x32xbf16>,
    %78 = arith.index_cast %23 : i32 to index
    %c0_43 = arith.constant 0 : index
    %c0_44 = arith.constant 0 : index
    %79 = vector.load %arg18[%78, %c0_43, %c0_44] : memref<8x8x96xf32, #tpu.memory_space<vmem>>, vector<1x8x96xf32>
    %80 = vector.shape_cast %79 : vector<1x8x96xf32> to vector<8x96xf32>
    %81 = arith.index_cast %23 : i32 to index
    %c0_45 = arith.constant 0 : index
    %c0_46 = arith.constant 0 : index
    %82 = vector.load %arg4[%81, %c0_45, %c0_46] : memref<8x8x1xf32, #tpu.memory_space<vmem>>, vector<1x8x1xf32>
    %83 = vector.shape_cast %82 : vector<1x8x1xf32> to vector<8x1xf32>
    %84 = arith.truncf %22 : vector<8x32xf32> to vector<8x32xbf16>
    %c0_47 = arith.constant 0 : index
    %c0_48 = arith.constant 0 : index
    %85 = vector.load %arg10[%c0_47, %c0_48] : memref<32x96xbf16, #tpu.memory_space<vmem>>, vector<32x96xbf16>
    %cst_49 = arith.constant dense<0.000000e+00> : vector<8x96xf32>
    %86 = tpu.matmul %84, %85, %cst_49 {dimension_numbers = #tpu.dot_dimension_numbers<[1], [0], [0], [1], [0, 0, 1, 1], [], []>} : vector<8x32xbf16>, vector<32x96xbf16>, vector<8x96xf32> -> vector<8x96xf32>
    %87 = vector.extract_strided_slice %80 {offsets = [0, 0], sizes = [8, 32], strides = [1, 1]} : vector<8x96xf32> to vector<8x32xf32>
    %88 = vector.extract_strided_slice %86 {offsets = [0, 0], sizes = [8, 32], strides = [1, 1]} : vector<8x96xf32> to vector<8x32xf32>
    %89 = arith.addf %87, %88 : vector<8x32xf32>
    %90 = arith.negf %89 : vector<8x32xf32>
    %91 = math.exp %90 : vector<8x32xf32>
    %cst_50 = arith.constant 1.000000e+00 : f32
    %92 = vector.broadcast %cst_50 : f32 to vector<8x32xf32>
    %93 = arith.addf %92, %91 : vector<8x32xf32>
    %94 = arith.divf %92, %93 : vector<8x32xf32>
    %95 = vector.extract_strided_slice %80 {offsets = [0, 32], sizes = [8, 32], strides = [1, 1]} : vector<8x96xf32> to vector<8x32xf32>
    %96 = vector.extract_strided_slice %86 {offsets = [0, 32], sizes = [8, 32], strides = [1, 1]} : vector<8x96xf32> to vector<8x32xf32>
    %97 = arith.addf %95, %96 : vector<8x32xf32>
    %98 = arith.negf %97 : vector<8x32xf32>
    %99 = math.exp %98 : vector<8x32xf32>
    %cst_51 = arith.constant 1.000000e+00 : f32
    %100 = vector.broadcast %cst_51 : f32 to vector<8x32xf32>
    %101 = arith.addf %100, %99 : vector<8x32xf32>
    %102 = arith.divf %100, %101 : vector<8x32xf32>
    %103 = vector.extract_strided_slice %80 {offsets = [0, 64], sizes = [8, 32], strides = [1, 1]} : vector<8x96xf32> to vector<8x32xf32>
    %104 = vector.extract_strided_slice %86 {offsets = [0, 64], sizes = [8, 32], strides = [1, 1]} : vector<8x96xf32> to vector<8x32xf32>
    %c0_52 = arith.constant 0 : index
    %c0_53 = arith.constant 0 : index
    %105 = vector.load %arg12[%c0_52, %c0_53] : memref<1x32xf32, #tpu.memory_space<vmem>>, vector<1x32xf32>
    %106 = vector.broadcast %105 : vector<1x32xf32> to vector<8x32xf32>
    %107 = arith.addf %104, %106 : vector<8x32xf32>
    %108 = arith.mulf %94, %107 : vector<8x32xf32>
    %109 = arith.addf %103, %108 : vector<8x32xf32>
    %110 = math.tanh %109 : vector<8x32xf32>
    %cst_54 = arith.constant 1.000000e+00 : f32
    %111 = vector.broadcast %cst_54 : f32 to vector<8x32xf32>
    %112 = arith.subf %111, %102 : vector<8x32xf32>
    %113 = arith.mulf %112, %110 : vector<8x32xf32>
    %114 = arith.mulf %102, %22 : vector<8x32xf32>
    %115 = arith.addf %113, %114 : vector<8x32xf32>
    %cst_55 = arith.constant 0.000000e+00 : f32
    %116 = vector.broadcast %cst_55 : f32 to vector<8x1xf32>
    %117 = arith.cmpf ogt, %83, %116 : vector<8x1xf32>
    %118 = vector.shape_cast %117 : vector<8x1xi1> to vector<8x1xi1>
    %119 = vector.broadcast %118 : vector<8x1xi1> to vector<8x32xi1>
    %120 = arith.select %119, %115, %22 : vector<8x32xi1>, vector<8x32xf32>
    %cst_56 = arith.constant 0.000000e+00 : f32
    %121 = vector.broadcast %cst_56 : f32 to vector<8x1xf32>
    %122 = arith.cmpf ogt, %83, %121 : vector<8x1xf32>
    %cst_57 = arith.constant 0.000000e+00 : f32
    %123 = vector.broadcast %cst_57 : f32 to vector<8x32xf32>
    %124 = vector.shape_cast %122 : vector<8x1xi1> to vector<8x1xi1>
    %125 = vector.broadcast %124 : vector<8x1xi1> to vector<8x32xi1>
    %126 = arith.select %125, %120, %123 : vector<8x32xi1>, vector<8x32xf32>
    %127 = arith.truncf %126 : vector<8x32xf32> to vector<8x32xbf16>
    %128 = arith.index_cast %23 : i32 to index
    %c0_58 = arith.constant 0 : index
    %c0_59 = arith.constant 0 : index
    %129 = vector.load %arg14[%128, %c0_58, %c0_59] : memref<8x8x32xbf16, #tpu.memory_space<vmem>>, vector<1x8x32xbf16>
    %130 = vector.shape_cast %129 : vector<1x8x32xbf16> to vector<8x32xbf16>
    %131 = vector.shape_cast %127 : vector<8x32xbf16> to vector<1x8x32xbf16>
    tpu.vector_store %arg14[%128, %c0_58, %c0_59], %131 {strides = array<i32>} : memref<8x8x32xbf16, #tpu.memory_space<vmem>>, vector<1x8x32xbf16>,
    %c1_i32 = arith.constant 1 : i32
    %c7_i32_60 = arith.constant 7 : i32
    %132 = arith.subi %c7_i32_60, %c1_i32 : i32
    %133 = arith.index_cast %c1_i32 : i32 to index
    %c0_61 = arith.constant 0 : index
    %c0_62 = arith.constant 0 : index
    %134 = vector.load %arg17[%133, %c0_61, %c0_62] : memref<8x8x96xf32, #tpu.memory_space<vmem>>, vector<1x8x96xf32>
    %135 = vector.shape_cast %134 : vector<1x8x96xf32> to vector<8x96xf32>
    %136 = arith.index_cast %c1_i32 : i32 to index
    %c0_63 = arith.constant 0 : index
    %c0_64 = arith.constant 0 : index
    %137 = vector.load %arg3[%136, %c0_63, %c0_64] : memref<8x8x1xf32, #tpu.memory_space<vmem>>, vector<1x8x1xf32>
    %138 = vector.shape_cast %137 : vector<1x8x1xf32> to vector<8x1xf32>
    %139 = arith.truncf %66 : vector<8x32xf32> to vector<8x32xbf16>
    %c0_65 = arith.constant 0 : index
    %c0_66 = arith.constant 0 : index
    %140 = vector.load %arg6[%c0_65, %c0_66] : memref<32x96xbf16, #tpu.memory_space<vmem>>, vector<32x96xbf16>
    %cst_67 = arith.constant dense<0.000000e+00> : vector<8x96xf32>
    %141 = tpu.matmul %139, %140, %cst_67 {dimension_numbers = #tpu.dot_dimension_numbers<[1], [0], [0], [1], [0, 0, 1, 1], [], []>} : vector<8x32xbf16>, vector<32x96xbf16>, vector<8x96xf32> -> vector<8x96xf32>
    %142 = vector.extract_strided_slice %135 {offsets = [0, 0], sizes = [8, 32], strides = [1, 1]} : vector<8x96xf32> to vector<8x32xf32>
    %143 = vector.extract_strided_slice %141 {offsets = [0, 0], sizes = [8, 32], strides = [1, 1]} : vector<8x96xf32> to vector<8x32xf32>
    %144 = arith.addf %142, %143 : vector<8x32xf32>
    %145 = arith.negf %144 : vector<8x32xf32>
    %146 = math.exp %145 : vector<8x32xf32>
    %cst_68 = arith.constant 1.000000e+00 : f32
    %147 = vector.broadcast %cst_68 : f32 to vector<8x32xf32>
    %148 = arith.addf %147, %146 : vector<8x32xf32>
    %149 = arith.divf %147, %148 : vector<8x32xf32>
    %150 = vector.extract_strided_slice %135 {offsets = [0, 32], sizes = [8, 32], strides = [1, 1]} : vector<8x96xf32> to vector<8x32xf32>
    %151 = vector.extract_strided_slice %141 {offsets = [0, 32], sizes = [8, 32], strides = [1, 1]} : vector<8x96xf32> to vector<8x32xf32>
    %152 = arith.addf %150, %151 : vector<8x32xf32>
    %153 = arith.negf %152 : vector<8x32xf32>
    %154 = math.exp %153 : vector<8x32xf32>
    %cst_69 = arith.constant 1.000000e+00 : f32
    %155 = vector.broadcast %cst_69 : f32 to vector<8x32xf32>
    %156 = arith.addf %155, %154 : vector<8x32xf32>
    %157 = arith.divf %155, %156 : vector<8x32xf32>
    %158 = vector.extract_strided_slice %135 {offsets = [0, 64], sizes = [8, 32], strides = [1, 1]} : vector<8x96xf32> to vector<8x32xf32>
    %159 = vector.extract_strided_slice %141 {offsets = [0, 64], sizes = [8, 32], strides = [1, 1]} : vector<8x96xf32> to vector<8x32xf32>
    %c0_70 = arith.constant 0 : index
    %c0_71 = arith.constant 0 : index
    %160 = vector.load %arg8[%c0_70, %c0_71] : memref<1x32xf32, #tpu.memory_space<vmem>>, vector<1x32xf32>
    %161 = vector.broadcast %160 : vector<1x32xf32> to vector<8x32xf32>
    %162 = arith.addf %159, %161 : vector<8x32xf32>
    %163 = arith.mulf %149, %162 : vector<8x32xf32>
    %164 = arith.addf %158, %163 : vector<8x32xf32>
    %165 = math.tanh %164 : vector<8x32xf32>
    %cst_72 = arith.constant 1.000000e+00 : f32
    %166 = vector.broadcast %cst_72 : f32 to vector<8x32xf32>
    %167 = arith.subf %166, %157 : vector<8x32xf32>
    %168 = arith.mulf %167, %165 : vector<8x32xf32>
    %169 = arith.mulf %157, %66 : vector<8x32xf32>
    %170 = arith.addf %168, %169 : vector<8x32xf32>
    %cst_73 = arith.constant 0.000000e+00 : f32
    %171 = vector.broadcast %cst_73 : f32 to vector<8x1xf32>
    %172 = arith.cmpf ogt, %138, %171 : vector<8x1xf32>
    %173 = vector.shape_cast %172 : vector<8x1xi1> to vector<8x1xi1>
    %174 = vector.broadcast %173 : vector<8x1xi1> to vector<8x32xi1>
    %175 = arith.select %174, %170, %66 : vector<8x32xi1>, vector<8x32xf32>
    %cst_74 = arith.constant 0.000000e+00 : f32
    %176 = vector.broadcast %cst_74 : f32 to vector<8x1xf32>
    %177 = arith.cmpf ogt, %138, %176 : vector<8x1xf32>
    %cst_75 = arith.constant 0.000000e+00 : f32
    %178 = vector.broadcast %cst_75 : f32 to vector<8x32xf32>
    %179 = vector.shape_cast %177 : vector<8x1xi1> to vector<8x1xi1>
    %180 = vector.broadcast %179 : vector<8x1xi1> to vector<8x32xi1>
    %181 = arith.select %180, %175, %178 : vector<8x32xi1>, vector<8x32xf32>
    %182 = arith.truncf %181 : vector<8x32xf32> to vector<8x32xbf16>
    %183 = arith.index_cast %c1_i32 : i32 to index
    %c0_76 = arith.constant 0 : index
    %c0_77 = arith.constant 0 : index
    %184 = vector.load %arg13[%183, %c0_76, %c0_77] : memref<8x8x32xbf16, #tpu.memory_space<vmem>>, vector<1x8x32xbf16>
    %185 = vector.shape_cast %184 : vector<1x8x32xbf16> to vector<8x32xbf16>
    %186 = vector.shape_cast %182 : vector<8x32xbf16> to vector<1x8x32xbf16>
    tpu.vector_store %arg13[%183, %c0_76, %c0_77], %186 {strides = array<i32>} : memref<8x8x32xbf16, #tpu.memory_space<vmem>>, vector<1x8x32xbf16>,
    %187 = arith.index_cast %132 : i32 to index
    %c0_78 = arith.constant 0 : index
    %c0_79 = arith.constant 0 : index
    %188 = vector.load %arg18[%187, %c0_78, %c0_79] : memref<8x8x96xf32, #tpu.memory_space<vmem>>, vector<1x8x96xf32>
    %189 = vector.shape_cast %188 : vector<1x8x96xf32> to vector<8x96xf32>
    %190 = arith.index_cast %132 : i32 to index
    %c0_80 = arith.constant 0 : index
    %c0_81 = arith.constant 0 : index
    %191 = vector.load %arg4[%190, %c0_80, %c0_81] : memref<8x8x1xf32, #tpu.memory_space<vmem>>, vector<1x8x1xf32>
    %192 = vector.shape_cast %191 : vector<1x8x1xf32> to vector<8x1xf32>
    %193 = arith.truncf %120 : vector<8x32xf32> to vector<8x32xbf16>
    %c0_82 = arith.constant 0 : index
    %c0_83 = arith.constant 0 : index
    %194 = vector.load %arg10[%c0_82, %c0_83] : memref<32x96xbf16, #tpu.memory_space<vmem>>, vector<32x96xbf16>
    %cst_84 = arith.constant dense<0.000000e+00> : vector<8x96xf32>
    %195 = tpu.matmul %193, %194, %cst_84 {dimension_numbers = #tpu.dot_dimension_numbers<[1], [0], [0], [1], [0, 0, 1, 1], [], []>} : vector<8x32xbf16>, vector<32x96xbf16>, vector<8x96xf32> -> vector<8x96xf32>
    %196 = vector.extract_strided_slice %189 {offsets = [0, 0], sizes = [8, 32], strides = [1, 1]} : vector<8x96xf32> to vector<8x32xf32>
    %197 = vector.extract_strided_slice %195 {offsets = [0, 0], sizes = [8, 32], strides = [1, 1]} : vector<8x96xf32> to vector<8x32xf32>
    %198 = arith.addf %196, %197 : vector<8x32xf32>
    %199 = arith.negf %198 : vector<8x32xf32>
    %200 = math.exp %199 : vector<8x32xf32>
    %cst_85 = arith.constant 1.000000e+00 : f32
    %201 = vector.broadcast %cst_85 : f32 to vector<8x32xf32>
    %202 = arith.addf %201, %200 : vector<8x32xf32>
    %203 = arith.divf %201, %202 : vector<8x32xf32>
    %204 = vector.extract_strided_slice %189 {offsets = [0, 32], sizes = [8, 32], strides = [1, 1]} : vector<8x96xf32> to vector<8x32xf32>
    %205 = vector.extract_strided_slice %195 {offsets = [0, 32], sizes = [8, 32], strides = [1, 1]} : vector<8x96xf32> to vector<8x32xf32>
    %206 = arith.addf %204, %205 : vector<8x32xf32>
    %207 = arith.negf %206 : vector<8x32xf32>
    %208 = math.exp %207 : vector<8x32xf32>
    %cst_86 = arith.constant 1.000000e+00 : f32
    %209 = vector.broadcast %cst_86 : f32 to vector<8x32xf32>
    %210 = arith.addf %209, %208 : vector<8x32xf32>
    %211 = arith.divf %209, %210 : vector<8x32xf32>
    %212 = vector.extract_strided_slice %189 {offsets = [0, 64], sizes = [8, 32], strides = [1, 1]} : vector<8x96xf32> to vector<8x32xf32>
    %213 = vector.extract_strided_slice %195 {offsets = [0, 64], sizes = [8, 32], strides = [1, 1]} : vector<8x96xf32> to vector<8x32xf32>
    %c0_87 = arith.constant 0 : index
    %c0_88 = arith.constant 0 : index
    %214 = vector.load %arg12[%c0_87, %c0_88] : memref<1x32xf32, #tpu.memory_space<vmem>>, vector<1x32xf32>
    %215 = vector.broadcast %214 : vector<1x32xf32> to vector<8x32xf32>
    %216 = arith.addf %213, %215 : vector<8x32xf32>
    %217 = arith.mulf %203, %216 : vector<8x32xf32>
    %218 = arith.addf %212, %217 : vector<8x32xf32>
    %219 = math.tanh %218 : vector<8x32xf32>
    %cst_89 = arith.constant 1.000000e+00 : f32
    %220 = vector.broadcast %cst_89 : f32 to vector<8x32xf32>
    %221 = arith.subf %220, %211 : vector<8x32xf32>
    %222 = arith.mulf %221, %219 : vector<8x32xf32>
    %223 = arith.mulf %211, %120 : vector<8x32xf32>
    %224 = arith.addf %222, %223 : vector<8x32xf32>
    %cst_90 = arith.constant 0.000000e+00 : f32
    %225 = vector.broadcast %cst_90 : f32 to vector<8x1xf32>
    %226 = arith.cmpf ogt, %192, %225 : vector<8x1xf32>
    %227 = vector.shape_cast %226 : vector<8x1xi1> to vector<8x1xi1>
    %228 = vector.broadcast %227 : vector<8x1xi1> to vector<8x32xi1>
    %229 = arith.select %228, %224, %120 : vector<8x32xi1>, vector<8x32xf32>
    %cst_91 = arith.constant 0.000000e+00 : f32
    %230 = vector.broadcast %cst_91 : f32 to vector<8x1xf32>
    %231 = arith.cmpf ogt, %192, %230 : vector<8x1xf32>
    %cst_92 = arith.constant 0.000000e+00 : f32
    %232 = vector.broadcast %cst_92 : f32 to vector<8x32xf32>
    %233 = vector.shape_cast %231 : vector<8x1xi1> to vector<8x1xi1>
    %234 = vector.broadcast %233 : vector<8x1xi1> to vector<8x32xi1>
    %235 = arith.select %234, %229, %232 : vector<8x32xi1>, vector<8x32xf32>
    %236 = arith.truncf %235 : vector<8x32xf32> to vector<8x32xbf16>
    %237 = arith.index_cast %132 : i32 to index
    %c0_93 = arith.constant 0 : index
    %c0_94 = arith.constant 0 : index
    %238 = vector.load %arg14[%237, %c0_93, %c0_94] : memref<8x8x32xbf16, #tpu.memory_space<vmem>>, vector<1x8x32xbf16>
    %239 = vector.shape_cast %238 : vector<1x8x32xbf16> to vector<8x32xbf16>
    %240 = vector.shape_cast %236 : vector<8x32xbf16> to vector<1x8x32xbf16>
    tpu.vector_store %arg14[%237, %c0_93, %c0_94], %240 {strides = array<i32>} : memref<8x8x32xbf16, #tpu.memory_space<vmem>>, vector<1x8x32xbf16>,
    %c2_i32 = arith.constant 2 : i32
    %c7_i32_95 = arith.constant 7 : i32
    %241 = arith.subi %c7_i32_95, %c2_i32 : i32
    %242 = arith.index_cast %c2_i32 : i32 to index
    %c0_96 = arith.constant 0 : index
    %c0_97 = arith.constant 0 : index
    %243 = vector.load %arg17[%242, %c0_96, %c0_97] : memref<8x8x96xf32, #tpu.memory_space<vmem>>, vector<1x8x96xf32>
    %244 = vector.shape_cast %243 : vector<1x8x96xf32> to vector<8x96xf32>
    %245 = arith.index_cast %c2_i32 : i32 to index
    %c0_98 = arith.constant 0 : index
    %c0_99 = arith.constant 0 : index
    %246 = vector.load %arg3[%245, %c0_98, %c0_99] : memref<8x8x1xf32, #tpu.memory_space<vmem>>, vector<1x8x1xf32>
    %247 = vector.shape_cast %246 : vector<1x8x1xf32> to vector<8x1xf32>
    %248 = arith.truncf %175 : vector<8x32xf32> to vector<8x32xbf16>
    %c0_100 = arith.constant 0 : index
    %c0_101 = arith.constant 0 : index
    %249 = vector.load %arg6[%c0_100, %c0_101] : memref<32x96xbf16, #tpu.memory_space<vmem>>, vector<32x96xbf16>
    %cst_102 = arith.constant dense<0.000000e+00> : vector<8x96xf32>
    %250 = tpu.matmul %248, %249, %cst_102 {dimension_numbers = #tpu.dot_dimension_numbers<[1], [0], [0], [1], [0, 0, 1, 1], [], []>} : vector<8x32xbf16>, vector<32x96xbf16>, vector<8x96xf32> -> vector<8x96xf32>
    %251 = vector.extract_strided_slice %244 {offsets = [0, 0], sizes = [8, 32], strides = [1, 1]} : vector<8x96xf32> to vector<8x32xf32>
    %252 = vector.extract_strided_slice %250 {offsets = [0, 0], sizes = [8, 32], strides = [1, 1]} : vector<8x96xf32> to vector<8x32xf32>
    %253 = arith.addf %251, %252 : vector<8x32xf32>
    %254 = arith.negf %253 : vector<8x32xf32>
    %255 = math.exp %254 : vector<8x32xf32>
    %cst_103 = arith.constant 1.000000e+00 : f32
    %256 = vector.broadcast %cst_103 : f32 to vector<8x32xf32>
    %257 = arith.addf %256, %255 : vector<8x32xf32>
    %258 = arith.divf %256, %257 : vector<8x32xf32>
    %259 = vector.extract_strided_slice %244 {offsets = [0, 32], sizes = [8, 32], strides = [1, 1]} : vector<8x96xf32> to vector<8x32xf32>
    %260 = vector.extract_strided_slice %250 {offsets = [0, 32], sizes = [8, 32], strides = [1, 1]} : vector<8x96xf32> to vector<8x32xf32>
    %261 = arith.addf %259, %260 : vector<8x32xf32>
    %262 = arith.negf %261 : vector<8x32xf32>
    %263 = math.exp %262 : vector<8x32xf32>
    %cst_104 = arith.constant 1.000000e+00 : f32
    %264 = vector.broadcast %cst_104 : f32 to vector<8x32xf32>
    %265 = arith.addf %264, %263 : vector<8x32xf32>
    %266 = arith.divf %264, %265 : vector<8x32xf32>
    %267 = vector.extract_strided_slice %244 {offsets = [0, 64], sizes = [8, 32], strides = [1, 1]} : vector<8x96xf32> to vector<8x32xf32>
    %268 = vector.extract_strided_slice %250 {offsets = [0, 64], sizes = [8, 32], strides = [1, 1]} : vector<8x96xf32> to vector<8x32xf32>
    %c0_105 = arith.constant 0 : index
    %c0_106 = arith.constant 0 : index
    %269 = vector.load %arg8[%c0_105, %c0_106] : memref<1x32xf32, #tpu.memory_space<vmem>>, vector<1x32xf32>
    %270 = vector.broadcast %269 : vector<1x32xf32> to vector<8x32xf32>
    %271 = arith.addf %268, %270 : vector<8x32xf32>
    %272 = arith.mulf %258, %271 : vector<8x32xf32>
    %273 = arith.addf %267, %272 : vector<8x32xf32>
    %274 = math.tanh %273 : vector<8x32xf32>
    %cst_107 = arith.constant 1.000000e+00 : f32
    %275 = vector.broadcast %cst_107 : f32 to vector<8x32xf32>
    %276 = arith.subf %275, %266 : vector<8x32xf32>
    %277 = arith.mulf %276, %274 : vector<8x32xf32>
    %278 = arith.mulf %266, %175 : vector<8x32xf32>
    %279 = arith.addf %277, %278 : vector<8x32xf32>
    %cst_108 = arith.constant 0.000000e+00 : f32
    %280 = vector.broadcast %cst_108 : f32 to vector<8x1xf32>
    %281 = arith.cmpf ogt, %247, %280 : vector<8x1xf32>
    %282 = vector.shape_cast %281 : vector<8x1xi1> to vector<8x1xi1>
    %283 = vector.broadcast %282 : vector<8x1xi1> to vector<8x32xi1>
    %284 = arith.select %283, %279, %175 : vector<8x32xi1>, vector<8x32xf32>
    %cst_109 = arith.constant 0.000000e+00 : f32
    %285 = vector.broadcast %cst_109 : f32 to vector<8x1xf32>
    %286 = arith.cmpf ogt, %247, %285 : vector<8x1xf32>
    %cst_110 = arith.constant 0.000000e+00 : f32
    %287 = vector.broadcast %cst_110 : f32 to vector<8x32xf32>
    %288 = vector.shape_cast %286 : vector<8x1xi1> to vector<8x1xi1>
    %289 = vector.broadcast %288 : vector<8x1xi1> to vector<8x32xi1>
    %290 = arith.select %289, %284, %287 : vector<8x32xi1>, vector<8x32xf32>
    %291 = arith.truncf %290 : vector<8x32xf32> to vector<8x32xbf16>
    %292 = arith.index_cast %c2_i32 : i32 to index
    %c0_111 = arith.constant 0 : index
    %c0_112 = arith.constant 0 : index
    %293 = vector.load %arg13[%292, %c0_111, %c0_112] : memref<8x8x32xbf16, #tpu.memory_space<vmem>>, vector<1x8x32xbf16>
    %294 = vector.shape_cast %293 : vector<1x8x32xbf16> to vector<8x32xbf16>
    %295 = vector.shape_cast %291 : vector<8x32xbf16> to vector<1x8x32xbf16>
    tpu.vector_store %arg13[%292, %c0_111, %c0_112], %295 {strides = array<i32>} : memref<8x8x32xbf16, #tpu.memory_space<vmem>>, vector<1x8x32xbf16>,
    %296 = arith.index_cast %241 : i32 to index
    %c0_113 = arith.constant 0 : index
    %c0_114 = arith.constant 0 : index
    %297 = vector.load %arg18[%296, %c0_113, %c0_114] : memref<8x8x96xf32, #tpu.memory_space<vmem>>, vector<1x8x96xf32>
    %298 = vector.shape_cast %297 : vector<1x8x96xf32> to vector<8x96xf32>
    %299 = arith.index_cast %241 : i32 to index
    %c0_115 = arith.constant 0 : index
    %c0_116 = arith.constant 0 : index
    %300 = vector.load %arg4[%299, %c0_115, %c0_116] : memref<8x8x1xf32, #tpu.memory_space<vmem>>, vector<1x8x1xf32>
    %301 = vector.shape_cast %300 : vector<1x8x1xf32> to vector<8x1xf32>
    %302 = arith.truncf %229 : vector<8x32xf32> to vector<8x32xbf16>
    %c0_117 = arith.constant 0 : index
    %c0_118 = arith.constant 0 : index
    %303 = vector.load %arg10[%c0_117, %c0_118] : memref<32x96xbf16, #tpu.memory_space<vmem>>, vector<32x96xbf16>
    %cst_119 = arith.constant dense<0.000000e+00> : vector<8x96xf32>
    %304 = tpu.matmul %302, %303, %cst_119 {dimension_numbers = #tpu.dot_dimension_numbers<[1], [0], [0], [1], [0, 0, 1, 1], [], []>} : vector<8x32xbf16>, vector<32x96xbf16>, vector<8x96xf32> -> vector<8x96xf32>
    %305 = vector.extract_strided_slice %298 {offsets = [0, 0], sizes = [8, 32], strides = [1, 1]} : vector<8x96xf32> to vector<8x32xf32>
    %306 = vector.extract_strided_slice %304 {offsets = [0, 0], sizes = [8, 32], strides = [1, 1]} : vector<8x96xf32> to vector<8x32xf32>
    %307 = arith.addf %305, %306 : vector<8x32xf32>
    %308 = arith.negf %307 : vector<8x32xf32>
    %309 = math.exp %308 : vector<8x32xf32>
    %cst_120 = arith.constant 1.000000e+00 : f32
    %310 = vector.broadcast %cst_120 : f32 to vector<8x32xf32>
    %311 = arith.addf %310, %309 : vector<8x32xf32>
    %312 = arith.divf %310, %311 : vector<8x32xf32>
    %313 = vector.extract_strided_slice %298 {offsets = [0, 32], sizes = [8, 32], strides = [1, 1]} : vector<8x96xf32> to vector<8x32xf32>
    %314 = vector.extract_strided_slice %304 {offsets = [0, 32], sizes = [8, 32], strides = [1, 1]} : vector<8x96xf32> to vector<8x32xf32>
    %315 = arith.addf %313, %314 : vector<8x32xf32>
    %316 = arith.negf %315 : vector<8x32xf32>
    %317 = math.exp %316 : vector<8x32xf32>
    %cst_121 = arith.constant 1.000000e+00 : f32
    %318 = vector.broadcast %cst_121 : f32 to vector<8x32xf32>
    %319 = arith.addf %318, %317 : vector<8x32xf32>
    %320 = arith.divf %318, %319 : vector<8x32xf32>
    %321 = vector.extract_strided_slice %298 {offsets = [0, 64], sizes = [8, 32], strides = [1, 1]} : vector<8x96xf32> to vector<8x32xf32>
    %322 = vector.extract_strided_slice %304 {offsets = [0, 64], sizes = [8, 32], strides = [1, 1]} : vector<8x96xf32> to vector<8x32xf32>
    %c0_122 = arith.constant 0 : index
    %c0_123 = arith.constant 0 : index
    %323 = vector.load %arg12[%c0_122, %c0_123] : memref<1x32xf32, #tpu.memory_space<vmem>>, vector<1x32xf32>
    %324 = vector.broadcast %323 : vector<1x32xf32> to vector<8x32xf32>
    %325 = arith.addf %322, %324 : vector<8x32xf32>
    %326 = arith.mulf %312, %325 : vector<8x32xf32>
    %327 = arith.addf %321, %326 : vector<8x32xf32>
    %328 = math.tanh %327 : vector<8x32xf32>
    %cst_124 = arith.constant 1.000000e+00 : f32
    %329 = vector.broadcast %cst_124 : f32 to vector<8x32xf32>
    %330 = arith.subf %329, %320 : vector<8x32xf32>
    %331 = arith.mulf %330, %328 : vector<8x32xf32>
    %332 = arith.mulf %320, %229 : vector<8x32xf32>
    %333 = arith.addf %331, %332 : vector<8x32xf32>
    %cst_125 = arith.constant 0.000000e+00 : f32
    %334 = vector.broadcast %cst_125 : f32 to vector<8x1xf32>
    %335 = arith.cmpf ogt, %301, %334 : vector<8x1xf32>
    %336 = vector.shape_cast %335 : vector<8x1xi1> to vector<8x1xi1>
    %337 = vector.broadcast %336 : vector<8x1xi1> to vector<8x32xi1>
    %338 = arith.select %337, %333, %229 : vector<8x32xi1>, vector<8x32xf32>
    %cst_126 = arith.constant 0.000000e+00 : f32
    %339 = vector.broadcast %cst_126 : f32 to vector<8x1xf32>
    %340 = arith.cmpf ogt, %301, %339 : vector<8x1xf32>
    %cst_127 = arith.constant 0.000000e+00 : f32
    %341 = vector.broadcast %cst_127 : f32 to vector<8x32xf32>
    %342 = vector.shape_cast %340 : vector<8x1xi1> to vector<8x1xi1>
    %343 = vector.broadcast %342 : vector<8x1xi1> to vector<8x32xi1>
    %344 = arith.select %343, %338, %341 : vector<8x32xi1>, vector<8x32xf32>
    %345 = arith.truncf %344 : vector<8x32xf32> to vector<8x32xbf16>
    %346 = arith.index_cast %241 : i32 to index
    %c0_128 = arith.constant 0 : index
    %c0_129 = arith.constant 0 : index
    %347 = vector.load %arg14[%346, %c0_128, %c0_129] : memref<8x8x32xbf16, #tpu.memory_space<vmem>>, vector<1x8x32xbf16>
    %348 = vector.shape_cast %347 : vector<1x8x32xbf16> to vector<8x32xbf16>
    %349 = vector.shape_cast %345 : vector<8x32xbf16> to vector<1x8x32xbf16>
    tpu.vector_store %arg14[%346, %c0_128, %c0_129], %349 {strides = array<i32>} : memref<8x8x32xbf16, #tpu.memory_space<vmem>>, vector<1x8x32xbf16>,
    %c3_i32 = arith.constant 3 : i32
    %c7_i32_130 = arith.constant 7 : i32
    %350 = arith.subi %c7_i32_130, %c3_i32 : i32
    %351 = arith.index_cast %c3_i32 : i32 to index
    %c0_131 = arith.constant 0 : index
    %c0_132 = arith.constant 0 : index
    %352 = vector.load %arg17[%351, %c0_131, %c0_132] : memref<8x8x96xf32, #tpu.memory_space<vmem>>, vector<1x8x96xf32>
    %353 = vector.shape_cast %352 : vector<1x8x96xf32> to vector<8x96xf32>
    %354 = arith.index_cast %c3_i32 : i32 to index
    %c0_133 = arith.constant 0 : index
    %c0_134 = arith.constant 0 : index
    %355 = vector.load %arg3[%354, %c0_133, %c0_134] : memref<8x8x1xf32, #tpu.memory_space<vmem>>, vector<1x8x1xf32>
    %356 = vector.shape_cast %355 : vector<1x8x1xf32> to vector<8x1xf32>
    %357 = arith.truncf %284 : vector<8x32xf32> to vector<8x32xbf16>
    %c0_135 = arith.constant 0 : index
    %c0_136 = arith.constant 0 : index
    %358 = vector.load %arg6[%c0_135, %c0_136] : memref<32x96xbf16, #tpu.memory_space<vmem>>, vector<32x96xbf16>
    %cst_137 = arith.constant dense<0.000000e+00> : vector<8x96xf32>
    %359 = tpu.matmul %357, %358, %cst_137 {dimension_numbers = #tpu.dot_dimension_numbers<[1], [0], [0], [1], [0, 0, 1, 1], [], []>} : vector<8x32xbf16>, vector<32x96xbf16>, vector<8x96xf32> -> vector<8x96xf32>
    %360 = vector.extract_strided_slice %353 {offsets = [0, 0], sizes = [8, 32], strides = [1, 1]} : vector<8x96xf32> to vector<8x32xf32>
    %361 = vector.extract_strided_slice %359 {offsets = [0, 0], sizes = [8, 32], strides = [1, 1]} : vector<8x96xf32> to vector<8x32xf32>
    %362 = arith.addf %360, %361 : vector<8x32xf32>
    %363 = arith.negf %362 : vector<8x32xf32>
    %364 = math.exp %363 : vector<8x32xf32>
    %cst_138 = arith.constant 1.000000e+00 : f32
    %365 = vector.broadcast %cst_138 : f32 to vector<8x32xf32>
    %366 = arith.addf %365, %364 : vector<8x32xf32>
    %367 = arith.divf %365, %366 : vector<8x32xf32>
    %368 = vector.extract_strided_slice %353 {offsets = [0, 32], sizes = [8, 32], strides = [1, 1]} : vector<8x96xf32> to vector<8x32xf32>
    %369 = vector.extract_strided_slice %359 {offsets = [0, 32], sizes = [8, 32], strides = [1, 1]} : vector<8x96xf32> to vector<8x32xf32>
    %370 = arith.addf %368, %369 : vector<8x32xf32>
    %371 = arith.negf %370 : vector<8x32xf32>
    %372 = math.exp %371 : vector<8x32xf32>
    %cst_139 = arith.constant 1.000000e+00 : f32
    %373 = vector.broadcast %cst_139 : f32 to vector<8x32xf32>
    %374 = arith.addf %373, %372 : vector<8x32xf32>
    %375 = arith.divf %373, %374 : vector<8x32xf32>
    %376 = vector.extract_strided_slice %353 {offsets = [0, 64], sizes = [8, 32], strides = [1, 1]} : vector<8x96xf32> to vector<8x32xf32>
    %377 = vector.extract_strided_slice %359 {offsets = [0, 64], sizes = [8, 32], strides = [1, 1]} : vector<8x96xf32> to vector<8x32xf32>
    %c0_140 = arith.constant 0 : index
    %c0_141 = arith.constant 0 : index
    %378 = vector.load %arg8[%c0_140, %c0_141] : memref<1x32xf32, #tpu.memory_space<vmem>>, vector<1x32xf32>
    %379 = vector.broadcast %378 : vector<1x32xf32> to vector<8x32xf32>
    %380 = arith.addf %377, %379 : vector<8x32xf32>
    %381 = arith.mulf %367, %380 : vector<8x32xf32>
    %382 = arith.addf %376, %381 : vector<8x32xf32>
    %383 = math.tanh %382 : vector<8x32xf32>
    %cst_142 = arith.constant 1.000000e+00 : f32
    %384 = vector.broadcast %cst_142 : f32 to vector<8x32xf32>
    %385 = arith.subf %384, %375 : vector<8x32xf32>
    %386 = arith.mulf %385, %383 : vector<8x32xf32>
    %387 = arith.mulf %375, %284 : vector<8x32xf32>
    %388 = arith.addf %386, %387 : vector<8x32xf32>
    %cst_143 = arith.constant 0.000000e+00 : f32
    %389 = vector.broadcast %cst_143 : f32 to vector<8x1xf32>
    %390 = arith.cmpf ogt, %356, %389 : vector<8x1xf32>
    %391 = vector.shape_cast %390 : vector<8x1xi1> to vector<8x1xi1>
    %392 = vector.broadcast %391 : vector<8x1xi1> to vector<8x32xi1>
    %393 = arith.select %392, %388, %284 : vector<8x32xi1>, vector<8x32xf32>
    %cst_144 = arith.constant 0.000000e+00 : f32
    %394 = vector.broadcast %cst_144 : f32 to vector<8x1xf32>
    %395 = arith.cmpf ogt, %356, %394 : vector<8x1xf32>
    %cst_145 = arith.constant 0.000000e+00 : f32
    %396 = vector.broadcast %cst_145 : f32 to vector<8x32xf32>
    %397 = vector.shape_cast %395 : vector<8x1xi1> to vector<8x1xi1>
    %398 = vector.broadcast %397 : vector<8x1xi1> to vector<8x32xi1>
    %399 = arith.select %398, %393, %396 : vector<8x32xi1>, vector<8x32xf32>
    %400 = arith.truncf %399 : vector<8x32xf32> to vector<8x32xbf16>
    %401 = arith.index_cast %c3_i32 : i32 to index
    %c0_146 = arith.constant 0 : index
    %c0_147 = arith.constant 0 : index
    %402 = vector.load %arg13[%401, %c0_146, %c0_147] : memref<8x8x32xbf16, #tpu.memory_space<vmem>>, vector<1x8x32xbf16>
    %403 = vector.shape_cast %402 : vector<1x8x32xbf16> to vector<8x32xbf16>
    %404 = vector.shape_cast %400 : vector<8x32xbf16> to vector<1x8x32xbf16>
    tpu.vector_store %arg13[%401, %c0_146, %c0_147], %404 {strides = array<i32>} : memref<8x8x32xbf16, #tpu.memory_space<vmem>>, vector<1x8x32xbf16>,
    %405 = arith.index_cast %350 : i32 to index
    %c0_148 = arith.constant 0 : index
    %c0_149 = arith.constant 0 : index
    %406 = vector.load %arg18[%405, %c0_148, %c0_149] : memref<8x8x96xf32, #tpu.memory_space<vmem>>, vector<1x8x96xf32>
    %407 = vector.shape_cast %406 : vector<1x8x96xf32> to vector<8x96xf32>
    %408 = arith.index_cast %350 : i32 to index
    %c0_150 = arith.constant 0 : index
    %c0_151 = arith.constant 0 : index
    %409 = vector.load %arg4[%408, %c0_150, %c0_151] : memref<8x8x1xf32, #tpu.memory_space<vmem>>, vector<1x8x1xf32>
    %410 = vector.shape_cast %409 : vector<1x8x1xf32> to vector<8x1xf32>
    %411 = arith.truncf %338 : vector<8x32xf32> to vector<8x32xbf16>
    %c0_152 = arith.constant 0 : index
    %c0_153 = arith.constant 0 : index
    %412 = vector.load %arg10[%c0_152, %c0_153] : memref<32x96xbf16, #tpu.memory_space<vmem>>, vector<32x96xbf16>
    %cst_154 = arith.constant dense<0.000000e+00> : vector<8x96xf32>
    %413 = tpu.matmul %411, %412, %cst_154 {dimension_numbers = #tpu.dot_dimension_numbers<[1], [0], [0], [1], [0, 0, 1, 1], [], []>} : vector<8x32xbf16>, vector<32x96xbf16>, vector<8x96xf32> -> vector<8x96xf32>
    %414 = vector.extract_strided_slice %407 {offsets = [0, 0], sizes = [8, 32], strides = [1, 1]} : vector<8x96xf32> to vector<8x32xf32>
    %415 = vector.extract_strided_slice %413 {offsets = [0, 0], sizes = [8, 32], strides = [1, 1]} : vector<8x96xf32> to vector<8x32xf32>
    %416 = arith.addf %414, %415 : vector<8x32xf32>
    %417 = arith.negf %416 : vector<8x32xf32>
    %418 = math.exp %417 : vector<8x32xf32>
    %cst_155 = arith.constant 1.000000e+00 : f32
    %419 = vector.broadcast %cst_155 : f32 to vector<8x32xf32>
    %420 = arith.addf %419, %418 : vector<8x32xf32>
    %421 = arith.divf %419, %420 : vector<8x32xf32>
    %422 = vector.extract_strided_slice %407 {offsets = [0, 32], sizes = [8, 32], strides = [1, 1]} : vector<8x96xf32> to vector<8x32xf32>
    %423 = vector.extract_strided_slice %413 {offsets = [0, 32], sizes = [8, 32], strides = [1, 1]} : vector<8x96xf32> to vector<8x32xf32>
    %424 = arith.addf %422, %423 : vector<8x32xf32>
    %425 = arith.negf %424 : vector<8x32xf32>
    %426 = math.exp %425 : vector<8x32xf32>
    %cst_156 = arith.constant 1.000000e+00 : f32
    %427 = vector.broadcast %cst_156 : f32 to vector<8x32xf32>
    %428 = arith.addf %427, %426 : vector<8x32xf32>
    %429 = arith.divf %427, %428 : vector<8x32xf32>
    %430 = vector.extract_strided_slice %407 {offsets = [0, 64], sizes = [8, 32], strides = [1, 1]} : vector<8x96xf32> to vector<8x32xf32>
    %431 = vector.extract_strided_slice %413 {offsets = [0, 64], sizes = [8, 32], strides = [1, 1]} : vector<8x96xf32> to vector<8x32xf32>
    %c0_157 = arith.constant 0 : index
    %c0_158 = arith.constant 0 : index
    %432 = vector.load %arg12[%c0_157, %c0_158] : memref<1x32xf32, #tpu.memory_space<vmem>>, vector<1x32xf32>
    %433 = vector.broadcast %432 : vector<1x32xf32> to vector<8x32xf32>
    %434 = arith.addf %431, %433 : vector<8x32xf32>
    %435 = arith.mulf %421, %434 : vector<8x32xf32>
    %436 = arith.addf %430, %435 : vector<8x32xf32>
    %437 = math.tanh %436 : vector<8x32xf32>
    %cst_159 = arith.constant 1.000000e+00 : f32
    %438 = vector.broadcast %cst_159 : f32 to vector<8x32xf32>
    %439 = arith.subf %438, %429 : vector<8x32xf32>
    %440 = arith.mulf %439, %437 : vector<8x32xf32>
    %441 = arith.mulf %429, %338 : vector<8x32xf32>
    %442 = arith.addf %440, %441 : vector<8x32xf32>
    %cst_160 = arith.constant 0.000000e+00 : f32
    %443 = vector.broadcast %cst_160 : f32 to vector<8x1xf32>
    %444 = arith.cmpf ogt, %410, %443 : vector<8x1xf32>
    %445 = vector.shape_cast %444 : vector<8x1xi1> to vector<8x1xi1>
    %446 = vector.broadcast %445 : vector<8x1xi1> to vector<8x32xi1>
    %447 = arith.select %446, %442, %338 : vector<8x32xi1>, vector<8x32xf32>
    %cst_161 = arith.constant 0.000000e+00 : f32
    %448 = vector.broadcast %cst_161 : f32 to vector<8x1xf32>
    %449 = arith.cmpf ogt, %410, %448 : vector<8x1xf32>
    %cst_162 = arith.constant 0.000000e+00 : f32
    %450 = vector.broadcast %cst_162 : f32 to vector<8x32xf32>
    %451 = vector.shape_cast %449 : vector<8x1xi1> to vector<8x1xi1>
    %452 = vector.broadcast %451 : vector<8x1xi1> to vector<8x32xi1>
    %453 = arith.select %452, %447, %450 : vector<8x32xi1>, vector<8x32xf32>
    %454 = arith.truncf %453 : vector<8x32xf32> to vector<8x32xbf16>
    %455 = arith.index_cast %350 : i32 to index
    %c0_163 = arith.constant 0 : index
    %c0_164 = arith.constant 0 : index
    %456 = vector.load %arg14[%455, %c0_163, %c0_164] : memref<8x8x32xbf16, #tpu.memory_space<vmem>>, vector<1x8x32xbf16>
    %457 = vector.shape_cast %456 : vector<1x8x32xbf16> to vector<8x32xbf16>
    %458 = vector.shape_cast %454 : vector<8x32xbf16> to vector<1x8x32xbf16>
    tpu.vector_store %arg14[%455, %c0_163, %c0_164], %458 {strides = array<i32>} : memref<8x8x32xbf16, #tpu.memory_space<vmem>>, vector<1x8x32xbf16>,
    %c4_i32 = arith.constant 4 : i32
    %c7_i32_165 = arith.constant 7 : i32
    %459 = arith.subi %c7_i32_165, %c4_i32 : i32
    %460 = arith.index_cast %c4_i32 : i32 to index
    %c0_166 = arith.constant 0 : index
    %c0_167 = arith.constant 0 : index
    %461 = vector.load %arg17[%460, %c0_166, %c0_167] : memref<8x8x96xf32, #tpu.memory_space<vmem>>, vector<1x8x96xf32>
    %462 = vector.shape_cast %461 : vector<1x8x96xf32> to vector<8x96xf32>
    %463 = arith.index_cast %c4_i32 : i32 to index
    %c0_168 = arith.constant 0 : index
    %c0_169 = arith.constant 0 : index
    %464 = vector.load %arg3[%463, %c0_168, %c0_169] : memref<8x8x1xf32, #tpu.memory_space<vmem>>, vector<1x8x1xf32>
    %465 = vector.shape_cast %464 : vector<1x8x1xf32> to vector<8x1xf32>
    %466 = arith.truncf %393 : vector<8x32xf32> to vector<8x32xbf16>
    %c0_170 = arith.constant 0 : index
    %c0_171 = arith.constant 0 : index
    %467 = vector.load %arg6[%c0_170, %c0_171] : memref<32x96xbf16, #tpu.memory_space<vmem>>, vector<32x96xbf16>
    %cst_172 = arith.constant dense<0.000000e+00> : vector<8x96xf32>
    %468 = tpu.matmul %466, %467, %cst_172 {dimension_numbers = #tpu.dot_dimension_numbers<[1], [0], [0], [1], [0, 0, 1, 1], [], []>} : vector<8x32xbf16>, vector<32x96xbf16>, vector<8x96xf32> -> vector<8x96xf32>
    %469 = vector.extract_strided_slice %462 {offsets = [0, 0], sizes = [8, 32], strides = [1, 1]} : vector<8x96xf32> to vector<8x32xf32>
    %470 = vector.extract_strided_slice %468 {offsets = [0, 0], sizes = [8, 32], strides = [1, 1]} : vector<8x96xf32> to vector<8x32xf32>
    %471 = arith.addf %469, %470 : vector<8x32xf32>
    %472 = arith.negf %471 : vector<8x32xf32>
    %473 = math.exp %472 : vector<8x32xf32>
    %cst_173 = arith.constant 1.000000e+00 : f32
    %474 = vector.broadcast %cst_173 : f32 to vector<8x32xf32>
    %475 = arith.addf %474, %473 : vector<8x32xf32>
    %476 = arith.divf %474, %475 : vector<8x32xf32>
    %477 = vector.extract_strided_slice %462 {offsets = [0, 32], sizes = [8, 32], strides = [1, 1]} : vector<8x96xf32> to vector<8x32xf32>
    %478 = vector.extract_strided_slice %468 {offsets = [0, 32], sizes = [8, 32], strides = [1, 1]} : vector<8x96xf32> to vector<8x32xf32>
    %479 = arith.addf %477, %478 : vector<8x32xf32>
    %480 = arith.negf %479 : vector<8x32xf32>
    %481 = math.exp %480 : vector<8x32xf32>
    %cst_174 = arith.constant 1.000000e+00 : f32
    %482 = vector.broadcast %cst_174 : f32 to vector<8x32xf32>
    %483 = arith.addf %482, %481 : vector<8x32xf32>
    %484 = arith.divf %482, %483 : vector<8x32xf32>
    %485 = vector.extract_strided_slice %462 {offsets = [0, 64], sizes = [8, 32], strides = [1, 1]} : vector<8x96xf32> to vector<8x32xf32>
    %486 = vector.extract_strided_slice %468 {offsets = [0, 64], sizes = [8, 32], strides = [1, 1]} : vector<8x96xf32> to vector<8x32xf32>
    %c0_175 = arith.constant 0 : index
    %c0_176 = arith.constant 0 : index
    %487 = vector.load %arg8[%c0_175, %c0_176] : memref<1x32xf32, #tpu.memory_space<vmem>>, vector<1x32xf32>
    %488 = vector.broadcast %487 : vector<1x32xf32> to vector<8x32xf32>
    %489 = arith.addf %486, %488 : vector<8x32xf32>
    %490 = arith.mulf %476, %489 : vector<8x32xf32>
    %491 = arith.addf %485, %490 : vector<8x32xf32>
    %492 = math.tanh %491 : vector<8x32xf32>
    %cst_177 = arith.constant 1.000000e+00 : f32
    %493 = vector.broadcast %cst_177 : f32 to vector<8x32xf32>
    %494 = arith.subf %493, %484 : vector<8x32xf32>
    %495 = arith.mulf %494, %492 : vector<8x32xf32>
    %496 = arith.mulf %484, %393 : vector<8x32xf32>
    %497 = arith.addf %495, %496 : vector<8x32xf32>
    %cst_178 = arith.constant 0.000000e+00 : f32
    %498 = vector.broadcast %cst_178 : f32 to vector<8x1xf32>
    %499 = arith.cmpf ogt, %465, %498 : vector<8x1xf32>
    %500 = vector.shape_cast %499 : vector<8x1xi1> to vector<8x1xi1>
    %501 = vector.broadcast %500 : vector<8x1xi1> to vector<8x32xi1>
    %502 = arith.select %501, %497, %393 : vector<8x32xi1>, vector<8x32xf32>
    %cst_179 = arith.constant 0.000000e+00 : f32
    %503 = vector.broadcast %cst_179 : f32 to vector<8x1xf32>
    %504 = arith.cmpf ogt, %465, %503 : vector<8x1xf32>
    %cst_180 = arith.constant 0.000000e+00 : f32
    %505 = vector.broadcast %cst_180 : f32 to vector<8x32xf32>
    %506 = vector.shape_cast %504 : vector<8x1xi1> to vector<8x1xi1>
    %507 = vector.broadcast %506 : vector<8x1xi1> to vector<8x32xi1>
    %508 = arith.select %507, %502, %505 : vector<8x32xi1>, vector<8x32xf32>
    %509 = arith.truncf %508 : vector<8x32xf32> to vector<8x32xbf16>
    %510 = arith.index_cast %c4_i32 : i32 to index
    %c0_181 = arith.constant 0 : index
    %c0_182 = arith.constant 0 : index
    %511 = vector.load %arg13[%510, %c0_181, %c0_182] : memref<8x8x32xbf16, #tpu.memory_space<vmem>>, vector<1x8x32xbf16>
    %512 = vector.shape_cast %511 : vector<1x8x32xbf16> to vector<8x32xbf16>
    %513 = vector.shape_cast %509 : vector<8x32xbf16> to vector<1x8x32xbf16>
    tpu.vector_store %arg13[%510, %c0_181, %c0_182], %513 {strides = array<i32>} : memref<8x8x32xbf16, #tpu.memory_space<vmem>>, vector<1x8x32xbf16>,
    %514 = arith.index_cast %459 : i32 to index
    %c0_183 = arith.constant 0 : index
    %c0_184 = arith.constant 0 : index
    %515 = vector.load %arg18[%514, %c0_183, %c0_184] : memref<8x8x96xf32, #tpu.memory_space<vmem>>, vector<1x8x96xf32>
    %516 = vector.shape_cast %515 : vector<1x8x96xf32> to vector<8x96xf32>
    %517 = arith.index_cast %459 : i32 to index
    %c0_185 = arith.constant 0 : index
    %c0_186 = arith.constant 0 : index
    %518 = vector.load %arg4[%517, %c0_185, %c0_186] : memref<8x8x1xf32, #tpu.memory_space<vmem>>, vector<1x8x1xf32>
    %519 = vector.shape_cast %518 : vector<1x8x1xf32> to vector<8x1xf32>
    %520 = arith.truncf %447 : vector<8x32xf32> to vector<8x32xbf16>
    %c0_187 = arith.constant 0 : index
    %c0_188 = arith.constant 0 : index
    %521 = vector.load %arg10[%c0_187, %c0_188] : memref<32x96xbf16, #tpu.memory_space<vmem>>, vector<32x96xbf16>
    %cst_189 = arith.constant dense<0.000000e+00> : vector<8x96xf32>
    %522 = tpu.matmul %520, %521, %cst_189 {dimension_numbers = #tpu.dot_dimension_numbers<[1], [0], [0], [1], [0, 0, 1, 1], [], []>} : vector<8x32xbf16>, vector<32x96xbf16>, vector<8x96xf32> -> vector<8x96xf32>
    %523 = vector.extract_strided_slice %516 {offsets = [0, 0], sizes = [8, 32], strides = [1, 1]} : vector<8x96xf32> to vector<8x32xf32>
    %524 = vector.extract_strided_slice %522 {offsets = [0, 0], sizes = [8, 32], strides = [1, 1]} : vector<8x96xf32> to vector<8x32xf32>
    %525 = arith.addf %523, %524 : vector<8x32xf32>
    %526 = arith.negf %525 : vector<8x32xf32>
    %527 = math.exp %526 : vector<8x32xf32>
    %cst_190 = arith.constant 1.000000e+00 : f32
    %528 = vector.broadcast %cst_190 : f32 to vector<8x32xf32>
    %529 = arith.addf %528, %527 : vector<8x32xf32>
    %530 = arith.divf %528, %529 : vector<8x32xf32>
    %531 = vector.extract_strided_slice %516 {offsets = [0, 32], sizes = [8, 32], strides = [1, 1]} : vector<8x96xf32> to vector<8x32xf32>
    %532 = vector.extract_strided_slice %522 {offsets = [0, 32], sizes = [8, 32], strides = [1, 1]} : vector<8x96xf32> to vector<8x32xf32>
    %533 = arith.addf %531, %532 : vector<8x32xf32>
    %534 = arith.negf %533 : vector<8x32xf32>
    %535 = math.exp %534 : vector<8x32xf32>
    %cst_191 = arith.constant 1.000000e+00 : f32
    %536 = vector.broadcast %cst_191 : f32 to vector<8x32xf32>
    %537 = arith.addf %536, %535 : vector<8x32xf32>
    %538 = arith.divf %536, %537 : vector<8x32xf32>
    %539 = vector.extract_strided_slice %516 {offsets = [0, 64], sizes = [8, 32], strides = [1, 1]} : vector<8x96xf32> to vector<8x32xf32>
    %540 = vector.extract_strided_slice %522 {offsets = [0, 64], sizes = [8, 32], strides = [1, 1]} : vector<8x96xf32> to vector<8x32xf32>
    %c0_192 = arith.constant 0 : index
    %c0_193 = arith.constant 0 : index
    %541 = vector.load %arg12[%c0_192, %c0_193] : memref<1x32xf32, #tpu.memory_space<vmem>>, vector<1x32xf32>
    %542 = vector.broadcast %541 : vector<1x32xf32> to vector<8x32xf32>
    %543 = arith.addf %540, %542 : vector<8x32xf32>
    %544 = arith.mulf %530, %543 : vector<8x32xf32>
    %545 = arith.addf %539, %544 : vector<8x32xf32>
    %546 = math.tanh %545 : vector<8x32xf32>
    %cst_194 = arith.constant 1.000000e+00 : f32
    %547 = vector.broadcast %cst_194 : f32 to vector<8x32xf32>
    %548 = arith.subf %547, %538 : vector<8x32xf32>
    %549 = arith.mulf %548, %546 : vector<8x32xf32>
    %550 = arith.mulf %538, %447 : vector<8x32xf32>
    %551 = arith.addf %549, %550 : vector<8x32xf32>
    %cst_195 = arith.constant 0.000000e+00 : f32
    %552 = vector.broadcast %cst_195 : f32 to vector<8x1xf32>
    %553 = arith.cmpf ogt, %519, %552 : vector<8x1xf32>
    %554 = vector.shape_cast %553 : vector<8x1xi1> to vector<8x1xi1>
    %555 = vector.broadcast %554 : vector<8x1xi1> to vector<8x32xi1>
    %556 = arith.select %555, %551, %447 : vector<8x32xi1>, vector<8x32xf32>
    %cst_196 = arith.constant 0.000000e+00 : f32
    %557 = vector.broadcast %cst_196 : f32 to vector<8x1xf32>
    %558 = arith.cmpf ogt, %519, %557 : vector<8x1xf32>
    %cst_197 = arith.constant 0.000000e+00 : f32
    %559 = vector.broadcast %cst_197 : f32 to vector<8x32xf32>
    %560 = vector.shape_cast %558 : vector<8x1xi1> to vector<8x1xi1>
    %561 = vector.broadcast %560 : vector<8x1xi1> to vector<8x32xi1>
    %562 = arith.select %561, %556, %559 : vector<8x32xi1>, vector<8x32xf32>
    %563 = arith.truncf %562 : vector<8x32xf32> to vector<8x32xbf16>
    %564 = arith.index_cast %459 : i32 to index
    %c0_198 = arith.constant 0 : index
    %c0_199 = arith.constant 0 : index
    %565 = vector.load %arg14[%564, %c0_198, %c0_199] : memref<8x8x32xbf16, #tpu.memory_space<vmem>>, vector<1x8x32xbf16>
    %566 = vector.shape_cast %565 : vector<1x8x32xbf16> to vector<8x32xbf16>
    %567 = vector.shape_cast %563 : vector<8x32xbf16> to vector<1x8x32xbf16>
    tpu.vector_store %arg14[%564, %c0_198, %c0_199], %567 {strides = array<i32>} : memref<8x8x32xbf16, #tpu.memory_space<vmem>>, vector<1x8x32xbf16>,
    %c5_i32 = arith.constant 5 : i32
    %c7_i32_200 = arith.constant 7 : i32
    %568 = arith.subi %c7_i32_200, %c5_i32 : i32
    %569 = arith.index_cast %c5_i32 : i32 to index
    %c0_201 = arith.constant 0 : index
    %c0_202 = arith.constant 0 : index
    %570 = vector.load %arg17[%569, %c0_201, %c0_202] : memref<8x8x96xf32, #tpu.memory_space<vmem>>, vector<1x8x96xf32>
    %571 = vector.shape_cast %570 : vector<1x8x96xf32> to vector<8x96xf32>
    %572 = arith.index_cast %c5_i32 : i32 to index
    %c0_203 = arith.constant 0 : index
    %c0_204 = arith.constant 0 : index
    %573 = vector.load %arg3[%572, %c0_203, %c0_204] : memref<8x8x1xf32, #tpu.memory_space<vmem>>, vector<1x8x1xf32>
    %574 = vector.shape_cast %573 : vector<1x8x1xf32> to vector<8x1xf32>
    %575 = arith.truncf %502 : vector<8x32xf32> to vector<8x32xbf16>
    %c0_205 = arith.constant 0 : index
    %c0_206 = arith.constant 0 : index
    %576 = vector.load %arg6[%c0_205, %c0_206] : memref<32x96xbf16, #tpu.memory_space<vmem>>, vector<32x96xbf16>
    %cst_207 = arith.constant dense<0.000000e+00> : vector<8x96xf32>
    %577 = tpu.matmul %575, %576, %cst_207 {dimension_numbers = #tpu.dot_dimension_numbers<[1], [0], [0], [1], [0, 0, 1, 1], [], []>} : vector<8x32xbf16>, vector<32x96xbf16>, vector<8x96xf32> -> vector<8x96xf32>
    %578 = vector.extract_strided_slice %571 {offsets = [0, 0], sizes = [8, 32], strides = [1, 1]} : vector<8x96xf32> to vector<8x32xf32>
    %579 = vector.extract_strided_slice %577 {offsets = [0, 0], sizes = [8, 32], strides = [1, 1]} : vector<8x96xf32> to vector<8x32xf32>
    %580 = arith.addf %578, %579 : vector<8x32xf32>
    %581 = arith.negf %580 : vector<8x32xf32>
    %582 = math.exp %581 : vector<8x32xf32>
    %cst_208 = arith.constant 1.000000e+00 : f32
    %583 = vector.broadcast %cst_208 : f32 to vector<8x32xf32>
    %584 = arith.addf %583, %582 : vector<8x32xf32>
    %585 = arith.divf %583, %584 : vector<8x32xf32>
    %586 = vector.extract_strided_slice %571 {offsets = [0, 32], sizes = [8, 32], strides = [1, 1]} : vector<8x96xf32> to vector<8x32xf32>
    %587 = vector.extract_strided_slice %577 {offsets = [0, 32], sizes = [8, 32], strides = [1, 1]} : vector<8x96xf32> to vector<8x32xf32>
    %588 = arith.addf %586, %587 : vector<8x32xf32>
    %589 = arith.negf %588 : vector<8x32xf32>
    %590 = math.exp %589 : vector<8x32xf32>
    %cst_209 = arith.constant 1.000000e+00 : f32
    %591 = vector.broadcast %cst_209 : f32 to vector<8x32xf32>
    %592 = arith.addf %591, %590 : vector<8x32xf32>
    %593 = arith.divf %591, %592 : vector<8x32xf32>
    %594 = vector.extract_strided_slice %571 {offsets = [0, 64], sizes = [8, 32], strides = [1, 1]} : vector<8x96xf32> to vector<8x32xf32>
    %595 = vector.extract_strided_slice %577 {offsets = [0, 64], sizes = [8, 32], strides = [1, 1]} : vector<8x96xf32> to vector<8x32xf32>
    %c0_210 = arith.constant 0 : index
    %c0_211 = arith.constant 0 : index
    %596 = vector.load %arg8[%c0_210, %c0_211] : memref<1x32xf32, #tpu.memory_space<vmem>>, vector<1x32xf32>
    %597 = vector.broadcast %596 : vector<1x32xf32> to vector<8x32xf32>
    %598 = arith.addf %595, %597 : vector<8x32xf32>
    %599 = arith.mulf %585, %598 : vector<8x32xf32>
    %600 = arith.addf %594, %599 : vector<8x32xf32>
    %601 = math.tanh %600 : vector<8x32xf32>
    %cst_212 = arith.constant 1.000000e+00 : f32
    %602 = vector.broadcast %cst_212 : f32 to vector<8x32xf32>
    %603 = arith.subf %602, %593 : vector<8x32xf32>
    %604 = arith.mulf %603, %601 : vector<8x32xf32>
    %605 = arith.mulf %593, %502 : vector<8x32xf32>
    %606 = arith.addf %604, %605 : vector<8x32xf32>
    %cst_213 = arith.constant 0.000000e+00 : f32
    %607 = vector.broadcast %cst_213 : f32 to vector<8x1xf32>
    %608 = arith.cmpf ogt, %574, %607 : vector<8x1xf32>
    %609 = vector.shape_cast %608 : vector<8x1xi1> to vector<8x1xi1>
    %610 = vector.broadcast %609 : vector<8x1xi1> to vector<8x32xi1>
    %611 = arith.select %610, %606, %502 : vector<8x32xi1>, vector<8x32xf32>
    %cst_214 = arith.constant 0.000000e+00 : f32
    %612 = vector.broadcast %cst_214 : f32 to vector<8x1xf32>
    %613 = arith.cmpf ogt, %574, %612 : vector<8x1xf32>
    %cst_215 = arith.constant 0.000000e+00 : f32
    %614 = vector.broadcast %cst_215 : f32 to vector<8x32xf32>
    %615 = vector.shape_cast %613 : vector<8x1xi1> to vector<8x1xi1>
    %616 = vector.broadcast %615 : vector<8x1xi1> to vector<8x32xi1>
    %617 = arith.select %616, %611, %614 : vector<8x32xi1>, vector<8x32xf32>
    %618 = arith.truncf %617 : vector<8x32xf32> to vector<8x32xbf16>
    %619 = arith.index_cast %c5_i32 : i32 to index
    %c0_216 = arith.constant 0 : index
    %c0_217 = arith.constant 0 : index
    %620 = vector.load %arg13[%619, %c0_216, %c0_217] : memref<8x8x32xbf16, #tpu.memory_space<vmem>>, vector<1x8x32xbf16>
    %621 = vector.shape_cast %620 : vector<1x8x32xbf16> to vector<8x32xbf16>
    %622 = vector.shape_cast %618 : vector<8x32xbf16> to vector<1x8x32xbf16>
    tpu.vector_store %arg13[%619, %c0_216, %c0_217], %622 {strides = array<i32>} : memref<8x8x32xbf16, #tpu.memory_space<vmem>>, vector<1x8x32xbf16>,
    %623 = arith.index_cast %568 : i32 to index
    %c0_218 = arith.constant 0 : index
    %c0_219 = arith.constant 0 : index
    %624 = vector.load %arg18[%623, %c0_218, %c0_219] : memref<8x8x96xf32, #tpu.memory_space<vmem>>, vector<1x8x96xf32>
    %625 = vector.shape_cast %624 : vector<1x8x96xf32> to vector<8x96xf32>
    %626 = arith.index_cast %568 : i32 to index
    %c0_220 = arith.constant 0 : index
    %c0_221 = arith.constant 0 : index
    %627 = vector.load %arg4[%626, %c0_220, %c0_221] : memref<8x8x1xf32, #tpu.memory_space<vmem>>, vector<1x8x1xf32>
    %628 = vector.shape_cast %627 : vector<1x8x1xf32> to vector<8x1xf32>
    %629 = arith.truncf %556 : vector<8x32xf32> to vector<8x32xbf16>
    %c0_222 = arith.constant 0 : index
    %c0_223 = arith.constant 0 : index
    %630 = vector.load %arg10[%c0_222, %c0_223] : memref<32x96xbf16, #tpu.memory_space<vmem>>, vector<32x96xbf16>
    %cst_224 = arith.constant dense<0.000000e+00> : vector<8x96xf32>
    %631 = tpu.matmul %629, %630, %cst_224 {dimension_numbers = #tpu.dot_dimension_numbers<[1], [0], [0], [1], [0, 0, 1, 1], [], []>} : vector<8x32xbf16>, vector<32x96xbf16>, vector<8x96xf32> -> vector<8x96xf32>
    %632 = vector.extract_strided_slice %625 {offsets = [0, 0], sizes = [8, 32], strides = [1, 1]} : vector<8x96xf32> to vector<8x32xf32>
    %633 = vector.extract_strided_slice %631 {offsets = [0, 0], sizes = [8, 32], strides = [1, 1]} : vector<8x96xf32> to vector<8x32xf32>
    %634 = arith.addf %632, %633 : vector<8x32xf32>
    %635 = arith.negf %634 : vector<8x32xf32>
    %636 = math.exp %635 : vector<8x32xf32>
    %cst_225 = arith.constant 1.000000e+00 : f32
    %637 = vector.broadcast %cst_225 : f32 to vector<8x32xf32>
    %638 = arith.addf %637, %636 : vector<8x32xf32>
    %639 = arith.divf %637, %638 : vector<8x32xf32>
    %640 = vector.extract_strided_slice %625 {offsets = [0, 32], sizes = [8, 32], strides = [1, 1]} : vector<8x96xf32> to vector<8x32xf32>
    %641 = vector.extract_strided_slice %631 {offsets = [0, 32], sizes = [8, 32], strides = [1, 1]} : vector<8x96xf32> to vector<8x32xf32>
    %642 = arith.addf %640, %641 : vector<8x32xf32>
    %643 = arith.negf %642 : vector<8x32xf32>
    %644 = math.exp %643 : vector<8x32xf32>
    %cst_226 = arith.constant 1.000000e+00 : f32
    %645 = vector.broadcast %cst_226 : f32 to vector<8x32xf32>
    %646 = arith.addf %645, %644 : vector<8x32xf32>
    %647 = arith.divf %645, %646 : vector<8x32xf32>
    %648 = vector.extract_strided_slice %625 {offsets = [0, 64], sizes = [8, 32], strides = [1, 1]} : vector<8x96xf32> to vector<8x32xf32>
    %649 = vector.extract_strided_slice %631 {offsets = [0, 64], sizes = [8, 32], strides = [1, 1]} : vector<8x96xf32> to vector<8x32xf32>
    %c0_227 = arith.constant 0 : index
    %c0_228 = arith.constant 0 : index
    %650 = vector.load %arg12[%c0_227, %c0_228] : memref<1x32xf32, #tpu.memory_space<vmem>>, vector<1x32xf32>
    %651 = vector.broadcast %650 : vector<1x32xf32> to vector<8x32xf32>
    %652 = arith.addf %649, %651 : vector<8x32xf32>
    %653 = arith.mulf %639, %652 : vector<8x32xf32>
    %654 = arith.addf %648, %653 : vector<8x32xf32>
    %655 = math.tanh %654 : vector<8x32xf32>
    %cst_229 = arith.constant 1.000000e+00 : f32
    %656 = vector.broadcast %cst_229 : f32 to vector<8x32xf32>
    %657 = arith.subf %656, %647 : vector<8x32xf32>
    %658 = arith.mulf %657, %655 : vector<8x32xf32>
    %659 = arith.mulf %647, %556 : vector<8x32xf32>
    %660 = arith.addf %658, %659 : vector<8x32xf32>
    %cst_230 = arith.constant 0.000000e+00 : f32
    %661 = vector.broadcast %cst_230 : f32 to vector<8x1xf32>
    %662 = arith.cmpf ogt, %628, %661 : vector<8x1xf32>
    %663 = vector.shape_cast %662 : vector<8x1xi1> to vector<8x1xi1>
    %664 = vector.broadcast %663 : vector<8x1xi1> to vector<8x32xi1>
    %665 = arith.select %664, %660, %556 : vector<8x32xi1>, vector<8x32xf32>
    %cst_231 = arith.constant 0.000000e+00 : f32
    %666 = vector.broadcast %cst_231 : f32 to vector<8x1xf32>
    %667 = arith.cmpf ogt, %628, %666 : vector<8x1xf32>
    %cst_232 = arith.constant 0.000000e+00 : f32
    %668 = vector.broadcast %cst_232 : f32 to vector<8x32xf32>
    %669 = vector.shape_cast %667 : vector<8x1xi1> to vector<8x1xi1>
    %670 = vector.broadcast %669 : vector<8x1xi1> to vector<8x32xi1>
    %671 = arith.select %670, %665, %668 : vector<8x32xi1>, vector<8x32xf32>
    %672 = arith.truncf %671 : vector<8x32xf32> to vector<8x32xbf16>
    %673 = arith.index_cast %568 : i32 to index
    %c0_233 = arith.constant 0 : index
    %c0_234 = arith.constant 0 : index
    %674 = vector.load %arg14[%673, %c0_233, %c0_234] : memref<8x8x32xbf16, #tpu.memory_space<vmem>>, vector<1x8x32xbf16>
    %675 = vector.shape_cast %674 : vector<1x8x32xbf16> to vector<8x32xbf16>
    %676 = vector.shape_cast %672 : vector<8x32xbf16> to vector<1x8x32xbf16>
    tpu.vector_store %arg14[%673, %c0_233, %c0_234], %676 {strides = array<i32>} : memref<8x8x32xbf16, #tpu.memory_space<vmem>>, vector<1x8x32xbf16>,
    %c6_i32 = arith.constant 6 : i32
    %c7_i32_235 = arith.constant 7 : i32
    %677 = arith.subi %c7_i32_235, %c6_i32 : i32
    %678 = arith.index_cast %c6_i32 : i32 to index
    %c0_236 = arith.constant 0 : index
    %c0_237 = arith.constant 0 : index
    %679 = vector.load %arg17[%678, %c0_236, %c0_237] : memref<8x8x96xf32, #tpu.memory_space<vmem>>, vector<1x8x96xf32>
    %680 = vector.shape_cast %679 : vector<1x8x96xf32> to vector<8x96xf32>
    %681 = arith.index_cast %c6_i32 : i32 to index
    %c0_238 = arith.constant 0 : index
    %c0_239 = arith.constant 0 : index
    %682 = vector.load %arg3[%681, %c0_238, %c0_239] : memref<8x8x1xf32, #tpu.memory_space<vmem>>, vector<1x8x1xf32>
    %683 = vector.shape_cast %682 : vector<1x8x1xf32> to vector<8x1xf32>
    %684 = arith.truncf %611 : vector<8x32xf32> to vector<8x32xbf16>
    %c0_240 = arith.constant 0 : index
    %c0_241 = arith.constant 0 : index
    %685 = vector.load %arg6[%c0_240, %c0_241] : memref<32x96xbf16, #tpu.memory_space<vmem>>, vector<32x96xbf16>
    %cst_242 = arith.constant dense<0.000000e+00> : vector<8x96xf32>
    %686 = tpu.matmul %684, %685, %cst_242 {dimension_numbers = #tpu.dot_dimension_numbers<[1], [0], [0], [1], [0, 0, 1, 1], [], []>} : vector<8x32xbf16>, vector<32x96xbf16>, vector<8x96xf32> -> vector<8x96xf32>
    %687 = vector.extract_strided_slice %680 {offsets = [0, 0], sizes = [8, 32], strides = [1, 1]} : vector<8x96xf32> to vector<8x32xf32>
    %688 = vector.extract_strided_slice %686 {offsets = [0, 0], sizes = [8, 32], strides = [1, 1]} : vector<8x96xf32> to vector<8x32xf32>
    %689 = arith.addf %687, %688 : vector<8x32xf32>
    %690 = arith.negf %689 : vector<8x32xf32>
    %691 = math.exp %690 : vector<8x32xf32>
    %cst_243 = arith.constant 1.000000e+00 : f32
    %692 = vector.broadcast %cst_243 : f32 to vector<8x32xf32>
    %693 = arith.addf %692, %691 : vector<8x32xf32>
    %694 = arith.divf %692, %693 : vector<8x32xf32>
    %695 = vector.extract_strided_slice %680 {offsets = [0, 32], sizes = [8, 32], strides = [1, 1]} : vector<8x96xf32> to vector<8x32xf32>
    %696 = vector.extract_strided_slice %686 {offsets = [0, 32], sizes = [8, 32], strides = [1, 1]} : vector<8x96xf32> to vector<8x32xf32>
    %697 = arith.addf %695, %696 : vector<8x32xf32>
    %698 = arith.negf %697 : vector<8x32xf32>
    %699 = math.exp %698 : vector<8x32xf32>
    %cst_244 = arith.constant 1.000000e+00 : f32
    %700 = vector.broadcast %cst_244 : f32 to vector<8x32xf32>
    %701 = arith.addf %700, %699 : vector<8x32xf32>
    %702 = arith.divf %700, %701 : vector<8x32xf32>
    %703 = vector.extract_strided_slice %680 {offsets = [0, 64], sizes = [8, 32], strides = [1, 1]} : vector<8x96xf32> to vector<8x32xf32>
    %704 = vector.extract_strided_slice %686 {offsets = [0, 64], sizes = [8, 32], strides = [1, 1]} : vector<8x96xf32> to vector<8x32xf32>
    %c0_245 = arith.constant 0 : index
    %c0_246 = arith.constant 0 : index
    %705 = vector.load %arg8[%c0_245, %c0_246] : memref<1x32xf32, #tpu.memory_space<vmem>>, vector<1x32xf32>
    %706 = vector.broadcast %705 : vector<1x32xf32> to vector<8x32xf32>
    %707 = arith.addf %704, %706 : vector<8x32xf32>
    %708 = arith.mulf %694, %707 : vector<8x32xf32>
    %709 = arith.addf %703, %708 : vector<8x32xf32>
    %710 = math.tanh %709 : vector<8x32xf32>
    %cst_247 = arith.constant 1.000000e+00 : f32
    %711 = vector.broadcast %cst_247 : f32 to vector<8x32xf32>
    %712 = arith.subf %711, %702 : vector<8x32xf32>
    %713 = arith.mulf %712, %710 : vector<8x32xf32>
    %714 = arith.mulf %702, %611 : vector<8x32xf32>
    %715 = arith.addf %713, %714 : vector<8x32xf32>
    %cst_248 = arith.constant 0.000000e+00 : f32
    %716 = vector.broadcast %cst_248 : f32 to vector<8x1xf32>
    %717 = arith.cmpf ogt, %683, %716 : vector<8x1xf32>
    %718 = vector.shape_cast %717 : vector<8x1xi1> to vector<8x1xi1>
    %719 = vector.broadcast %718 : vector<8x1xi1> to vector<8x32xi1>
    %720 = arith.select %719, %715, %611 : vector<8x32xi1>, vector<8x32xf32>
    %cst_249 = arith.constant 0.000000e+00 : f32
    %721 = vector.broadcast %cst_249 : f32 to vector<8x1xf32>
    %722 = arith.cmpf ogt, %683, %721 : vector<8x1xf32>
    %cst_250 = arith.constant 0.000000e+00 : f32
    %723 = vector.broadcast %cst_250 : f32 to vector<8x32xf32>
    %724 = vector.shape_cast %722 : vector<8x1xi1> to vector<8x1xi1>
    %725 = vector.broadcast %724 : vector<8x1xi1> to vector<8x32xi1>
    %726 = arith.select %725, %720, %723 : vector<8x32xi1>, vector<8x32xf32>
    %727 = arith.truncf %726 : vector<8x32xf32> to vector<8x32xbf16>
    %728 = arith.index_cast %c6_i32 : i32 to index
    %c0_251 = arith.constant 0 : index
    %c0_252 = arith.constant 0 : index
    %729 = vector.load %arg13[%728, %c0_251, %c0_252] : memref<8x8x32xbf16, #tpu.memory_space<vmem>>, vector<1x8x32xbf16>
    %730 = vector.shape_cast %729 : vector<1x8x32xbf16> to vector<8x32xbf16>
    %731 = vector.shape_cast %727 : vector<8x32xbf16> to vector<1x8x32xbf16>
    tpu.vector_store %arg13[%728, %c0_251, %c0_252], %731 {strides = array<i32>} : memref<8x8x32xbf16, #tpu.memory_space<vmem>>, vector<1x8x32xbf16>,
    %732 = arith.index_cast %677 : i32 to index
    %c0_253 = arith.constant 0 : index
    %c0_254 = arith.constant 0 : index
    %733 = vector.load %arg18[%732, %c0_253, %c0_254] : memref<8x8x96xf32, #tpu.memory_space<vmem>>, vector<1x8x96xf32>
    %734 = vector.shape_cast %733 : vector<1x8x96xf32> to vector<8x96xf32>
    %735 = arith.index_cast %677 : i32 to index
    %c0_255 = arith.constant 0 : index
    %c0_256 = arith.constant 0 : index
    %736 = vector.load %arg4[%735, %c0_255, %c0_256] : memref<8x8x1xf32, #tpu.memory_space<vmem>>, vector<1x8x1xf32>
    %737 = vector.shape_cast %736 : vector<1x8x1xf32> to vector<8x1xf32>
    %738 = arith.truncf %665 : vector<8x32xf32> to vector<8x32xbf16>
    %c0_257 = arith.constant 0 : index
    %c0_258 = arith.constant 0 : index
    %739 = vector.load %arg10[%c0_257, %c0_258] : memref<32x96xbf16, #tpu.memory_space<vmem>>, vector<32x96xbf16>
    %cst_259 = arith.constant dense<0.000000e+00> : vector<8x96xf32>
    %740 = tpu.matmul %738, %739, %cst_259 {dimension_numbers = #tpu.dot_dimension_numbers<[1], [0], [0], [1], [0, 0, 1, 1], [], []>} : vector<8x32xbf16>, vector<32x96xbf16>, vector<8x96xf32> -> vector<8x96xf32>
    %741 = vector.extract_strided_slice %734 {offsets = [0, 0], sizes = [8, 32], strides = [1, 1]} : vector<8x96xf32> to vector<8x32xf32>
    %742 = vector.extract_strided_slice %740 {offsets = [0, 0], sizes = [8, 32], strides = [1, 1]} : vector<8x96xf32> to vector<8x32xf32>
    %743 = arith.addf %741, %742 : vector<8x32xf32>
    %744 = arith.negf %743 : vector<8x32xf32>
    %745 = math.exp %744 : vector<8x32xf32>
    %cst_260 = arith.constant 1.000000e+00 : f32
    %746 = vector.broadcast %cst_260 : f32 to vector<8x32xf32>
    %747 = arith.addf %746, %745 : vector<8x32xf32>
    %748 = arith.divf %746, %747 : vector<8x32xf32>
    %749 = vector.extract_strided_slice %734 {offsets = [0, 32], sizes = [8, 32], strides = [1, 1]} : vector<8x96xf32> to vector<8x32xf32>
    %750 = vector.extract_strided_slice %740 {offsets = [0, 32], sizes = [8, 32], strides = [1, 1]} : vector<8x96xf32> to vector<8x32xf32>
    %751 = arith.addf %749, %750 : vector<8x32xf32>
    %752 = arith.negf %751 : vector<8x32xf32>
    %753 = math.exp %752 : vector<8x32xf32>
    %cst_261 = arith.constant 1.000000e+00 : f32
    %754 = vector.broadcast %cst_261 : f32 to vector<8x32xf32>
    %755 = arith.addf %754, %753 : vector<8x32xf32>
    %756 = arith.divf %754, %755 : vector<8x32xf32>
    %757 = vector.extract_strided_slice %734 {offsets = [0, 64], sizes = [8, 32], strides = [1, 1]} : vector<8x96xf32> to vector<8x32xf32>
    %758 = vector.extract_strided_slice %740 {offsets = [0, 64], sizes = [8, 32], strides = [1, 1]} : vector<8x96xf32> to vector<8x32xf32>
    %c0_262 = arith.constant 0 : index
    %c0_263 = arith.constant 0 : index
    %759 = vector.load %arg12[%c0_262, %c0_263] : memref<1x32xf32, #tpu.memory_space<vmem>>, vector<1x32xf32>
    %760 = vector.broadcast %759 : vector<1x32xf32> to vector<8x32xf32>
    %761 = arith.addf %758, %760 : vector<8x32xf32>
    %762 = arith.mulf %748, %761 : vector<8x32xf32>
    %763 = arith.addf %757, %762 : vector<8x32xf32>
    %764 = math.tanh %763 : vector<8x32xf32>
    %cst_264 = arith.constant 1.000000e+00 : f32
    %765 = vector.broadcast %cst_264 : f32 to vector<8x32xf32>
    %766 = arith.subf %765, %756 : vector<8x32xf32>
    %767 = arith.mulf %766, %764 : vector<8x32xf32>
    %768 = arith.mulf %756, %665 : vector<8x32xf32>
    %769 = arith.addf %767, %768 : vector<8x32xf32>
    %cst_265 = arith.constant 0.000000e+00 : f32
    %770 = vector.broadcast %cst_265 : f32 to vector<8x1xf32>
    %771 = arith.cmpf ogt, %737, %770 : vector<8x1xf32>
    %772 = vector.shape_cast %771 : vector<8x1xi1> to vector<8x1xi1>
    %773 = vector.broadcast %772 : vector<8x1xi1> to vector<8x32xi1>
    %774 = arith.select %773, %769, %665 : vector<8x32xi1>, vector<8x32xf32>
    %cst_266 = arith.constant 0.000000e+00 : f32
    %775 = vector.broadcast %cst_266 : f32 to vector<8x1xf32>
    %776 = arith.cmpf ogt, %737, %775 : vector<8x1xf32>
    %cst_267 = arith.constant 0.000000e+00 : f32
    %777 = vector.broadcast %cst_267 : f32 to vector<8x32xf32>
    %778 = vector.shape_cast %776 : vector<8x1xi1> to vector<8x1xi1>
    %779 = vector.broadcast %778 : vector<8x1xi1> to vector<8x32xi1>
    %780 = arith.select %779, %774, %777 : vector<8x32xi1>, vector<8x32xf32>
    %781 = arith.truncf %780 : vector<8x32xf32> to vector<8x32xbf16>
    %782 = arith.index_cast %677 : i32 to index
    %c0_268 = arith.constant 0 : index
    %c0_269 = arith.constant 0 : index
    %783 = vector.load %arg14[%782, %c0_268, %c0_269] : memref<8x8x32xbf16, #tpu.memory_space<vmem>>, vector<1x8x32xbf16>
    %784 = vector.shape_cast %783 : vector<1x8x32xbf16> to vector<8x32xbf16>
    %785 = vector.shape_cast %781 : vector<8x32xbf16> to vector<1x8x32xbf16>
    tpu.vector_store %arg14[%782, %c0_268, %c0_269], %785 {strides = array<i32>} : memref<8x8x32xbf16, #tpu.memory_space<vmem>>, vector<1x8x32xbf16>,
    %c7_i32_270 = arith.constant 7 : i32
    %c7_i32_271 = arith.constant 7 : i32
    %786 = arith.subi %c7_i32_271, %c7_i32_270 : i32
    %787 = arith.index_cast %c7_i32_270 : i32 to index
    %c0_272 = arith.constant 0 : index
    %c0_273 = arith.constant 0 : index
    %788 = vector.load %arg17[%787, %c0_272, %c0_273] : memref<8x8x96xf32, #tpu.memory_space<vmem>>, vector<1x8x96xf32>
    %789 = vector.shape_cast %788 : vector<1x8x96xf32> to vector<8x96xf32>
    %790 = arith.index_cast %c7_i32_270 : i32 to index
    %c0_274 = arith.constant 0 : index
    %c0_275 = arith.constant 0 : index
    %791 = vector.load %arg3[%790, %c0_274, %c0_275] : memref<8x8x1xf32, #tpu.memory_space<vmem>>, vector<1x8x1xf32>
    %792 = vector.shape_cast %791 : vector<1x8x1xf32> to vector<8x1xf32>
    %793 = arith.truncf %720 : vector<8x32xf32> to vector<8x32xbf16>
    %c0_276 = arith.constant 0 : index
    %c0_277 = arith.constant 0 : index
    %794 = vector.load %arg6[%c0_276, %c0_277] : memref<32x96xbf16, #tpu.memory_space<vmem>>, vector<32x96xbf16>
    %cst_278 = arith.constant dense<0.000000e+00> : vector<8x96xf32>
    %795 = tpu.matmul %793, %794, %cst_278 {dimension_numbers = #tpu.dot_dimension_numbers<[1], [0], [0], [1], [0, 0, 1, 1], [], []>} : vector<8x32xbf16>, vector<32x96xbf16>, vector<8x96xf32> -> vector<8x96xf32>
    %796 = vector.extract_strided_slice %789 {offsets = [0, 0], sizes = [8, 32], strides = [1, 1]} : vector<8x96xf32> to vector<8x32xf32>
    %797 = vector.extract_strided_slice %795 {offsets = [0, 0], sizes = [8, 32], strides = [1, 1]} : vector<8x96xf32> to vector<8x32xf32>
    %798 = arith.addf %796, %797 : vector<8x32xf32>
    %799 = arith.negf %798 : vector<8x32xf32>
    %800 = math.exp %799 : vector<8x32xf32>
    %cst_279 = arith.constant 1.000000e+00 : f32
    %801 = vector.broadcast %cst_279 : f32 to vector<8x32xf32>
    %802 = arith.addf %801, %800 : vector<8x32xf32>
    %803 = arith.divf %801, %802 : vector<8x32xf32>
    %804 = vector.extract_strided_slice %789 {offsets = [0, 32], sizes = [8, 32], strides = [1, 1]} : vector<8x96xf32> to vector<8x32xf32>
    %805 = vector.extract_strided_slice %795 {offsets = [0, 32], sizes = [8, 32], strides = [1, 1]} : vector<8x96xf32> to vector<8x32xf32>
    %806 = arith.addf %804, %805 : vector<8x32xf32>
    %807 = arith.negf %806 : vector<8x32xf32>
    %808 = math.exp %807 : vector<8x32xf32>
    %cst_280 = arith.constant 1.000000e+00 : f32
    %809 = vector.broadcast %cst_280 : f32 to vector<8x32xf32>
    %810 = arith.addf %809, %808 : vector<8x32xf32>
    %811 = arith.divf %809, %810 : vector<8x32xf32>
    %812 = vector.extract_strided_slice %789 {offsets = [0, 64], sizes = [8, 32], strides = [1, 1]} : vector<8x96xf32> to vector<8x32xf32>
    %813 = vector.extract_strided_slice %795 {offsets = [0, 64], sizes = [8, 32], strides = [1, 1]} : vector<8x96xf32> to vector<8x32xf32>
    %c0_281 = arith.constant 0 : index
    %c0_282 = arith.constant 0 : index
    %814 = vector.load %arg8[%c0_281, %c0_282] : memref<1x32xf32, #tpu.memory_space<vmem>>, vector<1x32xf32>
    %815 = vector.broadcast %814 : vector<1x32xf32> to vector<8x32xf32>
    %816 = arith.addf %813, %815 : vector<8x32xf32>
    %817 = arith.mulf %803, %816 : vector<8x32xf32>
    %818 = arith.addf %812, %817 : vector<8x32xf32>
    %819 = math.tanh %818 : vector<8x32xf32>
    %cst_283 = arith.constant 1.000000e+00 : f32
    %820 = vector.broadcast %cst_283 : f32 to vector<8x32xf32>
    %821 = arith.subf %820, %811 : vector<8x32xf32>
    %822 = arith.mulf %821, %819 : vector<8x32xf32>
    %823 = arith.mulf %811, %720 : vector<8x32xf32>
    %824 = arith.addf %822, %823 : vector<8x32xf32>
    %cst_284 = arith.constant 0.000000e+00 : f32
    %825 = vector.broadcast %cst_284 : f32 to vector<8x1xf32>
    %826 = arith.cmpf ogt, %792, %825 : vector<8x1xf32>
    %827 = vector.shape_cast %826 : vector<8x1xi1> to vector<8x1xi1>
    %828 = vector.broadcast %827 : vector<8x1xi1> to vector<8x32xi1>
    %829 = arith.select %828, %824, %720 : vector<8x32xi1>, vector<8x32xf32>
    %cst_285 = arith.constant 0.000000e+00 : f32
    %830 = vector.broadcast %cst_285 : f32 to vector<8x1xf32>
    %831 = arith.cmpf ogt, %792, %830 : vector<8x1xf32>
    %cst_286 = arith.constant 0.000000e+00 : f32
    %832 = vector.broadcast %cst_286 : f32 to vector<8x32xf32>
    %833 = vector.shape_cast %831 : vector<8x1xi1> to vector<8x1xi1>
    %834 = vector.broadcast %833 : vector<8x1xi1> to vector<8x32xi1>
    %835 = arith.select %834, %829, %832 : vector<8x32xi1>, vector<8x32xf32>
    %836 = arith.truncf %835 : vector<8x32xf32> to vector<8x32xbf16>
    %837 = arith.index_cast %c7_i32_270 : i32 to index
    %c0_287 = arith.constant 0 : index
    %c0_288 = arith.constant 0 : index
    %838 = vector.load %arg13[%837, %c0_287, %c0_288] : memref<8x8x32xbf16, #tpu.memory_space<vmem>>, vector<1x8x32xbf16>
    %839 = vector.shape_cast %838 : vector<1x8x32xbf16> to vector<8x32xbf16>
    %840 = vector.shape_cast %836 : vector<8x32xbf16> to vector<1x8x32xbf16>
    tpu.vector_store %arg13[%837, %c0_287, %c0_288], %840 {strides = array<i32>} : memref<8x8x32xbf16, #tpu.memory_space<vmem>>, vector<1x8x32xbf16>,
    %841 = arith.index_cast %786 : i32 to index
    %c0_289 = arith.constant 0 : index
    %c0_290 = arith.constant 0 : index
    %842 = vector.load %arg18[%841, %c0_289, %c0_290] : memref<8x8x96xf32, #tpu.memory_space<vmem>>, vector<1x8x96xf32>
    %843 = vector.shape_cast %842 : vector<1x8x96xf32> to vector<8x96xf32>
    %844 = arith.index_cast %786 : i32 to index
    %c0_291 = arith.constant 0 : index
    %c0_292 = arith.constant 0 : index
    %845 = vector.load %arg4[%844, %c0_291, %c0_292] : memref<8x8x1xf32, #tpu.memory_space<vmem>>, vector<1x8x1xf32>
    %846 = vector.shape_cast %845 : vector<1x8x1xf32> to vector<8x1xf32>
    %847 = arith.truncf %774 : vector<8x32xf32> to vector<8x32xbf16>
    %c0_293 = arith.constant 0 : index
    %c0_294 = arith.constant 0 : index
    %848 = vector.load %arg10[%c0_293, %c0_294] : memref<32x96xbf16, #tpu.memory_space<vmem>>, vector<32x96xbf16>
    %cst_295 = arith.constant dense<0.000000e+00> : vector<8x96xf32>
    %849 = tpu.matmul %847, %848, %cst_295 {dimension_numbers = #tpu.dot_dimension_numbers<[1], [0], [0], [1], [0, 0, 1, 1], [], []>} : vector<8x32xbf16>, vector<32x96xbf16>, vector<8x96xf32> -> vector<8x96xf32>
    %850 = vector.extract_strided_slice %843 {offsets = [0, 0], sizes = [8, 32], strides = [1, 1]} : vector<8x96xf32> to vector<8x32xf32>
    %851 = vector.extract_strided_slice %849 {offsets = [0, 0], sizes = [8, 32], strides = [1, 1]} : vector<8x96xf32> to vector<8x32xf32>
    %852 = arith.addf %850, %851 : vector<8x32xf32>
    %853 = arith.negf %852 : vector<8x32xf32>
    %854 = math.exp %853 : vector<8x32xf32>
    %cst_296 = arith.constant 1.000000e+00 : f32
    %855 = vector.broadcast %cst_296 : f32 to vector<8x32xf32>
    %856 = arith.addf %855, %854 : vector<8x32xf32>
    %857 = arith.divf %855, %856 : vector<8x32xf32>
    %858 = vector.extract_strided_slice %843 {offsets = [0, 32], sizes = [8, 32], strides = [1, 1]} : vector<8x96xf32> to vector<8x32xf32>
    %859 = vector.extract_strided_slice %849 {offsets = [0, 32], sizes = [8, 32], strides = [1, 1]} : vector<8x96xf32> to vector<8x32xf32>
    %860 = arith.addf %858, %859 : vector<8x32xf32>
    %861 = arith.negf %860 : vector<8x32xf32>
    %862 = math.exp %861 : vector<8x32xf32>
    %cst_297 = arith.constant 1.000000e+00 : f32
    %863 = vector.broadcast %cst_297 : f32 to vector<8x32xf32>
    %864 = arith.addf %863, %862 : vector<8x32xf32>
    %865 = arith.divf %863, %864 : vector<8x32xf32>
    %866 = vector.extract_strided_slice %843 {offsets = [0, 64], sizes = [8, 32], strides = [1, 1]} : vector<8x96xf32> to vector<8x32xf32>
    %867 = vector.extract_strided_slice %849 {offsets = [0, 64], sizes = [8, 32], strides = [1, 1]} : vector<8x96xf32> to vector<8x32xf32>
    %c0_298 = arith.constant 0 : index
    %c0_299 = arith.constant 0 : index
    %868 = vector.load %arg12[%c0_298, %c0_299] : memref<1x32xf32, #tpu.memory_space<vmem>>, vector<1x32xf32>
    %869 = vector.broadcast %868 : vector<1x32xf32> to vector<8x32xf32>
    %870 = arith.addf %867, %869 : vector<8x32xf32>
    %871 = arith.mulf %857, %870 : vector<8x32xf32>
    %872 = arith.addf %866, %871 : vector<8x32xf32>
    %873 = math.tanh %872 : vector<8x32xf32>
    %cst_300 = arith.constant 1.000000e+00 : f32
    %874 = vector.broadcast %cst_300 : f32 to vector<8x32xf32>
    %875 = arith.subf %874, %865 : vector<8x32xf32>
    %876 = arith.mulf %875, %873 : vector<8x32xf32>
    %877 = arith.mulf %865, %774 : vector<8x32xf32>
    %878 = arith.addf %876, %877 : vector<8x32xf32>
    %cst_301 = arith.constant 0.000000e+00 : f32
    %879 = vector.broadcast %cst_301 : f32 to vector<8x1xf32>
    %880 = arith.cmpf ogt, %846, %879 : vector<8x1xf32>
    %881 = vector.shape_cast %880 : vector<8x1xi1> to vector<8x1xi1>
    %882 = vector.broadcast %881 : vector<8x1xi1> to vector<8x32xi1>
    %883 = arith.select %882, %878, %774 : vector<8x32xi1>, vector<8x32xf32>
    %cst_302 = arith.constant 0.000000e+00 : f32
    %884 = vector.broadcast %cst_302 : f32 to vector<8x1xf32>
    %885 = arith.cmpf ogt, %846, %884 : vector<8x1xf32>
    %cst_303 = arith.constant 0.000000e+00 : f32
    %886 = vector.broadcast %cst_303 : f32 to vector<8x32xf32>
    %887 = vector.shape_cast %885 : vector<8x1xi1> to vector<8x1xi1>
    %888 = vector.broadcast %887 : vector<8x1xi1> to vector<8x32xi1>
    %889 = arith.select %888, %883, %886 : vector<8x32xi1>, vector<8x32xf32>
    %890 = arith.truncf %889 : vector<8x32xf32> to vector<8x32xbf16>
    %891 = arith.index_cast %786 : i32 to index
    %c0_304 = arith.constant 0 : index
    %c0_305 = arith.constant 0 : index
    %892 = vector.load %arg14[%891, %c0_304, %c0_305] : memref<8x8x32xbf16, #tpu.memory_space<vmem>>, vector<1x8x32xbf16>
    %893 = vector.shape_cast %892 : vector<1x8x32xbf16> to vector<8x32xbf16>
    %894 = vector.shape_cast %890 : vector<8x32xbf16> to vector<1x8x32xbf16>
    tpu.vector_store %arg14[%891, %c0_304, %c0_305], %894 {strides = array<i32>} : memref<8x8x32xbf16, #tpu.memory_space<vmem>>, vector<1x8x32xbf16>,
    %c8_i32 = arith.constant 8 : i32
    %c0_306 = arith.constant 0 : index
    %c0_307 = arith.constant 0 : index
    %895 = vector.load %arg15[%c0_306, %c0_307] : memref<8x32xf32, #tpu.memory_space<vmem>>, vector<8x32xf32>
    tpu.vector_store %arg15[%c0_306, %c0_307], %829 {strides = array<i32>} : memref<8x32xf32, #tpu.memory_space<vmem>>, vector<8x32xf32>,
    %c0_308 = arith.constant 0 : index
    %c0_309 = arith.constant 0 : index
    %896 = vector.load %arg16[%c0_308, %c0_309] : memref<8x32xf32, #tpu.memory_space<vmem>>, vector<8x32xf32>
    tpu.vector_store %arg16[%c0_308, %c0_309], %883 {strides = array<i32>} : memref<8x32xf32, #tpu.memory_space<vmem>>, vector<8x32xf32>,
    return
  }
  func.func @transform_0(%arg0: i32) -> (i32, i32, i32) {
    %c0_i32 = arith.constant 0 : i32
    %c0_i32_0 = arith.constant 0 : i32
    %c0_i32_1 = arith.constant 0 : i32
    return %arg0, %c0_i32, %c0_i32_0 : i32, i32, i32
  }
  func.func @transform_1(%arg0: i32) -> (i32, i32, i32) {
    %c1_i32 = arith.constant 1 : i32
    %0 = arith.subi %c1_i32, %arg0 : i32
    %c0_i32 = arith.constant 0 : i32
    %c0_i32_0 = arith.constant 0 : i32
    %c0_i32_1 = arith.constant 0 : i32
    return %0, %c0_i32, %c0_i32_0 : i32, i32, i32
  }
  func.func @transform_2(%arg0: i32) -> (i32, i32, i32) {
    %c0_i32 = arith.constant 0 : i32
    %c0_i32_0 = arith.constant 0 : i32
    %c0_i32_1 = arith.constant 0 : i32
    return %arg0, %c0_i32, %c0_i32_0 : i32, i32, i32
  }
  func.func @transform_3(%arg0: i32) -> (i32, i32, i32) {
    %c1_i32 = arith.constant 1 : i32
    %0 = arith.subi %c1_i32, %arg0 : i32
    %c0_i32 = arith.constant 0 : i32
    %c0_i32_0 = arith.constant 0 : i32
    %c0_i32_1 = arith.constant 0 : i32
    return %0, %c0_i32, %c0_i32_0 : i32, i32, i32
  }
  func.func @transform_4(%arg0: i32) -> (i32, i32) {
    %c0_i32 = arith.constant 0 : i32
    %c0_i32_0 = arith.constant 0 : i32
    %c0_i32_1 = arith.constant 0 : i32
    return %c0_i32, %c0_i32_0 : i32, i32
  }
  func.func @transform_5(%arg0: i32) -> (i32, i32) {
    %c0_i32 = arith.constant 0 : i32
    %c0_i32_0 = arith.constant 0 : i32
    %c0_i32_1 = arith.constant 0 : i32
    return %c0_i32, %c0_i32_0 : i32, i32
  }
  func.func @transform_6(%arg0: i32) -> (i32, i32) {
    %c0_i32 = arith.constant 0 : i32
    %c0_i32_0 = arith.constant 0 : i32
    %c0_i32_1 = arith.constant 0 : i32
    return %c0_i32, %c0_i32_0 : i32, i32
  }
  func.func @transform_7(%arg0: i32) -> (i32, i32) {
    %c0_i32 = arith.constant 0 : i32
    %c0_i32_0 = arith.constant 0 : i32
    %c0_i32_1 = arith.constant 0 : i32
    return %c0_i32, %c0_i32_0 : i32, i32
  }
  func.func @transform_8(%arg0: i32) -> (i32, i32) {
    %c0_i32 = arith.constant 0 : i32
    %c0_i32_0 = arith.constant 0 : i32
    %c0_i32_1 = arith.constant 0 : i32
    return %c0_i32, %c0_i32_0 : i32, i32
  }
  func.func @transform_9(%arg0: i32) -> (i32, i32) {
    %c0_i32 = arith.constant 0 : i32
    %c0_i32_0 = arith.constant 0 : i32
    %c0_i32_1 = arith.constant 0 : i32
    return %c0_i32, %c0_i32_0 : i32, i32
  }
  func.func @transform_10(%arg0: i32) -> (i32, i32) {
    %c0_i32 = arith.constant 0 : i32
    %c0_i32_0 = arith.constant 0 : i32
    %c0_i32_1 = arith.constant 0 : i32
    return %c0_i32, %c0_i32_0 : i32, i32
  }
  func.func @transform_11(%arg0: i32) -> (i32, i32) {
    %c0_i32 = arith.constant 0 : i32
    %c0_i32_0 = arith.constant 0 : i32
    %c0_i32_1 = arith.constant 0 : i32
    return %c0_i32, %c0_i32_0 : i32, i32
  }
  func.func @transform_12(%arg0: i32) -> (i32, i32, i32) {
    %c0_i32 = arith.constant 0 : i32
    %c0_i32_0 = arith.constant 0 : i32
    %c0_i32_1 = arith.constant 0 : i32
    return %arg0, %c0_i32, %c0_i32_0 : i32, i32, i32
  }
  func.func @transform_13(%arg0: i32) -> (i32, i32, i32) {
    %c1_i32 = arith.constant 1 : i32
    %0 = arith.subi %c1_i32, %arg0 : i32
    %c0_i32 = arith.constant 0 : i32
    %c0_i32_0 = arith.constant 0 : i32
    %c0_i32_1 = arith.constant 0 : i32
    return %0, %c0_i32, %c0_i32_0 : i32, i32, i32
  }
}

</mosaic_0001>

<bundles_post_ra>
// kernel: tpu_custom_call.1
= control target key start
LH: loop header
LB: loop body
LE: loop exit
PB: predicated region body
PF: predicated region fallthrough
CT: control target
= control target key end

     0   :  { %s4544_s0 = inlined_call_operand.vmem [shape: bf16[16,8,32], index: 0, kind: input, shape index: {}]   ;;  %s4545_s1 = inlined_call_operand.vmem [shape: bf16[16,8,32], index: 1, kind: input, shape index: {}]   ;;  %s4546_s2 = inlined_call_operand.vmem [shape: f32[16,8,1], index: 2, kind: input, shape index: {}]   ;;  %s4547_s3 = inlined_call_operand.vmem [shape: f32[16,8,1], index: 3, kind: input, shape index: {}]   ;;  %s4548_s4 = inlined_call_operand.vmem [shape: bf16[32,96], index: 4, kind: input, shape index: {}]   ;;  %s4549_s5 = inlined_call_operand.vmem [shape: bf16[32,96], index: 5, kind: input, shape index: {}]   ;;  %s4550_s6 = inlined_call_operand.vmem [shape: f32[1,96], index: 6, kind: input, shape index: {}]   ;;  %s4551_s7 = inlined_call_operand.vmem [shape: f32[1,32], index: 7, kind: input, shape index: {}]   ;;  %s4552_s8 = inlined_call_operand.vmem [shape: bf16[32,96], index: 8, kind: input, shape index: {}]   ;;  %s4553_s9 = inlined_call_operand.vmem [shape: bf16[32,96], index: 9, kind: input, shape index: {}]   ;;  %s4554_s10 = inlined_call_operand.vmem [shape: f32[1,96], index: 10, kind: input, shape index: {}]   ;;  %s4555_s11 = inlined_call_operand.vmem [shape: f32[1,32], index: 11, kind: input, shape index: {}]   ;;  %s4556_s12 = inlined_call_operand.hbm [shape: bf16[16,8,32], index: 12, kind: output, shape index: {0}]   ;;  %s4557_s13 = inlined_call_operand.hbm [shape: bf16[16,8,32], index: 13, kind: output, shape index: {1}]  }
   0x1   :  { %4578 = sst [smem:[#allocation26_spill]] %s4554_s10 }
   0x2   :  { %4579 = sst [smem:[#allocation27_spill]] %s4556_s12 }
   0x3   :  { %4580 = sst [smem:[#allocation28_spill]] %s4557_s13 }
   0x4   :  { %19 = vsyncpa [#allocation7], 0 }
   0x5   :  { %21 = vsyncpa [#allocation7 + $0x1], 0 }
   0x6   :  { %22 = vsyncpa [#allocation9], 0 }
   0x7   :  { %24 = vsyncpa [#allocation9 + $0x1], 0  ;;  %s3727_s25 = smov 0   ;;  %s3729_s26 = smov 0  }
   0x8   :  { %s3731_s27 = smov 0   ;;  %s3733_s28 = smov 0  }
   0x9   :  { %s3735_s29 = smov 0   ;;  %s3737_s30 = smov 0  }
   0xa   :  { %s3739_s14 = smov 0  }
   0xb LB: > { %4581 = sst [smem:[#allocation12_spill]] %s3621_s25  ;;  %s3763_s15 = sadd.s32 4294967295, %s3645_s14   ;;  %s3645_s14 = sphi %s3739_s14, %s4616_s14   ;;  %s3641_s30 = sphi %s3737_s30, %s4622_s30   ;;  %s3637_s29 = sphi %s3735_s29, %s4621_s29   ;;  %s3633_s28 = sphi %s3733_s28, %s4620_s28   ;;  %s3629_s27 = sphi %s3731_s27, %s4619_s27   ;;  %s3625_s26 = sphi %s3729_s26, %s4618_s26   ;;  %s3621_s25 = sphi %s3727_s25, %s4617_s25  }
   0xc   : > { %4582 = sst [smem:[#allocation13_spill]] %s3625_s26  ;;  %s2914_s16 = sadd.s32 4294967294, %s3645_s14  }
   0xd   : > { %4583 = sst [smem:[#allocation14_spill]] %s3629_s27  ;;  %s3767_s17 = sadd.s32 1, %s3645_s14  }
   0xe   : > { %4584 = sst [smem:[#allocation15_spill]] %s3633_s28  ;;  %s313_s18 = sadd.s32 1, %s3641_s30 }
   0xf   : > { %4585 = sst [smem:[#allocation16_spill]] %s3637_s29  ;;  %s310_s19 = ssub.s32 %s3645_s14, %s3767_s17 }
  0x10   : > { %4586 = sst [smem:[#allocation17_spill]] %s3641_s30  ;;  %p323_p0 = scmp.ne.s32.totalorder %s3641_s30, %s3637_s29 }
  0x11   : > { %4587 = sst [smem:[#allocation18_spill]] %s3645_s14  ;;  %p311_p1 = scmp.eq.s32.totalorder %s310_s19, 0 }
  0x12   : > { %4588 = sst [smem:[#allocation19_spill]] %s3767_s17  ;;  %p324_p2 = scmp.eq.s32.totalorder %s3763_s15, 1 }
  0x13   : > { %p329_p3 = scmp.ne.s32.totalorder %s3637_s29, %s3633_s28  ;;  %p3777_p4 = scmp.eq.s32.totalorder %s2914_s16, 1 }
  0x14   : > { %s3782_s21 = scalar_select %p311_p1, %s3641_s30, %s313_s18  }
  0x15   : > { %p3786_p5 = por %p324_p2, %p323_p0  ;;  %p3792_p6 = por %p3777_p4, %p329_p3 }
  0x16   : > { %4590 = sst [smem:[#allocation20_spill]] %s3782_s21  ;;  %s336_s24 = ssub.s32 1, %s3645_s14 }
  0x17   : > { %s4591_s22 = scalar_select %p3786_p5, 1, 0 }
  0x18   : > { %s4593_s23 = scalar_select %p3792_p6, 1, 0 }
  0x19   : > { %4592 = sst [smem:[#allocation21_spill]] %s4591_s22  ;;  %s337_s19 = ssub.s32 1, %s3767_s17 }
  0x1a   : > { %4594 = sst [smem:[#allocation22_spill]] %s4593_s23  ;;  %s338_s16 = ssub.s32 %s336_s24, %s337_s19 }
  0x1b   : > { %s341_s28 = sadd.s32 1, %s3629_s27  ;;  %p339_p7 = scmp.eq.s32.totalorder %s338_s16, 0 }
  0x1c   : > { %p351_p8 = scmp.ne.s32.totalorder %s3629_s27, %s3625_s26  ;;  %p357_p9 = scmp.ne.s32.totalorder %s3625_s26, %s3621_s25 }
  0x1d   : > { %p2917_p10 = scmp.ge.s32.totalorder %s3645_s14, 1  ;;  %p440_p13 = scmp.lt.s32.totalorder %s3645_s14, 3 }
  0x1e   : > { %s3805_s18 = scalar_select %p339_p7, %s3629_s27, %s341_s28  }
  0x1f   : > { %p3809_p11 = por %p351_p8, %p324_p2  ;;  %p3815_p12 = por %p357_p9, %p3777_p4 }
  0x20   : > { %4595 = sst [smem:[#allocation23_spill]] %s3805_s18  ;;  %p441_p0 = pnand %p2917_p10, %p440_p13 }
  0x21   : > { %s4596_s21 = scalar_select %p3809_p11, 1, 0 }
  0x22   : > { %s4598_s30 = scalar_select %p3815_p12, 1, 0 }
  0x23   : > { %4597 = sst [smem:[#allocation24_spill]] %s4596_s21  ;;  %444 = sbr.rel (%p441_p0) target bundleno = 5562 (0x15ba), region = 68 }
  0x24   : > { %4599 = sst [smem:[#allocation25_spill]] %s4598_s30  ;;  %s4570_s28 = sand.u32 (!%p441_p0), 1, %s3637_s29  }
  0x25   : > { %s4571_s24 = sand.u32 (!%p441_p0), 1, %s3625_s26   ;;  %s2918_s19 = sshll.u32 (!%p441_p0), %s4570_s28, 5 }
  0x26   : > { %s2919_s20 = sshll.u32 (!%p441_p0), %s4571_s24, 5  ;;  %s2920_s16 = sshll.u32 (!%p441_p0), %s3763_s15, 3 }
  0x27   : > { %s4574_s18 = ssub.s32 (!%p441_p0), 1, %s3763_s15  ;;  %p507_p1 = scmp.lt.s32.totalorder (!%p441_p0), %s2920_s16, 15 }
  0x28   : > { %s2922_s27 = sshll.u32 %s4574_s18, 3  ;;  %s3850_s25 = scalar_lea.vmem [#allocation6], %s2918_s19 }
  0x29   : > { %p514_p2 = scmp.lt.s32.totalorder %s2922_s27, 15  ;;  %s4624_s16 = smov (!%p507_p1, %s2920_s16), 15 }
  0x2a   : > { %s2921_s17 = sshll.u32 %s4624_s16, 2  ;;  %s2925_s30 = sshll.u32 %s4624_s16, 3 }
  0x2b   : > { %s4626_s27 = smov (!%p514_p2, %s2922_s27), 15  ;;  %s3833_s14 = scalar_lea.vmem %s4544_s0, %s2921_s17 }
  0x2c   : > { %s2923_s13 = sshll.u32 %s4626_s27, 2  ;;  %s3843_s18 = scalar_lea.vmem %s4546_s2, %s2925_s30 }
  0x2d   : > { %s3838_s24 = scalar_lea.vmem %s4545_s1, %s2923_s13  ;;  %s2927_s22 = sshll.u32 %s4626_s27, 3 }
  0x2e   : > { %s3848_s16 = scalar_lea.vmem %s4547_s3, %s2927_s22  ;;  %s3852_s17 = scalar_lea.vmem [#allocation8], %s2919_s20 }
  0x2f   : > { %p2928_p3 = scmp.ne.s32.totalorder %s3763_s15, 0 }
  0x31   : > { %541 = sbr.rel (%p2928_p3) target bundleno = 56 (0x38), region = 72 }
  0x36   : > { %vm542_vm0 = vcmask 261120   ;;  %v3647_v0 = vmov 0.0  }
  0x37   : > { %543 = vst.msk [vmem:[#allocation2] sm:$0xff] %vm542_vm0, %v3647_v0  ;;  %544 = vst.msk [vmem:[#allocation3] sm:$0xff] %vm542_vm0, %v3647_v0 }
  0x38 PF: > { %v3391_v1 = vld [vmem:[%s4548_s4 + $0x8] sm:$0xff]   ;;  %v3393_v3 = vld [vmem:[%s4548_s4] sm:$0xff]   ;;  %vm604_vm1 = vcmask 261120   ;;  %v3648_v9 = vmov 0.0   ;;  %v3401_v12 = vld [vmem:[%s3833_s14 + $0x10] sm:$0xff]   ;;  %vm3650_vm2 = vmmov 0  }
  0x39   : > { %v3392_v2 = vld [vmem:[%s4552_s8 + $0x8] sm:$0xff]   ;;  %3161 = vmatprep.subr.bf16.mxu0 %v3391_v1  ;;  %v3394_v4 = vld [vmem:[%s4552_s8] sm:$0xff]   ;;  %v3402_v13 = vld [vmem:[%s3838_s24 + $0x10] sm:$0xff]   ;;  %s4600_s28 = sld [smem:[#allocation26_spill]]  ;;  %vm682_vm3 = vcmask 785408   ;;  %v3651_v50 = vmov 0  }
  0x3a   : > { %3173 = vmatprep.subr.bf16.mxu1 %v3392_v2  ;;  %3162 = vmatpush3.bf16.msra.mxu0 %v3391_v1  ;;  %v3395_v5 = vld [vmem:[%s3833_s14] sm:$0xff]   ;;  %v3397_v7 = vld [vmem:[%s3833_s14 + $0x8] sm:$0xff]   ;;  %v3403_v14 = vld [vmem:[%s3833_s14 + $0x18] sm:$0xff]   ;;  %s3649_s14 = smov 64   ;;  %s3652_s19 = smov 32  }
  0x3b   : > { %3174 = vmatpush3.bf16.msra.mxu1 %v3392_v2  ;;  %3163 = vmatprep.subr.bf16.mxu0 %v3393_v3  ;;  %v3396_v6 = vld [vmem:[%s3838_s24] sm:$0xff]   ;;  %v3398_v8 = vld [vmem:[%s3838_s24 + $0x8] sm:$0xff]   ;;  %v3404_v15 = vld [vmem:[%s3838_s24 + $0x18] sm:$0xff]   ;;  %s3653_s26 = smov 96   ;;  %s2767_s21 = sshll.u32 %s3850_s25, 4  ;;  %s4439_s21 = int_to_ptr.vmem [resolvable:$true] %s2767_s21 }
  0x3c   : > { %3175 = vmatprep.subr.bf16.mxu1 %v3394_v4  ;;  %3165 = vmatprep.mubr.msk.bf16.mxu0 %vm604_vm1, %v3395_v5  ;;  %v3399_v10 = vld [vmem:[%s4549_s5 + $0x8] sm:$0xff]   ;;  %v3405_v16 = vld [vmem:[%s4549_s5] sm:$0xff]   ;;  %s4605_s12 = ssub.s32 1, %s3763_s15  ;;  %s2784_s10 = sshll.u32 %s3852_s17, 4  ;;  %s4484_s10 = int_to_ptr.vmem [resolvable:$true] %s2784_s10 }
  0x3d   : > { %3177 = vmatprep.mubr.msk.bf16.mxu1 %vm604_vm1, %v3396_v6  ;;  %v3400_v11 = vld [vmem:[%s4553_s9 + $0x8] sm:$0xff]   ;;  %v3406_v17 = vld [vmem:[%s4553_s9] sm:$0xff]   ;;  %3389 = vset.pattern.permute.xlu0 %v3651_v50  ;;  %s4443_s13 = sshll.u32 %s4605_s12, 9  ;;  %s3531_s29 = scalar_lea.vmem %s4439_s21, 512 }
  0x3e   : > { %3164 = vmatpush3.bf16.msra.mxu0 %v3393_v3  ;;  %v3900_v18 = vld [vmem:[%s4551_s7] ss:$0 sm:$0xff]  ;;  %v3912_v21 = vld [vmem:[#allocation3] sm:$0xff]  ;;  %3390 = vset.pattern.permute.xlu1 %v3651_v50  ;;  %p3532_p4 = scmp.ne.s32.totalorder %s4439_s21, %s3531_s29  ;;  %s3654_s30 = smov [#allocation6]  }
  0x3f   : > { %3176 = vmatpush3.bf16.msra.mxu1 %v3394_v4  ;;  %3185 = vmatprep.subr.bf16.mxu0 %v3648_v9  ;;  %v3902_v19 = vld [vmem:[#allocation2] sm:$0xff]  ;;  %v944_v23 = vpack.c.bf16 %v3912_v21, %v3912_v21 }
  0x40   : > { %3193 = vmatprep.subr.bf16.mxu1 %v3648_v9  ;;  %896 = vrot.lane.b32.xlu0 %v3900_v18, %s3649_s14  ;;  %v3909_v20 = vld [vmem:[%s4555_s11] ss:$0 sm:$0xff]  ;;  %v823_v22 = vpack.c.bf16 %v3902_v19, %v3902_v19  ;;  %p3533_p7 = pnand %p3532_p4, %p3786_p5 }
  0x41   : > { %3166 = vmatmul.mubr.msk.bf16.vlgmr.msra.gmra.mxu0 %vm604_vm1, %v3397_v7  ;;  %v2929_v24 = vld [vmem:[%s4550_s6] ss:$0 sm:$0xff] }
  0x42   : > { %3178 = vmatmul.mubr.msk.bf16.vlgmr.msra.gmra.mxu1 %vm604_vm1, %v3398_v8  ;;  %3186 = vmatpush3.bf16.msra.mxu0 %v3399_v10  ;;  %v2940_v25 = vld [vmem:[%s4600_s28] ss:$0 sm:$0xff]  ;;  %s4603_s28 = sld [smem:[#allocation27_spill]]  ;;  %p3534_p8 = pneg %p3533_p7 }
  0x43   : > { %3194 = vmatpush3.bf16.msra.mxu1 %v3400_v11  ;;  %3169 = vmatprep.mubr.msk.bf16.mxu0 %vm604_vm1, %v3401_v12 }
  0x44   : > { %3181 = vmatprep.mubr.msk.bf16.mxu1 %vm604_vm1, %v3402_v13  ;;  %3187 = vmatprep.subr.bf16.mxu0 %v3648_v9 }
  0x45   : > { %3195 = vmatprep.subr.bf16.mxu1 %v3648_v9  ;;  %1017 = vrot.lane.b32.xlu0 %v3909_v20, %s3649_s14 }
  0x46   : > { %3188 = vmatpush3.bf16.msra.mxu0 %v3405_v16 }
  0x47   : > { %3196 = vmatpush3.bf16.msra.mxu1 %v3406_v17  ;;  %3201 = vmatprep.subr.bf16.mxu0 %v3648_v9 }
  0x48   : > { %3209 = vmatprep.subr.bf16.mxu1 %v3648_v9 }
  0x49   : > { %3170 = vmatmul.mubr.msk.bf16.gmra.mxu0 %vm604_vm1, %v3403_v14 }
  0x4a   : > { %3182 = vmatmul.mubr.msk.bf16.gmra.mxu1 %vm604_vm1, %v3404_v15  ;;  %3189 = vmatprep.mubr.msk.bf16.mxu0 %vm3650_vm2, %v3648_v9 }
  0x4b   : > { %3197 = vmatprep.mubr.msk.bf16.mxu1 %vm3650_vm2, %v3648_v9 }
  0x51   : > { %3190 = vmatmul.mubr.msk.bf16.vlgmr.msra.gmra.mxu0 %vm604_vm1, %v823_v22  ;;  %v822_v22 = vld [vmem:[%s3843_s18] sm:$0xff] }
  0x52   : > { %3198 = vmatmul.mubr.msk.bf16.vlgmr.msra.gmra.mxu1 %vm604_vm1, %v944_v23  ;;  %3205 = vmatprep.mubr.msk.bf16.mxu0 %vm3650_vm2, %v3648_v9  ;;  %vm923_vm4 = vcmp.gt.f32.partialorder %v822_v22, 0.0 }
  0x53   : > { %3213 = vmatprep.mubr.msk.bf16.mxu1 %vm3650_vm2, %v3648_v9 }
  0xb2   : > { %v897_v47 = vpop.permute.xlu0 %896 }
  0xb7   : > { %v1018_v61 = vpop.permute.xlu0 %1017 }
 0x101   : > { %v3167_v26 = vpop.f32.mrf.mxu0 }
 0x102   : > { %v660_v27 = vadd.f32 %v3167_v26, %v2929_v24  ;;  %v3179_v28 = vpop.f32.mrf.mxu1  ;;  %v2957_v26 = vld [vmem:[%s3848_s16 + $0x38] sm:$0xff] }
 0x103   : > { %v789_v29 = vadd.f32 %v3179_v28, %v2940_v25  ;;  %v651_v30 = vpop.f32.mrf.mxu0  ;;  %vm1044_vm5 = vcmp.gt.f32.partialorder %v2957_v26, 0.0  ;;  %v2965_v26 = vld [vmem:[%s3843_s18 + $0x8] sm:$0xff] }
 0x104   : > { %685 = vst.msk [vmem:[#allocation4 + $0x10] sm:$0xff] %vm682_vm3, %v660_v27  ;;  %v652_v31 = vadd.f32 %v2929_v24, %v651_v30  ;;  %v780_v32 = vpop.f32.mrf.mxu1  ;;  %vm1164_vm8 = vcmp.gt.f32.partialorder %v2965_v26, 0.0 }
 0x105   : > { %813 = vst.msk [vmem:[#allocation5 + $0x10] sm:$0xff] %vm682_vm3, %v789_v29  ;;  %v781_v33 = vadd.f32 %v2940_v25, %v780_v32  ;;  %v3168_v34 = vpop.f32.mrf.mxu0  ;;  %v924_v29 = vsel %vm923_vm4, 1, %v3651_v50 }
 0x106   : > { %683 = vst.msk [vmem:[#allocation4] sm:$0xff] %vm682_vm3, %v652_v31  ;;  %v663_v35 = vadd.f32 %v3168_v34, %v2929_v24  ;;  %v3180_v36 = vpop.f32.mrf.mxu1  ;;  %v1045_v31 = vsel %vm1044_vm5, 1, %v3651_v50 }
 0x107   : > { %811 = vst.msk [vmem:[#allocation5] sm:$0xff] %vm682_vm3, %v781_v33  ;;  %v792_v37 = vadd.f32 %v3180_v36, %v2940_v25  ;;  %v654_v38 = vpop.f32.mrf.mxu0  ;;  %v3407_v36 = vld [vmem:[%s4549_s5 + $0x8] sm:$0xff]  }
 0x108   : > { %686 = vst.msk [vmem:[#allocation4 + $0x18] sm:$0xff] %vm682_vm3, %v663_v35  ;;  %v655_v39 = vadd.f32 %v2929_v24, %v654_v38  ;;  %v783_v40 = vpop.f32.mrf.mxu1  ;;  %3202 = vmatpush3.bf16.msra.mxu0 %v3407_v36 }
 0x109   : > { %814 = vst.msk [vmem:[#allocation5 + $0x18] sm:$0xff] %vm682_vm3, %v792_v37  ;;  %v784_v41 = vadd.f32 %v2940_v25, %v783_v40  ;;  %v3171_v42 = vpop.f32.mrf.mxu0  ;;  %v3409_v37 = vld [vmem:[%s4553_s9 + $0x8] sm:$0xff]   ;;  %3203 = vmatprep.subr.bf16.mxu0 %v3648_v9 }
 0x10a   : > { %684 = vst.msk [vmem:[#allocation4 + $0x8] sm:$0xff] %vm682_vm3, %v655_v39  ;;  %v676_v43 = vadd.f32 %v3171_v42, %v2929_v24  ;;  %v3183_v44 = vpop.f32.mrf.mxu1  ;;  %3210 = vmatpush3.bf16.msra.mxu1 %v3409_v37 }
 0x10b   : > { %812 = vst.msk [vmem:[#allocation5 + $0x8] sm:$0xff] %vm682_vm3, %v784_v41  ;;  %v805_v45 = vadd.f32 %v3183_v44, %v2940_v25  ;;  %v667_v46 = vpop.f32.mrf.mxu0  ;;  %3211 = vmatprep.subr.bf16.mxu1 %v3648_v9  ;;  %v3410_v41 = vld [vmem:[%s4553_s9] sm:$0xff]  }
 0x10c   : > { %689 = vst.msk [vmem:[#allocation4 + $0x30] sm:$0xff] %vm682_vm3, %v676_v43  ;;  %v668_v48 = vadd.f32 %v2929_v24, %v667_v46  ;;  %v796_v49 = vpop.f32.mrf.mxu1 }
 0x10d   : > { %817 = vst.msk [vmem:[#allocation5 + $0x30] sm:$0xff] %vm682_vm3, %v805_v45  ;;  %v797_v51 = vadd.f32 %v2940_v25, %v796_v49  ;;  %v3172_v52 = vpop.f32.mrf.mxu0  ;;  %v821_v7 = vld [vmem:[#allocation4] sm:$0xff] }
 0x10e   : > { %687 = vst.msk [vmem:[#allocation4 + $0x20] sm:$0xff] %vm682_vm3, %v668_v48  ;;  %v679_v53 = vadd.f32 %v3172_v52, %v2929_v24  ;;  %v3184_v54 = vpop.f32.mrf.mxu1  ;;  %3212 = vmatpush3.bf16.msra.mxu1 %v3410_v41  ;;  %v3412_v41 = vld [vmem:[%s4549_s5] sm:$0xff]  }
 0x10f   : > { %815 = vst.msk [vmem:[#allocation5 + $0x20] sm:$0xff] %vm682_vm3, %v797_v51  ;;  %v808_v55 = vadd.f32 %v3184_v54, %v2940_v25  ;;  %v670_v56 = vpop.f32.mrf.mxu0  ;;  %3225 = vmatprep.subr.bf16.mxu1 %v3648_v9 }
 0x110   : > { %690 = vst.msk [vmem:[#allocation4 + $0x38] sm:$0xff] %vm682_vm3, %v679_v53  ;;  %v671_v57 = vadd.f32 %v2929_v24, %v670_v56  ;;  %v799_v58 = vpop.f32.mrf.mxu1 }
 0x111   : > { %818 = vst.msk [vmem:[#allocation5 + $0x38] sm:$0xff] %vm682_vm3, %v808_v55  ;;  %v800_v59 = vadd.f32 %v2940_v25, %v799_v58  ;;  %v877_v60 = vpop.f32.mrf.mxu0 }
 0x112   : > { %688 = vst.msk [vmem:[#allocation4 + $0x28] sm:$0xff] %vm682_vm3, %v671_v57  ;;  %v998_v62 = vpop.f32.mrf.mxu1  ;;  %v899_v63 = vadd.f32 %v897_v47, %v877_v60  ;;  %v883_v8 = vadd.f32 %v877_v60, %v821_v7 }
 0x113   : > { %816 = vst.msk [vmem:[#allocation5 + $0x28] sm:$0xff] %vm682_vm3, %v800_v59  ;;  %v3191_v0 = vpop.f32.mrf.mxu0  ;;  %v1020_v2 = vadd.f32 %v1018_v61, %v998_v62 }
 0x114   : > { %v3199_v1 = vpop.f32.mrf.mxu1  ;;  %901 = vrot.lane.b32.xlu1 %v899_v63, %s3649_s14  ;;  %v2954_v11 = vmul.f32 -1.442695, %v883_v8 }
 0x115   : > { %v880_v3 = vpop.f32.mrf.mxu0 }
 0x116   : > { %v1001_v4 = vpop.f32.mrf.mxu1  ;;  %3435 = vpow2.f32 %v2954_v11 }
 0x117   : > { %v3192_v5 = vpop.f32.mrf.mxu0 }
 0x118   : > { %v3200_v6 = vpop.f32.mrf.mxu1  ;;  %1022 = vrot.lane.b32.xlu1 %v1020_v2, %s3649_s14  ;;  %v941_v10 = vld [vmem:[#allocation5 + $0x38] sm:$0xff] }
 0x119   : > { %v1004_v12 = vadd.f32 %v998_v62, %v941_v10 }
 0x11b   : > { %v2961_v13 = vmul.f32 -1.442695, %v1004_v12  ;;  %v1062_v12 = vld [vmem:[#allocation4 + $0x8] sm:$0xff] }
 0x11d   : > { %3437 = vpow2.f32 %v2961_v13 }
 0x123   : > { %v3436_v14 = vpop.eup %3435 }
 0x124   : > { %v887_v15 = vadd.f32 1.0, %v3436_v14  ;;  %v1182_v14 = vld [vmem:[#allocation5 + $0x30] sm:$0xff] }
 0x126   : > { %3439 = vrcp.f32 %v887_v15 }
 0x12a   : > { %v3438_v16 = vpop.eup %3437 }
 0x12b   : > { %v1008_v17 = vadd.f32 1.0, %v3438_v16 }
 0x12d   : > { %3441 = vrcp.f32 %v1008_v17 }
 0x133   : > { %v3440_v23 = vpop.eup %3439 }
 0x134   : > { %v911_v43 = vsub.f32 1.0, %v3440_v23 }
 0x13a   : > { %v3442_v27 = vpop.eup %3441 }
 0x13b   : > { %v1032_v49 = vsub.f32 1.0, %v3442_v27 }
 0x186   : > { %v902_v24 = vpop.permute.xlu1 %901 }
 0x187   : > { %v904_v25 = vmul.f32 %v3440_v23, %v902_v24 }
 0x189   : > { %906 = vrot.lane.b32.xlu0 %v904_v25, %s3649_s14 }
 0x18a   : > { %v1023_v28 = vpop.permute.xlu1 %1022 }
 0x18b   : > { %v1025_v30 = vmul.f32 %v3442_v27, %v1023_v28 }
 0x18d   : > { %1027 = vrot.lane.b32.xlu1 %v1025_v30, %s3649_s14  ;;  %926 = vperm.xlu0 %3389, %v924_v29   ;;  %v2973_v30 = vld [vmem:[%s3848_s16 + $0x30] sm:$0xff] }
 0x18e   : > { %vm1284_vm9 = vcmp.gt.f32.partialorder %v2973_v30, 0.0  ;;  %v2981_v30 = vld [vmem:[%s3843_s18 + $0x10] sm:$0xff] }
 0x18f   : > { %vm1404_vm12 = vcmp.gt.f32.partialorder %v2981_v30, 0.0 }
 0x191   : > { %918 = vrot.lane.b32.xlu0 %v3902_v19, %s3652_s19  ;;  %1047 = vperm.xlu1 %3390, %v1045_v31   ;;  %v3408_v19 = vld [vmem:[%s4549_s5] sm:$0xff]  }
 0x192   : > { %3204 = vmatpush3.bf16.msra.mxu0 %v3408_v19 }
 0x193   : > { %3217 = vmatprep.subr.bf16.mxu0 %v3648_v9 }
 0x195   : > { %1039 = vrot.lane.b32.xlu0 %v3912_v21, %s3652_s19  ;;  %s4604_s19 = smov %s4603_s28 }
 0x1fb   : > { %v907_v32 = vpop.permute.xlu0 %906 }
 0x1fc   : > { %v909_v33 = vadd.f32 %v907_v32, %v821_v7 }
 0x1fe   : > { %3443 = vtanh.f32 %v909_v33  ;;  %v1165_v33 = vsel %vm1164_vm8, 1, %v3651_v50 }
 0x1ff   : > { %v1028_v34 = vpop.permute.xlu1 %1027 }
 0x200   : > { %v1030_v35 = vadd.f32 %v1028_v34, %v941_v10 }
 0x202   : > { %3445 = vtanh.f32 %v1030_v35  ;;  %v1285_v35 = vsel %vm1284_vm9, 1, %v3651_v50 }
 0x208   : > { %v927_v39 = vpop.permute.xlu0 %926 }
 0x209   : > { %vm928_vm6 = vcmp.eq.s32.totalorder %v927_v39, 1  ;;  %v3413_v39 = vld [vmem:[%s4553_s9 + $0x8] sm:$0xff]  }
 0x20b   : > { %v3444_v38 = vpop.eup %3443 }
 0x20c   : > { %913 = vrot.lane.b32.xlu1 %v3444_v38, %s3653_s26  ;;  %v1048_v40 = vpop.permute.xlu1 %1047  ;;  %v919_v42 = vpop.permute.xlu0 %918 }
 0x20d   : > { %v921_v45 = vmul.f32 %v3440_v23, %v919_v42  ;;  %vm1049_vm7 = vcmp.eq.s32.totalorder %v1048_v40, 1 }
 0x20f   : > { %v3446_v21 = vpop.eup %3445 }
 0x210   : > { %1034 = vrot.lane.b32.xlu1 %v3446_v21, %s3653_s26  ;;  %v1040_v47 = vpop.permute.xlu0 %1039  ;;  %v3411_v21 = vld [vmem:[%s4549_s5 + $0x8] sm:$0xff]  }
 0x211   : > { %v1042_v52 = vmul.f32 %v3442_v27, %v1040_v47 }
 0x27e   : > { %v914_v44 = vpop.permute.xlu1 %913 }
 0x27f   : > { %v916_v46 = vmul.f32 %v914_v44, %v911_v43  ;;  %v3414_v43 = vld [vmem:[%s4553_s9] sm:$0xff]  }
 0x281   : > { %v922_v48 = vadd.f32 %v921_v45, %v916_v46 }
 0x282   : > { %v1035_v51 = vpop.permute.xlu1 %1034 }
 0x283   : > { %v1037_v53 = vmul.f32 %v1035_v51, %v1032_v49  ;;  %v3985_v54 = vsel %vm928_vm6, %v922_v48, %v919_v42  ;;  %v3987_v55 = vsel %vm928_vm6, %v922_v48, 0.0 }
 0x284   : > { %v1065_v56 = vpack.c.bf16 %v3985_v54, %v3985_v54 }
 0x285   : > { %v1043_v57 = vadd.f32 %v1042_v52, %v1037_v53 }
 0x286   : > { %1071 = vrot.lane.b32.xlu1 %v1065_v56, %s3653_s26 }
 0x287   : > { %v3992_v58 = vsel %vm1049_vm7, %v1043_v57, %v1040_v47  ;;  %v3994_v59 = vsel %vm1049_vm7, %v1043_v57, 0.0 }
 0x288   : > { %v1185_v60 = vpack.c.bf16 %v3992_v58, %v3992_v58 }
 0x28a   : > { %1191 = vrot.lane.b32.xlu0 %v1185_v60, %s3653_s26  ;;  %1141 = vrot.lane.b32.xlu1 %v3900_v18, %s3649_s14 }
 0x28e   : > { %1261 = vrot.lane.b32.xlu0 %v3909_v20, %s3649_s14 }
 0x2f8   : > { %v1072_v61 = vpop.permute.xlu1 %1071 }
 0x2f9   : > { %3206 = vmatmul.mubr.msk.bf16.vlgmr.msra.gmra.mxu0 %vm604_vm1, %v1072_v61 }
 0x2fa   : > { %3221 = vmatprep.mubr.msk.bf16.mxu0 %vm3650_vm2, %v3648_v9  ;;  %3218 = vmatpush3.bf16.msra.mxu0 %v3411_v21 }
 0x2fb   : > { %3219 = vmatprep.subr.bf16.mxu0 %v3648_v9 }
 0x2fc   : > { %v1192_v62 = vpop.permute.xlu0 %1191  ;;  %v1142_v63 = vpop.permute.xlu1 %1141 }
 0x2fd   : > { %3214 = vmatmul.mubr.msk.bf16.vlgmr.msra.gmra.mxu1 %vm604_vm1, %v1192_v62 }
 0x2fe   : > { %3229 = vmatprep.mubr.msk.bf16.mxu1 %vm3650_vm2, %v3648_v9  ;;  %3226 = vmatpush3.bf16.msra.mxu1 %v3413_v39 }
 0x2ff   : > { %3227 = vmatprep.subr.bf16.mxu1 %v3648_v9  ;;  %3220 = vmatpush3.bf16.msra.mxu0 %v3412_v41 }
 0x300   : > { %v1262_v3 = vpop.permute.xlu0 %1261  ;;  %3233 = vmatprep.subr.bf16.mxu0 %v3648_v9 }
 0x302   : > { %3228 = vmatpush3.bf16.msra.mxu1 %v3414_v43  ;;  %v3417_v43 = vld [vmem:[%s4553_s9 + $0x8] sm:$0xff]  }
 0x303   : > { %3241 = vmatprep.subr.bf16.mxu1 %v3648_v9 }
 0x3b9   : > { %v1122_v0 = vpop.f32.mrf.mxu0 }
 0x3ba   : > { %v1144_v1 = vadd.f32 %v1142_v63, %v1122_v0  ;;  %v1128_v13 = vadd.f32 %v1122_v0, %v1062_v12 }
 0x3bb   : > { %v3207_v2 = vpop.f32.mrf.mxu0 }
 0x3bc   : > { %1146 = vrot.lane.b32.xlu1 %v1144_v1, %s3649_s14  ;;  %v2969_v15 = vmul.f32 -1.442695, %v1128_v13 }
 0x3bd   : > { %v1125_v4 = vpop.f32.mrf.mxu0  ;;  %v1242_v5 = vpop.f32.mrf.mxu1 }
 0x3be   : > { %v1264_v6 = vadd.f32 %v1262_v3, %v1242_v5  ;;  %v1248_v16 = vadd.f32 %v1242_v5, %v1182_v14  ;;  %3447 = vpow2.f32 %v2969_v15 }
 0x3bf   : > { %v3208_v7 = vpop.f32.mrf.mxu0  ;;  %v3215_v8 = vpop.f32.mrf.mxu1 }
 0x3c0   : > { %1266 = vrot.lane.b32.xlu0 %v1264_v6, %s3649_s14  ;;  %v2977_v17 = vmul.f32 -1.442695, %v1248_v16  ;;  %v1302_v16 = vld [vmem:[#allocation4 + $0x10] sm:$0xff] }
 0x3c1   : > { %v1245_v10 = vpop.f32.mrf.mxu1 }
 0x3c2   : > { %3449 = vpow2.f32 %v2977_v17 }
 0x3c3   : > { %v3216_v11 = vpop.f32.mrf.mxu1 }
 0x3cb   : > { %v3448_v22 = vpop.eup %3447 }
 0x3cc   : > { %v1132_v23 = vadd.f32 1.0, %v3448_v22  ;;  %v1422_v22 = vld [vmem:[#allocation5 + $0x28] sm:$0xff] }
 0x3ce   : > { %3451 = vrcp.f32 %v1132_v23 }
 0x3cf   : > { %v3450_v24 = vpop.eup %3449 }
 0x3d0   : > { %v1252_v25 = vadd.f32 1.0, %v3450_v24 }
 0x3d2   : > { %3453 = vrcp.f32 %v1252_v25 }
 0x3db   : > { %v3452_v27 = vpop.eup %3451 }
 0x3dc   : > { %v1156_v45 = vsub.f32 1.0, %v3452_v27  ;;  %v1162_v48 = vmul.f32 %v3452_v27, %v3985_v54 }
 0x3df   : > { %v3454_v31 = vpop.eup %3453 }
 0x3e0   : > { %v1276_v52 = vsub.f32 1.0, %v3454_v31  ;;  %v1282_v57 = vmul.f32 %v3454_v31, %v3992_v58 }
 0x42e   : > { %v1147_v28 = vpop.permute.xlu1 %1146 }
 0x42f   : > { %v1149_v29 = vmul.f32 %v3452_v27, %v1147_v28 }
 0x431   : > { %1151 = vrot.lane.b32.xlu1 %v1149_v29, %s3649_s14 }
 0x432   : > { %v1267_v32 = vpop.permute.xlu0 %1266 }
 0x433   : > { %v1269_v34 = vmul.f32 %v3454_v31, %v1267_v32 }
 0x435   : > { %1167 = vperm.xlu1 %3390, %v1165_v33   ;;  %1271 = vrot.lane.b32.xlu0 %v1269_v34, %s3649_s14  ;;  %v2989_v34 = vld [vmem:[%s3848_s16 + $0x28] sm:$0xff] }
 0x436   : > { %vm1524_vm13 = vcmp.gt.f32.partialorder %v2989_v34, 0.0 }
 0x439   : > { %1287 = vperm.xlu0 %3389, %v1285_v35  }
 0x4a3   : > { %v1152_v36 = vpop.permute.xlu1 %1151 }
 0x4a4   : > { %v1154_v37 = vadd.f32 %v1152_v36, %v1062_v12 }
 0x4a6   : > { %3455 = vtanh.f32 %v1154_v37  ;;  %v1405_v37 = vsel %vm1404_vm12, 1, %v3651_v50 }
 0x4a7   : > { %v1272_v38 = vpop.permute.xlu0 %1271 }
 0x4a8   : > { %v1274_v19 = vadd.f32 %v1272_v38, %v1182_v14 }
 0x4aa   : > { %3457 = vtanh.f32 %v1274_v19  ;;  %v1525_v19 = vsel %vm1524_vm13, 1, %v3651_v50 }
 0x4b0   : > { %v1168_v44 = vpop.permute.xlu1 %1167 }
 0x4b1   : > { %vm1169_vm10 = vcmp.eq.s32.totalorder %v1168_v44, 1 }
 0x4b3   : > { %v3456_v40 = vpop.eup %3455 }
 0x4b4   : > { %1158 = vrot.lane.b32.xlu1 %v3456_v40, %s3653_s26  ;;  %v1288_v46 = vpop.permute.xlu0 %1287 }
 0x4b5   : > { %vm1289_vm11 = vcmp.eq.s32.totalorder %v1288_v46, 1 }
 0x4b7   : > { %v3458_v42 = vpop.eup %3457 }
 0x4b8   : > { %1278 = vrot.lane.b32.xlu0 %v3458_v42, %s3653_s26  ;;  %v3415_v42 = vld [vmem:[%s4549_s5 + $0x8] sm:$0xff]  }
 0x526   : > { %v1159_v47 = vpop.permute.xlu1 %1158 }
 0x527   : > { %v1161_v49 = vmul.f32 %v1159_v47, %v1156_v45  ;;  %v3416_v45 = vld [vmem:[%s4549_s5] sm:$0xff]  }
 0x528   : > { %v3418_v47 = vld [vmem:[%s4553_s9] sm:$0xff]  }
 0x529   : > { %v1163_v51 = vadd.f32 %v1162_v48, %v1161_v49 }
 0x52a   : > { %v1279_v53 = vpop.permute.xlu0 %1278 }
 0x52b   : > { %v4036_v56 = vsel %vm1169_vm10, %v1163_v51, 0.0  ;;  %v1281_v60 = vmul.f32 %v1279_v53, %v1276_v52  ;;  %v4040_v61 = vsel %vm1169_vm10, %v1163_v51, %v3985_v54 }
 0x52c   : > { %v1305_v62 = vpack.c.bf16 %v4040_v61, %v4040_v61 }
 0x52d   : > { %v1283_v63 = vadd.f32 %v1282_v57, %v1281_v60 }
 0x52e   : > { %1311 = vrot.lane.b32.xlu1 %v1305_v62, %s3653_s26 }
 0x52f   : > { %v4045_v0 = vsel %vm1289_vm11, %v1283_v63, 0.0  ;;  %v4048_v1 = vsel %vm1289_vm11, %v1283_v63, %v3992_v58 }
 0x530   : > { %v1425_v2 = vpack.c.bf16 %v4048_v1, %v4048_v1 }
 0x532   : > { %1431 = vrot.lane.b32.xlu0 %v1425_v2, %s3653_s26  ;;  %1381 = vrot.lane.b32.xlu1 %v3900_v18, %s3649_s14 }
 0x536   : > { %1501 = vrot.lane.b32.xlu0 %v3909_v20, %s3649_s14 }
 0x5a0   : > { %v1312_v54 = vpop.permute.xlu1 %1311 }
 0x5a1   : > { %3222 = vmatmul.mubr.msk.bf16.vlgmr.msra.gmra.mxu0 %vm604_vm1, %v1312_v54 }
 0x5a2   : > { %3237 = vmatprep.mubr.msk.bf16.mxu0 %vm3650_vm2, %v3648_v9  ;;  %3234 = vmatpush3.bf16.msra.mxu0 %v3415_v42 }
 0x5a3   : > { %3235 = vmatprep.subr.bf16.mxu0 %v3648_v9 }
 0x5a4   : > { %v1432_v3 = vpop.permute.xlu0 %1431  ;;  %v1382_v58 = vpop.permute.xlu1 %1381 }
 0x5a5   : > { %3230 = vmatmul.mubr.msk.bf16.vlgmr.msra.gmra.mxu1 %vm604_vm1, %v1432_v3 }
 0x5a6   : > { %3245 = vmatprep.mubr.msk.bf16.mxu1 %vm3650_vm2, %v3648_v9  ;;  %3242 = vmatpush3.bf16.msra.mxu1 %v3417_v43 }
 0x5a7   : > { %3243 = vmatprep.subr.bf16.mxu1 %v3648_v9  ;;  %3236 = vmatpush3.bf16.msra.mxu0 %v3416_v45 }
 0x5a8   : > { %v1502_v7 = vpop.permute.xlu0 %1501  ;;  %3249 = vmatprep.subr.bf16.mxu0 %v3648_v9 }
 0x5aa   : > { %3244 = vmatpush3.bf16.msra.mxu1 %v3418_v47 }
 0x5ab   : > { %3257 = vmatprep.subr.bf16.mxu1 %v3648_v9 }
 0x661   : > { %v1362_v4 = vpop.f32.mrf.mxu0 }
 0x662   : > { %v1384_v5 = vadd.f32 %v1382_v58, %v1362_v4  ;;  %v1368_v17 = vadd.f32 %v1362_v4, %v1302_v16 }
 0x663   : > { %v3223_v6 = vpop.f32.mrf.mxu0 }
 0x664   : > { %1386 = vrot.lane.b32.xlu1 %v1384_v5, %s3649_s14  ;;  %v2985_v23 = vmul.f32 -1.442695, %v1368_v17 }
 0x665   : > { %v1365_v8 = vpop.f32.mrf.mxu0  ;;  %v1482_v10 = vpop.f32.mrf.mxu1 }
 0x666   : > { %v1504_v11 = vadd.f32 %v1502_v7, %v1482_v10  ;;  %v1488_v24 = vadd.f32 %v1482_v10, %v1422_v22  ;;  %3459 = vpow2.f32 %v2985_v23 }
 0x667   : > { %v3224_v12 = vpop.f32.mrf.mxu0  ;;  %v3231_v13 = vpop.f32.mrf.mxu1 }
 0x668   : > { %1506 = vrot.lane.b32.xlu0 %v1504_v11, %s3649_s14  ;;  %v2993_v25 = vmul.f32 -1.442695, %v1488_v24 }
 0x669   : > { %v1485_v14 = vpop.f32.mrf.mxu1 }
 0x66a   : > { %3461 = vpow2.f32 %v2993_v25 }
 0x66b   : > { %v3232_v15 = vpop.f32.mrf.mxu1 }
 0x673   : > { %v3460_v26 = vpop.eup %3459 }
 0x674   : > { %v1372_v27 = vadd.f32 1.0, %v3460_v26  ;;  %v1542_v26 = vld [vmem:[#allocation4 + $0x18] sm:$0xff] }
 0x676   : > { %3463 = vrcp.f32 %v1372_v27 }
 0x677   : > { %v3462_v28 = vpop.eup %3461 }
 0x678   : > { %v1492_v29 = vadd.f32 1.0, %v3462_v28  ;;  %v1662_v28 = vld [vmem:[#allocation5 + $0x20] sm:$0xff] }
 0x67a   : > { %3465 = vrcp.f32 %v1492_v29 }
 0x683   : > { %v3464_v31 = vpop.eup %3463 }
 0x684   : > { %v1396_v49 = vsub.f32 1.0, %v3464_v31  ;;  %v1402_v53 = vmul.f32 %v3464_v31, %v4040_v61 }
 0x687   : > { %v3466_v35 = vpop.eup %3465 }
 0x688   : > { %v1516_v62 = vsub.f32 1.0, %v3466_v35  ;;  %v1522_v54 = vmul.f32 %v3466_v35, %v4048_v1 }
 0x6d6   : > { %v1387_v32 = vpop.permute.xlu1 %1386 }
 0x6d7   : > { %v1389_v33 = vmul.f32 %v3464_v31, %v1387_v32 }
 0x6d9   : > { %1391 = vrot.lane.b32.xlu1 %v1389_v33, %s3649_s14 }
 0x6da   : > { %v1507_v36 = vpop.permute.xlu0 %1506 }
 0x6db   : > { %v1509_v38 = vmul.f32 %v3466_v35, %v1507_v36  ;;  %v2997_v36 = vld [vmem:[%s3843_s18 + $0x18] sm:$0xff] }
 0x6dc   : > { %vm1644_vm0 = vcmp.gt.f32.partialorder %v2997_v36, 0.0 }
 0x6dd   : > { %1407 = vperm.xlu1 %3390, %v1405_v37   ;;  %1511 = vrot.lane.b32.xlu0 %v1509_v38, %s3649_s14 }
 0x6e1   : > { %1527 = vperm.xlu0 %3389, %v1525_v19  }
 0x74b   : > { %v1392_v21 = vpop.permute.xlu1 %1391 }
 0x74c   : > { %v1394_v39 = vadd.f32 %v1392_v21, %v1302_v16  ;;  %v3005_v21 = vld [vmem:[%s3848_s16 + $0x20] sm:$0xff] }
 0x74d   : > { %vm1764_vm3 = vcmp.gt.f32.partialorder %v3005_v21, 0.0 }
 0x74e   : > { %3467 = vtanh.f32 %v1394_v39  ;;  %v1765_v43 = vsel %vm1764_vm3, 1, %v3651_v50 }
 0x74f   : > { %v1512_v40 = vpop.permute.xlu0 %1511 }
 0x750   : > { %v1514_v41 = vadd.f32 %v1512_v40, %v1422_v22 }
 0x752   : > { %3469 = vtanh.f32 %v1514_v41  ;;  %v1645_v41 = vsel %vm1644_vm0, 1, %v3651_v50 }
 0x758   : > { %v1408_v48 = vpop.permute.xlu1 %1407 }
 0x759   : > { %vm1409_vm14 = vcmp.eq.s32.totalorder %v1408_v48, 1  ;;  %v3419_v48 = vld [vmem:[%s4549_s5 + $0x8] sm:$0xff]  }
 0x75b   : > { %v3468_v44 = vpop.eup %3467 }
 0x75c   : > { %1398 = vrot.lane.b32.xlu1 %v3468_v44, %s3653_s26  ;;  %v1528_v51 = vpop.permute.xlu0 %1527 }
 0x75d   : > { %vm1529_vm15 = vcmp.eq.s32.totalorder %v1528_v51, 1 }
 0x75f   : > { %v3470_v46 = vpop.eup %3469 }
 0x760   : > { %1518 = vrot.lane.b32.xlu0 %v3470_v46, %s3653_s26 }
 0x7ce   : > { %v1399_v52 = vpop.permute.xlu1 %1398 }
 0x7cf   : > { %v1401_v57 = vmul.f32 %v1399_v52, %v1396_v49  ;;  %v3421_v49 = vld [vmem:[%s4553_s9 + $0x8] sm:$0xff]   ;;  %v3420_v52 = vld [vmem:[%s4549_s5] sm:$0xff]  }
 0x7d1   : > { %v1403_v60 = vadd.f32 %v1402_v53, %v1401_v57  ;;  %v3422_v57 = vld [vmem:[%s4553_s9] sm:$0xff]  }
 0x7d2   : > { %v1519_v63 = vpop.permute.xlu0 %1518 }
 0x7d3   : > { %v4090_v2 = vsel %vm1409_vm14, %v1403_v60, 0.0  ;;  %v1521_v3 = vmul.f32 %v1519_v63, %v1516_v62  ;;  %v4094_v58 = vsel %vm1409_vm14, %v1403_v60, %v4040_v61 }
 0x7d4   : > { %v1545_v4 = vpack.c.bf16 %v4094_v58, %v4094_v58 }
 0x7d5   : > { %v1523_v5 = vadd.f32 %v1522_v54, %v1521_v3 }
 0x7d6   : > { %1551 = vrot.lane.b32.xlu1 %v1545_v4, %s3653_s26 }
 0x7d7   : > { %v4099_v6 = vsel %vm1529_vm15, %v1523_v5, 0.0  ;;  %v4102_v7 = vsel %vm1529_vm15, %v1523_v5, %v4048_v1 }
 0x7d8   : > { %v1665_v8 = vpack.c.bf16 %v4102_v7, %v4102_v7 }
 0x7da   : > { %1671 = vrot.lane.b32.xlu0 %v1665_v8, %s3653_s26  ;;  %1621 = vrot.lane.b32.xlu1 %v3900_v18, %s3649_s14 }
 0x7de   : > { %1741 = vrot.lane.b32.xlu0 %v3909_v20, %s3649_s14 }
 0x848   : > { %v1552_v61 = vpop.permute.xlu1 %1551 }
 0x849   : > { %3238 = vmatmul.mubr.msk.bf16.vlgmr.msra.gmra.mxu0 %vm604_vm1, %v1552_v61 }
 0x84a   : > { %3253 = vmatprep.mubr.msk.bf16.mxu0 %vm3650_vm2, %v3648_v9  ;;  %3250 = vmatpush3.bf16.msra.mxu0 %v3419_v48 }
 0x84b   : > { %3251 = vmatprep.subr.bf16.mxu0 %v3648_v9 }
 0x84c   : > { %v1672_v10 = vpop.permute.xlu0 %1671  ;;  %v1622_v1 = vpop.permute.xlu1 %1621 }
 0x84d   : > { %3246 = vmatmul.mubr.msk.bf16.vlgmr.msra.gmra.mxu1 %vm604_vm1, %v1672_v10 }
 0x84e   : > { %3261 = vmatprep.mubr.msk.bf16.mxu1 %vm3650_vm2, %v3648_v9  ;;  %3258 = vmatpush3.bf16.msra.mxu1 %v3421_v49 }
 0x84f   : > { %3259 = vmatprep.subr.bf16.mxu1 %v3648_v9  ;;  %3252 = vmatpush3.bf16.msra.mxu0 %v3420_v52 }
 0x850   : > { %v1742_v14 = vpop.permute.xlu0 %1741  ;;  %3265 = vmatprep.subr.bf16.mxu0 %v3648_v9 }
 0x852   : > { %3260 = vmatpush3.bf16.msra.mxu1 %v3422_v57 }
 0x853   : > { %3273 = vmatprep.subr.bf16.mxu1 %v3648_v9 }
 0x909   : > { %v1602_v11 = vpop.f32.mrf.mxu0 }
 0x90a   : > { %v1624_v12 = vadd.f32 %v1622_v1, %v1602_v11  ;;  %v1608_v27 = vadd.f32 %v1602_v11, %v1542_v26 }
 0x90b   : > { %v3239_v13 = vpop.f32.mrf.mxu0 }
 0x90c   : > { %1626 = vrot.lane.b32.xlu1 %v1624_v12, %s3649_s14  ;;  %v3001_v29 = vmul.f32 -1.442695, %v1608_v27 }
 0x90d   : > { %v1605_v15 = vpop.f32.mrf.mxu0  ;;  %v1722_v16 = vpop.f32.mrf.mxu1 }
 0x90e   : > { %v1744_v17 = vadd.f32 %v1742_v14, %v1722_v16  ;;  %v1728_v30 = vadd.f32 %v1722_v16, %v1662_v28  ;;  %3471 = vpow2.f32 %v3001_v29 }
 0x90f   : > { %v3240_v22 = vpop.f32.mrf.mxu0  ;;  %v3247_v23 = vpop.f32.mrf.mxu1 }
 0x910   : > { %1746 = vrot.lane.b32.xlu0 %v1744_v17, %s3649_s14  ;;  %v3009_v31 = vmul.f32 -1.442695, %v1728_v30 }
 0x911   : > { %v1725_v24 = vpop.f32.mrf.mxu1 }
 0x912   : > { %3473 = vpow2.f32 %v3009_v31 }
 0x913   : > { %v3248_v25 = vpop.f32.mrf.mxu1 }
 0x91b   : > { %v3472_v32 = vpop.eup %3471 }
 0x91c   : > { %v1612_v33 = vadd.f32 1.0, %v3472_v32  ;;  %v1782_v32 = vld [vmem:[#allocation4 + $0x20] sm:$0xff] }
 0x91e   : > { %3475 = vrcp.f32 %v1612_v33 }
 0x91f   : > { %v3474_v34 = vpop.eup %3473 }
 0x920   : > { %v1732_v35 = vadd.f32 1.0, %v3474_v34  ;;  %v1902_v34 = vld [vmem:[#allocation5 + $0x18] sm:$0xff] }
 0x922   : > { %3477 = vrcp.f32 %v1732_v35 }
 0x92b   : > { %v3476_v37 = vpop.eup %3475 }
 0x92c   : > { %v1636_v62 = vsub.f32 1.0, %v3476_v37  ;;  %v1642_v3 = vmul.f32 %v3476_v37, %v4094_v58 }
 0x92f   : > { %v3478_v39 = vpop.eup %3477 }
 0x930   : > { %v1756_v8 = vsub.f32 1.0, %v3478_v39  ;;  %v1762_v1 = vmul.f32 %v3478_v39, %v4102_v7 }
 0x97e   : > { %v1627_v38 = vpop.permute.xlu1 %1626 }
 0x97f   : > { %v1629_v19 = vmul.f32 %v3476_v37, %v1627_v38 }
 0x981   : > { %1631 = vrot.lane.b32.xlu1 %v1629_v19, %s3649_s14 }
 0x982   : > { %v1747_v40 = vpop.permute.xlu0 %1746 }
 0x983   : > { %v1749_v42 = vmul.f32 %v3478_v39, %v1747_v40  ;;  %v3013_v40 = vld [vmem:[%s3843_s18 + $0x20] sm:$0xff] }
 0x984   : > { %vm1884_vm6 = vcmp.gt.f32.partialorder %v3013_v40, 0.0  ;;  %v2022_v40 = vld [vmem:[#allocation4 + $0x28] sm:$0xff] }
 0x985   : > { %1647 = vperm.xlu1 %3390, %v1645_v41   ;;  %1751 = vrot.lane.b32.xlu0 %v1749_v42, %s3649_s14 }
 0x989   : > { %1767 = vperm.xlu0 %3389, %v1765_v43  }
 0x9f3   : > { %v1632_v44 = vpop.permute.xlu1 %1631 }
 0x9f4   : > { %v1634_v45 = vadd.f32 %v1632_v44, %v1542_v26  ;;  %v3021_v44 = vld [vmem:[%s3848_s16 + $0x18] sm:$0xff] }
 0x9f5   : > { %vm2004_vm7 = vcmp.gt.f32.partialorder %v3021_v44, 0.0 }
 0x9f6   : > { %3479 = vtanh.f32 %v1634_v45  ;;  %v2005_v49 = vsel %vm2004_vm7, 1, %v3651_v50 }
 0x9f7   : > { %v1752_v46 = vpop.permute.xlu0 %1751 }
 0x9f8   : > { %v1754_v47 = vadd.f32 %v1752_v46, %v1662_v28 }
 0x9fa   : > { %3481 = vtanh.f32 %v1754_v47  ;;  %v1885_v47 = vsel %vm1884_vm6, 1, %v3651_v50 }
 0xa00   : > { %v1648_v60 = vpop.permute.xlu1 %1647 }
 0xa01   : > { %vm1649_vm4 = vcmp.eq.s32.totalorder %v1648_v60, 1  ;;  %v3423_v60 = vld [vmem:[%s4549_s5 + $0x8] sm:$0xff]  }
 0xa03   : > { %v3480_v51 = vpop.eup %3479 }
 0xa04   : > { %1638 = vrot.lane.b32.xlu1 %v3480_v51, %s3653_s26  ;;  %v1768_v63 = vpop.permute.xlu0 %1767 }
 0xa05   : > { %vm1769_vm5 = vcmp.eq.s32.totalorder %v1768_v63, 1 }
 0xa07   : > { %v3482_v53 = vpop.eup %3481 }
 0xa08   : > { %1758 = vrot.lane.b32.xlu0 %v3482_v53, %s3653_s26 }
 0xa76   : > { %v1639_v54 = vpop.permute.xlu1 %1638 }
 0xa77   : > { %v1641_v4 = vmul.f32 %v1639_v54, %v1636_v62  ;;  %v3425_v62 = vld [vmem:[%s4553_s9 + $0x8] sm:$0xff]   ;;  %v3424_v54 = vld [vmem:[%s4549_s5] sm:$0xff]  }
 0xa79   : > { %v1643_v5 = vadd.f32 %v1642_v3, %v1641_v4  ;;  %v3426_v4 = vld [vmem:[%s4553_s9] sm:$0xff]  }
 0xa7a   : > { %v1759_v61 = vpop.permute.xlu0 %1758 }
 0xa7b   : > { %v4144_v10 = vsel %vm1649_vm4, %v1643_v5, 0.0  ;;  %v1761_v11 = vmul.f32 %v1759_v61, %v1756_v8  ;;  %v4148_v12 = vsel %vm1649_vm4, %v1643_v5, %v4094_v58 }
 0xa7c   : > { %v1785_v13 = vpack.c.bf16 %v4148_v12, %v4148_v12 }
 0xa7d   : > { %v1763_v14 = vadd.f32 %v1762_v1, %v1761_v11 }
 0xa7e   : > { %1791 = vrot.lane.b32.xlu1 %v1785_v13, %s3653_s26 }
 0xa7f   : > { %v4153_v15 = vsel %vm1769_vm5, %v1763_v14, 0.0  ;;  %v4156_v16 = vsel %vm1769_vm5, %v1763_v14, %v4102_v7  ;;  %vm938_vm5 = vcmask 257024  }
 0xa80   : > { %v1905_v17 = vpack.c.bf16 %v4156_v16, %v4156_v16 }
 0xa82   : > { %1911 = vrot.lane.b32.xlu0 %v1905_v17, %s3653_s26  ;;  %1861 = vrot.lane.b32.xlu1 %v3900_v18, %s3649_s14 }
 0xa86   : > { %1981 = vrot.lane.b32.xlu0 %v3909_v20, %s3649_s14 }
 0xaf0   : > { %v1792_v58 = vpop.permute.xlu1 %1791 }
 0xaf1   : > { %3254 = vmatmul.mubr.msk.bf16.vlgmr.msra.gmra.mxu0 %vm604_vm1, %v1792_v58 }
 0xaf2   : > { %3269 = vmatprep.mubr.msk.bf16.mxu0 %vm3650_vm2, %v3648_v9  ;;  %3266 = vmatpush3.bf16.msra.mxu0 %v3423_v60  ;;  %v3037_v60 = vld [vmem:[%s3848_s16 + $0x10] sm:$0xff] }
 0xaf3   : > { %3267 = vmatprep.subr.bf16.mxu0 %v3648_v9  ;;  %vm2244_vm11 = vcmp.gt.f32.partialorder %v3037_v60, 0.0  ;;  %v2382_v60 = vld [vmem:[#allocation5 + $0x8] sm:$0xff] }
 0xaf4   : > { %v1912_v22 = vpop.permute.xlu0 %1911  ;;  %v1862_v7 = vpop.permute.xlu1 %1861 }
 0xaf5   : > { %3262 = vmatmul.mubr.msk.bf16.vlgmr.msra.gmra.mxu1 %vm604_vm1, %v1912_v22 }
 0xaf6   : > { %3277 = vmatprep.mubr.msk.bf16.mxu1 %vm3650_vm2, %v3648_v9  ;;  %3274 = vmatpush3.bf16.msra.mxu1 %v3425_v62 }
 0xaf7   : > { %3275 = vmatprep.subr.bf16.mxu1 %v3648_v9  ;;  %3268 = vmatpush3.bf16.msra.mxu0 %v3424_v54 }
 0xaf8   : > { %v1982_v18 = vpop.permute.xlu0 %1981  ;;  %3281 = vmatprep.subr.bf16.mxu0 %v3648_v9 }
 0xafa   : > { %3276 = vmatpush3.bf16.msra.mxu1 %v3426_v4  ;;  %v2245_v4 = vsel %vm2244_vm11, 1, %v3651_v50 }
 0xafb   : > { %3289 = vmatprep.subr.bf16.mxu1 %v3648_v9 }
 0xbb1   : > { %v1842_v23 = vpop.f32.mrf.mxu0 }
 0xbb2   : > { %v1864_v24 = vadd.f32 %v1862_v7, %v1842_v23  ;;  %v1848_v33 = vadd.f32 %v1842_v23, %v1782_v32 }
 0xbb3   : > { %v3255_v25 = vpop.f32.mrf.mxu0 }
 0xbb4   : > { %1866 = vrot.lane.b32.xlu1 %v1864_v24, %s3649_s14  ;;  %v3017_v35 = vmul.f32 -1.442695, %v1848_v33 }
 0xbb5   : > { %v1845_v20 = vpop.f32.mrf.mxu0  ;;  %v1962_v26 = vpop.f32.mrf.mxu1 }
 0xbb6   : > { %v1984_v27 = vadd.f32 %v1982_v18, %v1962_v26  ;;  %v1968_v36 = vadd.f32 %v1962_v26, %v1902_v34  ;;  %3483 = vpow2.f32 %v3017_v35 }
 0xbb7   : > { %v3256_v28 = vpop.f32.mrf.mxu0  ;;  %v3263_v29 = vpop.f32.mrf.mxu1 }
 0xbb8   : > { %1986 = vrot.lane.b32.xlu0 %v1984_v27, %s3649_s14  ;;  %v3025_v37 = vmul.f32 -1.442695, %v1968_v36  ;;  %v4215_v27 = vld [vmem:[%s4551_s7] ss:$0 sm:$0xff] }
 0xbb9   : > { %v1965_v30 = vpop.f32.mrf.mxu1  ;;  %v4225_v28 = vld [vmem:[%s4555_s11] ss:$0 sm:$0xff] }
 0xbba   : > { %3485 = vpow2.f32 %v3025_v37 }
 0xbbb   : > { %v3264_v31 = vpop.f32.mrf.mxu1 }
 0xbc3   : > { %v3484_v38 = vpop.eup %3483 }
 0xbc4   : > { %v1852_v19 = vadd.f32 1.0, %v3484_v38 }
 0xbc6   : > { %3487 = vrcp.f32 %v1852_v19 }
 0xbc7   : > { %v3486_v21 = vpop.eup %3485 }
 0xbc8   : > { %v1972_v39 = vadd.f32 1.0, %v3486_v21 }
 0xbca   : > { %3489 = vrcp.f32 %v1972_v39 }
 0xbd3   : > { %v3488_v41 = vpop.eup %3487 }
 0xbd4   : > { %v1876_v8 = vsub.f32 1.0, %v3488_v41  ;;  %v1882_v11 = vmul.f32 %v3488_v41, %v4148_v12 }
 0xbd7   : > { %v3490_v45 = vpop.eup %3489 }
 0xbd8   : > { %v1996_v17 = vsub.f32 1.0, %v3490_v45  ;;  %v2002_v7 = vmul.f32 %v3490_v45, %v4156_v16 }
 0xc26   : > { %v1867_v42 = vpop.permute.xlu1 %1866 }
 0xc27   : > { %v1869_v43 = vmul.f32 %v3488_v41, %v1867_v42  ;;  %v2142_v42 = vld [vmem:[#allocation5 + $0x10] sm:$0xff] }
 0xc29   : > { %1871 = vrot.lane.b32.xlu1 %v1869_v43, %s3649_s14 }
 0xc2a   : > { %v1987_v46 = vpop.permute.xlu0 %1986 }
 0xc2b   : > { %v1989_v48 = vmul.f32 %v3490_v45, %v1987_v46 }
 0xc2d   : > { %1887 = vperm.xlu1 %3390, %v1885_v47   ;;  %1991 = vrot.lane.b32.xlu0 %v1989_v48, %s3649_s14 }
 0xc31   : > { %2007 = vperm.xlu0 %3389, %v2005_v49  }
 0xc9b   : > { %v1872_v51 = vpop.permute.xlu1 %1871 }
 0xc9c   : > { %v1874_v52 = vadd.f32 %v1872_v51, %v1782_v32  ;;  %v3029_v51 = vld [vmem:[%s3843_s18 + $0x28] sm:$0xff] }
 0xc9d   : > { %vm2124_vm10 = vcmp.gt.f32.partialorder %v3029_v51, 0.0 }
 0xc9e   : > { %3491 = vtanh.f32 %v1874_v52  ;;  %v2125_v54 = vsel %vm2124_vm10, 1, %v3651_v50 }
 0xc9f   : > { %v1992_v53 = vpop.permute.xlu0 %1991 }
 0xca0   : > { %v1994_v57 = vadd.f32 %v1992_v53, %v1902_v34 }
 0xca2   : > { %3493 = vtanh.f32 %v1994_v57 }
 0xca8   : > { %v1888_v5 = vpop.permute.xlu1 %1887 }
 0xca9   : > { %vm1889_vm8 = vcmp.eq.s32.totalorder %v1888_v5, 1 }
 0xcab   : > { %v3492_v63 = vpop.eup %3491 }
 0xcac   : > { %1878 = vrot.lane.b32.xlu1 %v3492_v63, %s3653_s26  ;;  %v2008_v61 = vpop.permute.xlu0 %2007 }
 0xcad   : > { %vm2009_vm9 = vcmp.eq.s32.totalorder %v2008_v61, 1 }
 0xcaf   : > { %v3494_v3 = vpop.eup %3493 }
 0xcb0   : > { %1998 = vrot.lane.b32.xlu0 %v3494_v3, %s3653_s26 }
 0xd1e   : > { %v1879_v1 = vpop.permute.xlu1 %1878 }
 0xd1f   : > { %v1881_v13 = vmul.f32 %v1879_v1, %v1876_v8 }
 0xd21   : > { %v1883_v14 = vadd.f32 %v1882_v11, %v1881_v13  ;;  %v3427_v11 = vld [vmem:[%s4549_s5 + $0x8] sm:$0xff]  }
 0xd22   : > { %v1999_v58 = vpop.permute.xlu0 %1998  ;;  %v3429_v13 = vld [vmem:[%s4553_s9 + $0x8] sm:$0xff]  }
 0xd23   : > { %v4198_v22 = vsel %vm1889_vm8, %v1883_v14, 0.0  ;;  %v2001_v23 = vmul.f32 %v1999_v58, %v1996_v17  ;;  %v4202_v24 = vsel %vm1889_vm8, %v1883_v14, %v4148_v12  ;;  %v3428_v17 = vld [vmem:[%s4549_s5] sm:$0xff]  }
 0xd24   : > { %v2025_v25 = vpack.c.bf16 %v4202_v24, %v4202_v24 }
 0xd25   : > { %v2003_v18 = vadd.f32 %v2002_v7, %v2001_v23  ;;  %v3430_v7 = vld [vmem:[%s4553_s9] sm:$0xff]  }
 0xd26   : > { %2031 = vrot.lane.b32.xlu1 %v2025_v25, %s3653_s26 }
 0xd27   : > { %v4207_v20 = vsel %vm2009_vm9, %v2003_v18, 0.0  ;;  %v4210_v26 = vsel %vm2009_vm9, %v2003_v18, %v4156_v16 }
 0xd28   : > { %v2145_v12 = vpack.c.bf16 %v4210_v26, %v4210_v26 }
 0xd2a   : > { %2151 = vrot.lane.b32.xlu0 %v2145_v12, %s3653_s26  ;;  %2101 = vrot.lane.b32.xlu1 %v4215_v27, %s3649_s14 }
 0xd2e   : > { %2221 = vrot.lane.b32.xlu0 %v4225_v28, %s3649_s14 }
 0xd98   : > { %v2032_v16 = vpop.permute.xlu1 %2031 }
 0xd99   : > { %3270 = vmatmul.mubr.msk.bf16.vlgmr.msra.gmra.mxu0 %vm604_vm1, %v2032_v16 }
 0xd9a   : > { %3285 = vmatprep.mubr.msk.bf16.mxu0 %vm3650_vm2, %v3648_v9  ;;  %3282 = vmatpush3.bf16.msra.mxu0 %v3427_v11 }
 0xd9b   : > { %3283 = vmatprep.subr.bf16.mxu0 %v3648_v9 }
 0xd9c   : > { %v2152_v29 = vpop.permute.xlu0 %2151  ;;  %v2102_v30 = vpop.permute.xlu1 %2101 }
 0xd9d   : > { %3278 = vmatmul.mubr.msk.bf16.vlgmr.msra.gmra.mxu1 %vm604_vm1, %v2152_v29 }
 0xd9e   : > { %3293 = vmatprep.mubr.msk.bf16.mxu1 %vm3650_vm2, %v3648_v9  ;;  %3290 = vmatpush3.bf16.msra.mxu1 %v3429_v13 }
 0xd9f   : > { %3291 = vmatprep.subr.bf16.mxu1 %v3648_v9  ;;  %3284 = vmatpush3.bf16.msra.mxu0 %v3428_v17 }
 0xda0   : > { %v2222_v34 = vpop.permute.xlu0 %2221  ;;  %3297 = vmatprep.subr.bf16.mxu0 %v3648_v9 }
 0xda2   : > { %3292 = vmatpush3.bf16.msra.mxu1 %v3430_v7 }
 0xda3   : > { %3305 = vmatprep.subr.bf16.mxu1 %v3648_v9 }
 0xe59   : > { %v2082_v31 = vpop.f32.mrf.mxu0 }
 0xe5a   : > { %v2104_v32 = vadd.f32 %v2102_v30, %v2082_v31  ;;  %v2088_v41 = vadd.f32 %v2082_v31, %v2022_v40 }
 0xe5b   : > { %v3271_v33 = vpop.f32.mrf.mxu0 }
 0xe5c   : > { %2106 = vrot.lane.b32.xlu1 %v2104_v32, %s3649_s14  ;;  %v3033_v43 = vmul.f32 -1.442695, %v2088_v41 }
 0xe5d   : > { %v2085_v35 = vpop.f32.mrf.mxu0  ;;  %v2202_v36 = vpop.f32.mrf.mxu1 }
 0xe5e   : > { %v2224_v37 = vadd.f32 %v2222_v34, %v2202_v36  ;;  %v2208_v44 = vadd.f32 %v2202_v36, %v2142_v42  ;;  %3495 = vpow2.f32 %v3033_v43 }
 0xe5f   : > { %v3272_v38 = vpop.f32.mrf.mxu0  ;;  %v3279_v19 = vpop.f32.mrf.mxu1 }
 0xe60   : > { %2226 = vrot.lane.b32.xlu0 %v2224_v37, %s3649_s14  ;;  %v3041_v45 = vmul.f32 -1.442695, %v2208_v44 }
 0xe61   : > { %v2205_v21 = vpop.f32.mrf.mxu1 }
 0xe62   : > { %3497 = vpow2.f32 %v3041_v45 }
 0xe63   : > { %v3280_v39 = vpop.f32.mrf.mxu1 }
 0xe6b   : > { %v3496_v46 = vpop.eup %3495 }
 0xe6c   : > { %v2092_v47 = vadd.f32 1.0, %v3496_v46 }
 0xe6e   : > { %3499 = vrcp.f32 %v2092_v47 }
 0xe6f   : > { %v3498_v48 = vpop.eup %3497 }
 0xe70   : > { %v2212_v49 = vadd.f32 1.0, %v3498_v48 }
 0xe72   : > { %3501 = vrcp.f32 %v2212_v49 }
 0xe7b   : > { %v3500_v52 = vpop.eup %3499 }
 0xe7c   : > { %v2116_v25 = vsub.f32 1.0, %v3500_v52  ;;  %v2122_v16 = vmul.f32 %v3500_v52, %v4202_v24 }
 0xe7f   : > { %v3502_v62 = vpop.eup %3501 }
 0xe80   : > { %v2236_v31 = vsub.f32 1.0, %v3502_v62  ;;  %v2242_v34 = vmul.f32 %v3502_v62, %v4210_v26 }
 0xece   : > { %v2107_v53 = vpop.permute.xlu1 %2106 }
 0xecf   : > { %v2109_v57 = vmul.f32 %v3500_v52, %v2107_v53  ;;  %v2262_v53 = vld [vmem:[#allocation4 + $0x30] sm:$0xff] }
 0xed1   : > { %2111 = vrot.lane.b32.xlu1 %v2109_v57, %s3649_s14 }
 0xed2   : > { %v2227_v63 = vpop.permute.xlu0 %2226 }
 0xed3   : > { %v2229_v3 = vmul.f32 %v3502_v62, %v2227_v63 }
 0xed5   : > { %2127 = vperm.xlu1 %3390, %v2125_v54   ;;  %2231 = vrot.lane.b32.xlu0 %v2229_v3, %s3649_s14 }
 0xed9   : > { %2247 = vperm.xlu0 %3389, %v2245_v4  }
 0xf43   : > { %v2112_v5 = vpop.permute.xlu1 %2111 }
 0xf44   : > { %v2114_v8 = vadd.f32 %v2112_v5, %v2022_v40 }
 0xf46   : > { %3503 = vtanh.f32 %v2114_v8 }
 0xf47   : > { %v2232_v61 = vpop.permute.xlu0 %2231 }
 0xf48   : > { %v2234_v1 = vadd.f32 %v2232_v61, %v2142_v42  ;;  %v3045_v61 = vld [vmem:[%s3843_s18 + $0x30] sm:$0xff] }
 0xf4a   : > { %3505 = vtanh.f32 %v2234_v1 }
 0xf50   : > { %v2128_v23 = vpop.permute.xlu1 %2127 }
 0xf51   : > { %vm2129_vm12 = vcmp.eq.s32.totalorder %v2128_v23, 1 }
 0xf53   : > { %v3504_v14 = vpop.eup %3503 }
 0xf54   : > { %2118 = vrot.lane.b32.xlu1 %v3504_v14, %s3653_s26  ;;  %v2248_v18 = vpop.permute.xlu0 %2247  ;;  %v3053_v14 = vld [vmem:[%s3848_s16 + $0x8] sm:$0xff] }
 0xf55   : > { %vm2249_vm13 = vcmp.eq.s32.totalorder %v2248_v18, 1  ;;  %vm2484_vm14 = vcmp.gt.f32.partialorder %v3053_v14, 0.0 }
 0xf57   : > { %v3506_v58 = vpop.eup %3505 }
 0xf58   : > { %2238 = vrot.lane.b32.xlu0 %v3506_v58, %s3653_s26 }
 0xfc6   : > { %v2119_v12 = vpop.permute.xlu1 %2118 }
 0xfc7   : > { %v2121_v29 = vmul.f32 %v2119_v12, %v2116_v25  ;;  %v2485_v25 = vsel %vm2484_vm14, 1, %v3651_v50 }
 0xfc9   : > { %v2123_v30 = vadd.f32 %v2122_v16, %v2121_v29 }
 0xfca   : > { %v2239_v32 = vpop.permute.xlu0 %2238 }
 0xfcb   : > { %v4262_v33 = vsel %vm2129_vm12, %v2123_v30, 0.0  ;;  %v2241_v35 = vmul.f32 %v2239_v32, %v2236_v31  ;;  %v4266_v36 = vsel %vm2129_vm12, %v2123_v30, %v4202_v24  ;;  %v3431_v30 = vld [vmem:[%s4549_s5 + $0x8] sm:$0xff]  }
 0xfcc   : > { %v2265_v37 = vpack.c.bf16 %v4266_v36, %v4266_v36  ;;  %v3433_v31 = vld [vmem:[%s4553_s9 + $0x8] sm:$0xff]  }
 0xfcd   : > { %v2243_v38 = vadd.f32 %v2242_v34, %v2241_v35  ;;  %v3432_v34 = vld [vmem:[%s4549_s5] sm:$0xff]  }
 0xfce   : > { %2271 = vrot.lane.b32.xlu1 %v2265_v37, %s3653_s26  ;;  %v3434_v37 = vld [vmem:[%s4553_s9] sm:$0xff]  }
 0xfcf   : > { %v4271_v19 = vsel %vm2249_vm13, %v2243_v38, 0.0  ;;  %v4274_v21 = vsel %vm2249_vm13, %v2243_v38, %v4210_v26 }
 0xfd0   : > { %v2385_v39 = vpack.c.bf16 %v4274_v21, %v4274_v21 }
 0xfd2   : > { %2391 = vrot.lane.b32.xlu0 %v2385_v39, %s3653_s26  ;;  %2341 = vrot.lane.b32.xlu1 %v4215_v27, %s3649_s14 }
 0xfd6   : > { %2461 = vrot.lane.b32.xlu0 %v4225_v28, %s3649_s14 }
0x1040   : > { %v2272_v24 = vpop.permute.xlu1 %2271 }
0x1041   : > { %3286 = vmatmul.mubr.msk.bf16.vlgmr.msra.gmra.mxu0 %vm604_vm1, %v2272_v24 }
0x1042   : > { %3301 = vmatprep.mubr.msk.bf16.mxu0 %vm3650_vm2, %v3648_v9  ;;  %3298 = vmatpush3.bf16.msra.mxu0 %v3431_v30 }
0x1043   : > { %3299 = vmatprep.subr.bf16.mxu0 %v3648_v9 }
0x1044   : > { %v2392_v40 = vpop.permute.xlu0 %2391  ;;  %v2342_v26 = vpop.permute.xlu1 %2341 }
0x1045   : > { %3294 = vmatmul.mubr.msk.bf16.vlgmr.msra.gmra.mxu1 %vm604_vm1, %v2392_v40 }
0x1046   : > { %3309 = vmatprep.mubr.msk.bf16.mxu1 %vm3650_vm2, %v3648_v9  ;;  %vm2364_vm2 = vcmp.gt.f32.partialorder %v3045_v61, 0.0  ;;  %3306 = vmatpush3.bf16.msra.mxu1 %v3433_v31  ;;  %v2622_v31 = vld [vmem:[%s3848_s16] sm:$0xff] }
0x1047   : > { %v2365_v7 = vsel %vm2364_vm2, 1, %v3651_v50  ;;  %3307 = vmatprep.subr.bf16.mxu1 %v3648_v9  ;;  %3300 = vmatpush3.bf16.msra.mxu0 %v3432_v34  ;;  %vm2722_vm4 = vcmp.gt.f32.partialorder %v2622_v31, 0.0 }
0x1048   : > { %v2462_v44 = vpop.permute.xlu0 %2461 }
0x104a   : > { %3308 = vmatpush3.bf16.msra.mxu1 %v3434_v37 }
0x1101   : > { %v2322_v41 = vpop.f32.mrf.mxu0 }
0x1102   : > { %v2344_v42 = vadd.f32 %v2342_v26, %v2322_v41  ;;  %v2328_v57 = vadd.f32 %v2322_v41, %v2262_v53 }
0x1103   : > { %v3287_v43 = vpop.f32.mrf.mxu0 }
0x1104   : > { %2346 = vrot.lane.b32.xlu1 %v2344_v42, %s3649_s14  ;;  %v3049_v62 = vmul.f32 -1.442695, %v2328_v57 }
0x1105   : > { %v2325_v45 = vpop.f32.mrf.mxu0  ;;  %v2442_v46 = vpop.f32.mrf.mxu1 }
0x1106   : > { %v2464_v47 = vadd.f32 %v2462_v44, %v2442_v46  ;;  %v2448_v63 = vadd.f32 %v2442_v46, %v2382_v60  ;;  %3507 = vpow2.f32 %v3049_v62 }
0x1107   : > { %v3288_v48 = vpop.f32.mrf.mxu0  ;;  %v3295_v49 = vpop.f32.mrf.mxu1 }
0x1108   : > { %2466 = vrot.lane.b32.xlu0 %v2464_v47, %s3649_s14  ;;  %v3057_v54 = vmul.f32 -1.442695, %v2448_v63 }
0x1109   : > { %v2445_v51 = vpop.f32.mrf.mxu1 }
0x110a   : > { %3509 = vpow2.f32 %v3057_v54 }
0x110b   : > { %v3296_v52 = vpop.f32.mrf.mxu1 }
0x1113   : > { %v3508_v3 = vpop.eup %3507 }
0x1114   : > { %v2332_v4 = vadd.f32 1.0, %v3508_v3 }
0x1116   : > { %3511 = vrcp.f32 %v2332_v4 }
0x1117   : > { %v3510_v5 = vpop.eup %3509 }
0x1118   : > { %v2452_v8 = vadd.f32 1.0, %v3510_v5 }
0x111a   : > { %3513 = vrcp.f32 %v2452_v8 }
0x1123   : > { %v3512_v1 = vpop.eup %3511 }
0x1124   : > { %v2356_v39 = vsub.f32 1.0, %v3512_v1  ;;  %v2362_v26 = vmul.f32 %v3512_v1, %v4266_v36 }
0x1127   : > { %v3514_v17 = vpop.eup %3513 }
0x1128   : > { %v2476_v43 = vsub.f32 1.0, %v3514_v17  ;;  %v2482_v45 = vmul.f32 %v3514_v17, %v4274_v21 }
0x1176   : > { %v2347_v11 = vpop.permute.xlu1 %2346 }
0x1177   : > { %v2349_v13 = vmul.f32 %v3512_v1, %v2347_v11  ;;  %v2502_v1 = vld [vmem:[#allocation4 + $0x38] sm:$0xff] }
0x1179   : > { %2351 = vrot.lane.b32.xlu1 %v2349_v13, %s3649_s14  ;;  %v2621_v13 = vld [vmem:[#allocation5] sm:$0xff] }
0x117a   : > { %v2467_v58 = vpop.permute.xlu0 %2466 }
0x117b   : > { %v2469_v23 = vmul.f32 %v3514_v17, %v2467_v58 }
0x117d   : > { %2367 = vperm.xlu1 %3390, %v2365_v7   ;;  %2471 = vrot.lane.b32.xlu0 %v2469_v23, %s3649_s14 }
0x1181   : > { %2487 = vperm.xlu0 %3389, %v2485_v25  }
0x11eb   : > { %v2352_v18 = vpop.permute.xlu1 %2351 }
0x11ec   : > { %v2354_v12 = vadd.f32 %v2352_v18, %v2262_v53 }
0x11ee   : > { %3515 = vtanh.f32 %v2354_v12  ;;  %v3061_v12 = vld [vmem:[%s3843_s18 + $0x38] sm:$0xff]  ;;  %s4601_s18 = sld [smem:[#allocation16_spill]] }
0x11ef   : > { %v2472_v16 = vpop.permute.xlu0 %2471  ;;  %vm2604_vm3 = vcmp.gt.f32.partialorder %v3061_v12, 0.0 }
0x11f0   : > { %v2474_v29 = vadd.f32 %v2472_v16, %v2382_v60 }
0x11f2   : > { %3517 = vtanh.f32 %v2474_v29 }
0x11f4   : > { %s4606_s27 = sand.u32 1, %s4601_s18  }
0x11f5   : > { %s4450_s24 = scalar_lea.sflag [#allocation7], %s4606_s27 }
0x11f8   : > { %v2368_v38 = vpop.permute.xlu1 %2367 }
0x11f9   : > { %vm2369_vm15 = vcmp.eq.s32.totalorder %v2368_v38, 1  ;;  %v2723_v38 = vsel %vm2722_vm4, 1, %v3651_v50 }
0x11fb   : > { %v3516_v32 = vpop.eup %3515 }
0x11fc   : > { %2358 = vrot.lane.b32.xlu1 %v3516_v32, %s3653_s26  ;;  %v2488_v24 = vpop.permute.xlu0 %2487 }
0x11fd   : > { %vm2489_vm0 = vcmp.eq.s32.totalorder %v2488_v24, 1 }
0x11ff   : > { %v3518_v35 = vpop.eup %3517 }
0x1200   : > { %2478 = vrot.lane.b32.xlu0 %v3518_v35, %s3653_s26  ;;  %v2605_v35 = vsel %vm2604_vm3, 1, %v3651_v50  ;;  %v3085_v50 = vpack.c.bf16 %v4036_v56, %v4036_v56  ;;  %v3088_v56 = vpack.c.bf16 %v4099_v6, %v4099_v6  ;;  %v3092_v6 = vpack.c.bf16 %v4207_v20, %v4207_v20 }
0x126e   : > { %v2359_v40 = vpop.permute.xlu1 %2358 }
0x126f   : > { %v2361_v41 = vmul.f32 %v2359_v40, %v2356_v39 }
0x1271   : > { %v2363_v42 = vadd.f32 %v2362_v26, %v2361_v41 }
0x1272   : > { %v2479_v9 = vpop.permute.xlu0 %2478 }
0x1273   : > { %v4314_v44 = vsel %vm2369_vm15, %v2363_v42, 0.0  ;;  %v2481_v46 = vmul.f32 %v2479_v9, %v2476_v43  ;;  %v4318_v47 = vsel %vm2369_vm15, %v2363_v42, %v4266_v36  ;;  %v3083_v42 = vpack.c.bf16 %v3987_v55, %v3987_v55 }
0x1274   : > { %v2505_v48 = vpack.c.bf16 %v4318_v47, %v4318_v47  ;;  %v3084_v9 = vpack.c.bf16 %v3994_v59, %v3994_v59  ;;  %v3087_v55 = vpack.c.bf16 %v4090_v2, %v4090_v2  ;;  %v3089_v59 = vpack.c.bf16 %v4144_v10, %v4144_v10 }
0x1275   : > { %v2483_v49 = vadd.f32 %v2482_v45, %v2481_v46  ;;  %v3086_v45 = vpack.c.bf16 %v4045_v0, %v4045_v0  ;;  %v3090_v0 = vpack.c.bf16 %v4153_v15, %v4153_v15  ;;  %v3091_v2 = vpack.c.bf16 %v4198_v22, %v4198_v22 }
0x1276   : > { %2511 = vrot.lane.b32.xlu1 %v2505_v48, %s3653_s26  ;;  %v3093_v10 = vpack.c.bf16 %v4262_v33, %v4262_v33  ;;  %v3094_v15 = vpack.c.bf16 %v4271_v19, %v4271_v19  ;;  %v3095_v22 = vpack.c.bf16 %v4314_v44, %v4314_v44 }
0x1277   : > { %v4323_v51 = vsel %vm2489_vm0, %v2483_v49, 0.0  ;;  %v4326_v52 = vsel %vm2489_vm0, %v2483_v49, %v4274_v21 }
0x1278   : > { %v2623_v53 = vpack.c.bf16 %v4326_v52, %v4326_v52  ;;  %v3096_v20 = vpack.c.bf16 %v4323_v51, %v4323_v51 }
0x127a   : > { %2629 = vrot.lane.b32.xlu0 %v2623_v53, %s3653_s26  ;;  %2581 = vrot.lane.b32.xlu1 %v4215_v27, %s3649_s14 }
0x127e   : > { %2699 = vrot.lane.b32.xlu0 %v4225_v28, %s3649_s14 }
0x12e8   : > { %v2512_v36 = vpop.permute.xlu1 %2511 }
0x12e9   : > { %3302 = vmatmul.mubr.msk.bf16.vlgmr.msra.gmra.mxu0 %vm604_vm1, %v2512_v36 }
0x12ec   : > { %v2630_v57 = vpop.permute.xlu0 %2629  ;;  %v2582_v60 = vpop.permute.xlu1 %2581 }
0x12ed   : > { %3310 = vmatmul.mubr.msk.bf16.vlgmr.msra.gmra.mxu1 %vm604_vm1, %v2630_v57 }
0x12f0   : > { %v2700_v54 = vpop.permute.xlu0 %2699 }
0x13a9   : > { %v2562_v21 = vpop.f32.mrf.mxu0 }
0x13aa   : > { %v2584_v62 = vadd.f32 %v2582_v60, %v2562_v21  ;;  %v2568_v11 = vadd.f32 %v2562_v21, %v2502_v1 }
0x13ab   : > { %v3303_v63 = vpop.f32.mrf.mxu0 }
0x13ac   : > { %2586 = vrot.lane.b32.xlu1 %v2584_v62, %s3649_s14  ;;  %v3065_v14 = vmul.f32 -1.442695, %v2568_v11 }
0x13ad   : > { %v2565_v3 = vpop.f32.mrf.mxu0  ;;  %v2680_v4 = vpop.f32.mrf.mxu1 }
0x13ae   : > { %v2702_v5 = vadd.f32 %v2700_v54, %v2680_v4  ;;  %v2686_v17 = vadd.f32 %v2680_v4, %v2621_v13  ;;  %3519 = vpow2.f32 %v3065_v14 }
0x13af   : > { %v3304_v27 = vpop.f32.mrf.mxu0  ;;  %v3311_v8 = vpop.f32.mrf.mxu1 }
0x13b0   : > { %2704 = vrot.lane.b32.xlu0 %v2702_v5, %s3649_s14  ;;  %v3072_v58 = vmul.f32 -1.442695, %v2686_v17 }
0x13b1   : > { %v2683_v28 = vpop.f32.mrf.mxu1 }
0x13b2   : > { %3521 = vpow2.f32 %v3072_v58 }
0x13b3   : > { %v3312_v61 = vpop.f32.mrf.mxu1 }
0x13bb   : > { %v3520_v7 = vpop.eup %3519 }
0x13bc   : > { %v2572_v23 = vadd.f32 1.0, %v3520_v7 }
0x13be   : > { %3523 = vrcp.f32 %v2572_v23 }
0x13bf   : > { %v3522_v25 = vpop.eup %3521 }
0x13c0   : > { %v2690_v18 = vadd.f32 1.0, %v3522_v25 }
0x13c2   : > { %3525 = vrcp.f32 %v2690_v18 }
0x13cb   : > { %v3524_v16 = vpop.eup %3523 }
0x13cc   : > { %v2596_v46 = vsub.f32 1.0, %v3524_v16  ;;  %v2602_v53 = vmul.f32 %v3524_v16, %v4318_v47 }
0x13cf   : > { %v4342_v32 = vpop.eup %3525 }
0x13d0   : > { %v2714_v44 = vsub.f32 1.0, %v4342_v32  ;;  %v2720_v21 = vmul.f32 %v4342_v32, %v4326_v52 }
0x141e   : > { %v2587_v29 = vpop.permute.xlu1 %2586 }
0x141f   : > { %v2589_v30 = vmul.f32 %v3524_v16, %v2587_v29 }
0x1421   : > { %2591 = vrot.lane.b32.xlu1 %v2589_v30, %s3649_s14 }
0x1422   : > { %v2705_v34 = vpop.permute.xlu0 %2704 }
0x1423   : > { %v2707_v37 = vmul.f32 %v4342_v32, %v2705_v34 }
0x1425   : > { %2607 = vperm.xlu1 %3390, %v2605_v35   ;;  %2709 = vrot.lane.b32.xlu0 %v2707_v37, %s3649_s14 }
0x1429   : > { %2725 = vperm.xlu0 %3389, %v2723_v38  }
0x1493   : > { %v2592_v39 = vpop.permute.xlu1 %2591 }
0x1494   : > { %v2594_v24 = vadd.f32 %v2592_v39, %v2502_v1 }
0x1496   : > { %3527 = vtanh.f32 %v2594_v24 }
0x1497   : > { %v2710_v40 = vpop.permute.xlu0 %2709 }
0x1498   : > { %v2712_v26 = vadd.f32 %v2710_v40, %v2621_v13 }
0x149a   : > { %3529 = vtanh.f32 %v2712_v26 }
0x14a0   : > { %v2608_v33 = vpop.permute.xlu1 %2607 }
0x14a1   : > { %vm2609_vm6 = vcmp.eq.s32.totalorder %v2608_v33, 1 }
0x14a3   : > { %v3528_v41 = vpop.eup %3527 }
0x14a4   : > { %2598 = vrot.lane.b32.xlu1 %v3528_v41, %s3653_s26  ;;  %v2726_v48 = vpop.permute.xlu0 %2725 }
0x14a5   : > { %vm2727_vm7 = vcmp.eq.s32.totalorder %v2726_v48, 1 }
0x14a7   : > { %v3530_v43 = vpop.eup %3529 }
0x14a8   : > { %935 = vrot.lane.b32.xlu1 %v3083_v42, %s3653_s26  ;;  %2716 = vrot.lane.b32.xlu0 %v3530_v43, %s3653_s26 }
0x14ac   : > { %1176 = vrot.lane.b32.xlu1 %v3085_v50, %s3653_s26  ;;  %1056 = vrot.lane.b32.xlu0 %v3084_v9, %s3653_s26 }
0x14b0   : > { %1416 = vrot.lane.b32.xlu1 %v3087_v55, %s3653_s26  ;;  %1296 = vrot.lane.b32.xlu0 %v3086_v45, %s3653_s26 }
0x14b4   : > { %1656 = vrot.lane.b32.xlu1 %v3089_v59, %s3653_s26  ;;  %1536 = vrot.lane.b32.xlu0 %v3088_v56, %s3653_s26 }
0x14b8   : > { %1896 = vrot.lane.b32.xlu1 %v3091_v2, %s3653_s26  ;;  %1776 = vrot.lane.b32.xlu0 %v3090_v0, %s3653_s26 }
0x14bc   : > { %2136 = vrot.lane.b32.xlu1 %v3093_v10, %s3653_s26  ;;  %2016 = vrot.lane.b32.xlu0 %v3092_v6, %s3653_s26 }
0x14c0   : > { %2376 = vrot.lane.b32.xlu1 %v3095_v22, %s3653_s26  ;;  %2256 = vrot.lane.b32.xlu0 %v3094_v15, %s3653_s26 }
0x14c4   : > { %2496 = vrot.lane.b32.xlu0 %v3096_v20, %s3653_s26 }
0x1516   : > { %v2599_v49 = vpop.permute.xlu1 %2598 }
0x1517   : > { %v2601_v19 = vmul.f32 %v2599_v49, %v2596_v46 }
0x1519   : > { %v2603_v36 = vadd.f32 %v2602_v53, %v2601_v19 }
0x151a   : > { %v936_v57 = vpop.permute.xlu1 %935  ;;  %v2717_v60 = vpop.permute.xlu0 %2716 }
0x151b   : > { %v2611_v51 = vsel %vm2609_vm6, %v2603_v36, 0.0  ;;  %939 = vst.msk [vmem:[%s3850_s25] sm:$0xf] %vm938_vm5, %v936_v57  ;;  %v2719_v62 = vmul.f32 %v2717_v60, %v2714_v44  ;;  %v2610_v8 = vsel %vm2609_vm6, %v2603_v36, %v4318_v47 }
0x151c   : > { %v3097_v63 = vpack.c.bf16 %v2611_v51, %v2611_v51 }
0x151d   : > { %v2721_v54 = vadd.f32 %v2720_v21, %v2719_v62 }
0x151e   : > { %2616 = vrot.lane.b32.xlu1 %v3097_v63, %s3653_s26  ;;  %v1177_v3 = vpop.permute.xlu1 %1176  ;;  %v1057_v4 = vpop.permute.xlu0 %1056 }
0x151f   : > { %v2729_v5 = vsel %vm2727_vm7, %v2721_v54, 0.0  ;;  %2972 = vst.msk [vmem:[%s3850_s25 + $0x4] sm:$0xf] %vm938_vm5, %v1177_v3  ;;  %2964 = vst.msk [vmem:[%s3852_s17 + $0x1c] sm:$0xf] %vm938_vm5, %v1057_v4  ;;  %v2728_v1 = vsel %vm2727_vm7, %v2721_v54, %v4326_v52 }
0x1520   : > { %v3098_v27 = vpack.c.bf16 %v2729_v5, %v2729_v5 }
0x1522   : > { %2739 = vrot.lane.b32.xlu1 %v2610_v8, %s3653_s26  ;;  %v1417_v28 = vpop.permute.xlu1 %1416  ;;  %2734 = vrot.lane.b32.xlu0 %v3098_v27, %s3653_s26  ;;  %v1297_v61 = vpop.permute.xlu0 %1296 }
0x1523   : > { %2988 = vst.msk [vmem:[%s3850_s25 + $0x8] sm:$0xf] %vm938_vm5, %v1417_v28  ;;  %2980 = vst.msk [vmem:[%s3852_s17 + $0x18] sm:$0xf] %vm938_vm5, %v1297_v61 }
0x1526   : > { %v1657_v11 = vpop.permute.xlu1 %1656  ;;  %2744 = vrot.lane.b32.xlu0 %v2728_v1, %s3653_s26  ;;  %v1537_v47 = vpop.permute.xlu0 %1536  ;;  %s3099_s26 = sshll.u32 %s3763_s15, 9 }
0x1527   : > { %3004 = vst.msk [vmem:[%s3850_s25 + $0xc] sm:$0xf] %vm938_vm5, %v1657_v11  ;;  %2996 = vst.msk [vmem:[%s3852_s17 + $0x14] sm:$0xf] %vm938_vm5, %v1537_v47  ;;  %s4437_s20 = scalar_lea.hbm %s4603_s28, %s3099_s26  ;;  %s3535_s26 = sshll.u32 %s3654_s30, 4  ;;  %s3536_s26 = int_to_ptr.vmem [resolvable:$false] %s3535_s26 }
0x1528   : > { %s3537_s22 = scalar_lea.vmem %s3536_s26, 1024  ;;  %p3538_p9 = scmp.lt.s32.totalorder %s4439_s21, %s3536_s26 }
0x1529   : > { %p3539_p10 = scmp.lt.s32.totalorder %s3537_s22, %s3531_s29 }
0x152a   : > { %v1897_v13 = vpop.permute.xlu1 %1896  ;;  %v1777_v14 = vpop.permute.xlu0 %1776 }
0x152b   : > { %3020 = vst.msk [vmem:[%s3850_s25 + $0x10] sm:$0xf] %vm938_vm5, %v1897_v13  ;;  %3012 = vst.msk [vmem:[%s3852_s17 + $0x10] sm:$0xf] %vm938_vm5, %v1777_v14  ;;  %p3540_p13 = por %p3539_p10, %p3538_p9 }
0x152d   : > { %p3541_p0 = pnand %p3540_p13, %p3534_p8 }
0x152e   : > { %v2137_v52 = vpop.permute.xlu1 %2136  ;;  %v2017_v17 = vpop.permute.xlu0 %2016 }
0x152f   : > { %3036 = vst.msk [vmem:[%s3850_s25 + $0x14] sm:$0xf] %vm938_vm5, %v2137_v52  ;;  %3028 = vst.msk [vmem:[%s3852_s17 + $0xc] sm:$0xf] %vm938_vm5, %v2017_v17 }
0x1532   : > { %v2377_v58 = vpop.permute.xlu1 %2376  ;;  %v2257_v7 = vpop.permute.xlu0 %2256 }
0x1533   : > { %3052 = vst.msk [vmem:[%s3850_s25 + $0x18] sm:$0xf] %vm938_vm5, %v2377_v58  ;;  %3044 = vst.msk [vmem:[%s3852_s17 + $0x8] sm:$0xf] %vm938_vm5, %v2257_v7 }
0x1536   : > { %v2497_v23 = vpop.permute.xlu0 %2496 }
0x1537   : > { %3060 = vst.msk [vmem:[%s3852_s17 + $0x4] sm:$0xf] %vm938_vm5, %v2497_v23 }
0x1590   : > { %v2617_v25 = vpop.permute.xlu1 %2616 }
0x1591   : > { %3068 = vst.msk [vmem:[%s3850_s25 + $0x1c] sm:$0xf] %vm938_vm5, %v2617_v25 }
0x1592   : > { %3544 = shalt.err (!%p3541_p0)
}
0x1593   : > { %s3545_s15 = scalar_lea.hbm %s4437_s20, 512  ;;  %s3549_s23 = scalar_lea.hbm %s4604_s19, 1024 }
0x1594   : > { %p3546_p1 = scmp.ne.s32.totalorder %s4437_s20, %s3545_s15  ;;  %p3550_p4 = scmp.lt.s32.totalorder %s4437_s20, %s4604_s19 }
0x1595   : > { %p3551_p7 = scmp.lt.s32.totalorder %s3549_s23, %s3545_s15 }
0x1596   : > { %p3547_p2 = pnand %p3546_p1, %p3786_p5 }
0x1597   : > { %p3552_p8 = por %p3551_p7, %p3550_p4 }
0x1598   : > { %p3548_p3 = pneg %p3547_p2 }
0x159a   : > { %p3553_p9 = pnand %p3552_p8, %p3548_p3 }
0x159c   : > { %3556 = shalt.err (!%p3553_p9)
}
0x159d   : > { %s3655_s27 = smov 4   ;;  %s4607_s29 = sld [smem:[#allocation13_spill]]  ;;  %v2740_v18 = vpop.permute.xlu1 %2739  ;;  %v2735_v12 = vpop.permute.xlu0 %2734 }
0x159e   : > { %3313 = dma.vmem_to_hbm [thread:$0]  (%p3786_p5), %s4439_s21, 512, %s4437_s20, %s4450_s24, %s3649_s14, %s3649_s14, %s3655_s27   ;;  %2742 = vst.msk [vmem:[#allocation2] sm:$0xff] %vm604_vm1, %v2740_v18 }
0x159f   : > { %s4609_s15 = sld [smem:[#allocation28_spill]]  ;;  %2737 = vst.msk [vmem:[%s3852_s17] sm:$0xf] %vm938_vm5, %v2735_v12  ;;  %s3557_s21 = scalar_lea.vmem %s4484_s10, 512 }
0x15a0   : > { %p3558_p5 = scmp.ne.s32.totalorder %s4484_s10, %s3557_s21  ;;  %s3656_s20 = smov [#allocation8]  }
0x15a2   : > { %p3559_p10 = pnand %p3558_p5, %p3809_p11 }
0x15a3   : > { %s4610_s16 = sand.u32 1, %s4607_s29  }
0x15a4   : > { %s2754_s18 = scalar_lea.sflag [#allocation9], %s4610_s16  ;;  %p3560_p13 = pneg %p3559_p10 }
0x15a5   : > { %s4480_s25 = scalar_lea.hbm %s4609_s15, %s4443_s13  ;;  %s3561_s13 = sshll.u32 %s3656_s20, 4  ;;  %s3562_s13 = int_to_ptr.vmem [resolvable:$false] %s3561_s13 }
0x15a6   : > { %s3563_s24 = scalar_lea.vmem %s3562_s13, 1024  ;;  %p3564_p0 = scmp.lt.s32.totalorder %s4484_s10, %s3562_s13 }
0x15a7   : > { %p3565_p1 = scmp.lt.s32.totalorder %s3563_s24, %s3557_s21 }
0x15a9   : > { %p3566_p2 = por %p3565_p1, %p3564_p0 }
0x15ab   : > { %p3567_p3 = pnand %p3566_p2, %p3560_p13 }
0x15ad   : > { %3570 = shalt.err (!%p3567_p3)
}
0x15ae   : > { %s3571_s17 = scalar_lea.hbm %s4480_s25, 512  ;;  %s3575_s12 = scalar_lea.hbm %s4609_s15, 1024 }
0x15af   : > { %p3572_p4 = scmp.ne.s32.totalorder %s4480_s25, %s3571_s17  ;;  %p3576_p9 = scmp.lt.s32.totalorder %s4480_s25, %s4609_s15 }
0x15b0   : > { %p3577_p5 = scmp.lt.s32.totalorder %s3575_s12, %s3571_s17 }
0x15b1   : > { %p3573_p7 = pnand %p3572_p4, %p3809_p11 }
0x15b2   : > { %p3578_p10 = por %p3577_p5, %p3576_p9 }
0x15b3   : > { %p3574_p8 = pneg %p3573_p7 }
0x15b5   : > { %p3579_p13 = pnand %p3578_p10, %p3574_p8 }
0x15b7   : > { %3582 = shalt.err (!%p3579_p13)
}
0x15b8   : > { %3314 = dma.vmem_to_hbm [thread:$0]  (%p3809_p11), %s4484_s10, 512, %s4480_s25, %s2754_s18, %s3649_s14, %s3649_s14, %s3655_s27   ;;  %v2745_v16 = vpop.permute.xlu0 %2744 }
0x15b9   : > { %2747 = vst.msk [vmem:[#allocation3] sm:$0xff] %vm604_vm1, %v2745_v16 }
0x15ba PF: > { %s4611_s22 = sld [smem:[#allocation18_spill]] }
0x15bb   : > { %s4612_s16 = sld [smem:[#allocation15_spill]] }
0x15c0   : > { %p3324_p0 = scmp.ge.s32.totalorder %s4611_s22, 2 }
0x15c1   : > { %s2799_s20 = sand.u32 1, %s4612_s16  }
0x15c2   : > { %p3318_p1 = pnand %p3324_p0, %p3792_p6  ;;  %s2800_s13 = scalar_lea.sflag [#allocation7], %s2799_s20 }
0x15c4   : > { %p3319_p2 = pneg %p3318_p1 }
0x15c6   : > { %3612 = dma.done.wait (%p3319_p2), %s2800_s13, 512  }
0x15c7   : > { %3614 = vsyncadd (%p3319_p2), %s2800_s13, 4294966784  ;;  %s4614_s30 = sld [smem:[#allocation12_spill]]  ;;  %p3321_p11 = pnand %p3324_p0, %p3815_p12 }
0x15c9   : > { %p3322_p3 = pneg %p3321_p11 }
0x15cd   : > { %s2808_s17 = sand.u32 1, %s4614_s30  }
0x15ce   : > { %s2809_s14 = scalar_lea.sflag [#allocation9], %s2808_s17 }
0x15cf   : > { %3616 = dma.done.wait (%p3322_p3), %s2809_s14, 512  }
0x15d0   : > { %3618 = vsyncadd (%p3322_p3), %s2809_s14, 4294966784  ;;  %s4616_s14 = sld [smem:[#allocation19_spill]] }
0x15d1   : > { %s4617_s25 = sld [smem:[#allocation13_spill]] }
0x15d2   : > { %s4618_s26 = sld [smem:[#allocation14_spill]] }
0x15d3   : > { %s4619_s27 = sld [smem:[#allocation23_spill]] }
0x15d4   : > { %s4620_s28 = sld [smem:[#allocation16_spill]] }
0x15d5   : > { %s4621_s29 = sld [smem:[#allocation17_spill]] }
0x15d6   : > { %s4622_s30 = sld [smem:[#allocation20_spill]]  ;;  %p27_p6 = scmp.ge.s32.totalorder %s4616_s14, 4  }
0x15d8   :  { %29 = sbr.rel (!%p27_p6) target bundleno = 11 (0xb), region = 175 }
0x15dd   :  { %2814 = vsyncpa [#allocation7], 1 }
0x15de   :  { %2816 = vsyncpa [#allocation7 + $0x1], 1 }
0x15df   :  { %2817 = vsyncpa [#allocation9], 1 }
0x15e0   :  { %2819 = vsyncpa [#allocation9 + $0x1], 1 }

</bundles_post_ra>
